<compile_context>
chip_gen: v7x
topology: tpu7x:2x2x1
jax: 0.10.0
libtpu: 0.0.40
codegen_flags: <defaults>
</compile_context>

<pallas_src>
import functools

import jax
import jax.numpy as jnp
from jax.experimental import pallas as pl
from jax.experimental.pallas import tpu as pltpu

BLOCK_NUM = 3
EMBED_NUM = 8
CONV_OUT = 128      # hardcoded in the PyTorch module
OUT_DIM = 64        # hardcoded in the PyTorch module
OUT_PAD = 128       # lane-dense padded output width
KSIZE = 3


def _round_up(v, m):
    return ((v + m - 1) // m) * m


def _shift2d(x2, k):
    """x2: (TB, Lp) -> t with t[:, l] = x2[:, l + k]; zero tail.
    x2 is tiny and lane-dense, so the slice+concat cost is negligible."""
    if k == 0:
        return x2
    return jnp.concatenate([x2[:, k:], jnp.zeros_like(x2[:, :k])], axis=1)


def _roll_len(h3, k, lp):
    """h3: (TB, Lp, C) f32 -> r with r[:, l, :] = h3[:, (l + k) mod Lp, :] (XLU roll)."""
    if k == 0:
        return h3
    return pltpu.roll(h3, shift=lp - k, axis=1)


def make_protein_cnn_kernel(block_num, valid_len, lp):
    """Kernel refs:
       [x(TB,Lp), wfold_all(3,NF), bfold_all(1,NF),
        (per block: [wcat(384,128) bf16, b(1,128) f32] * n_hidden),
        lw(NF,128), lb(1,128), out(TB,128)]  with NF = block_num*128."""

    def kernel(*refs):
        it = iter(refs)
        x_ref = next(it)                                  # (TB, Lp)      f32 lane-dense
        wf_ref = next(it)                                 # (3, NF)       f32 fused folded first conv
        bf_ref = next(it)                                 # (1, NF)       f32
        hidden = []
        for bi in range(block_num):
            hidden.append([(next(it), next(it)) for _ in range(bi)])
        lw_ref = next(it)                                 # (NF, 128)     f32 (N padded 64->128)
        lb_ref = next(it)                                 # (1, 128)      f32
        out_ref = next(it)                                # (TB, 128)     f32

        x2 = x_ref[...]                                   # (TB, Lp)
        tb = x2.shape[0]
        wf = wf_ref[...]                                  # (3, NF)

        # Static per-position index for masking the padded / invalid tail.
        pos = jax.lax.broadcasted_iota(jnp.int32, (1, lp, 1), 1)

        # ---- fused first conv for ALL blocks (embed Linear folded wrapper-side):
        #      3 VPU broadcast MACs of the shifted raw sequence, f32. ----
        acc = None
        for k in range(KSIZE):
            xk = _shift2d(x2, k)[:, :, None]              # (TB, Lp, 1)
            term = xk * wf[k:k + 1, :][None]              # (TB, Lp, NF)
            acc = term if acc is None else acc + term
        acc = acc + bf_ref[...][None]
        valid0 = valid_len - (KSIZE - 1)
        h0 = jnp.where(pos < valid0, jnp.maximum(acc, 0.0), 0.0)   # (TB, Lp, NF) f32

        feats = []
        for bi in range(block_num):
            h = h0[:, :, bi * CONV_OUT:(bi + 1) * CONV_OUT]        # (TB, Lp, 128) f32
            valid = valid0
            for wc_ref, bc_ref in hidden[bi]:
                # Conv1d(k=3) as 3 accumulating K=128 bf16 MXU matmuls on one bf16
                # copy of h; the tap shift is applied to the f32 results via an XLU
                # sublane roll (conv is linear: sum_k h[l+k] @ W_k == sum_k
                # roll(h @ W_k, -k)[l]); wrapped tail rows are zeroed by the mask.
                hb = h.astype(jnp.bfloat16).reshape(tb * lp, CONV_OUT)
                y = None
                for k in range(KSIZE):
                    yk = jnp.dot(hb, wc_ref[k * CONV_OUT:(k + 1) * CONV_OUT, :],
                                 preferred_element_type=jnp.float32)
                    yk = _roll_len(yk.reshape(tb, lp, CONV_OUT), k, lp)
                    y = yk if y is None else y + yk
                y = y + bc_ref[...][None]
                valid -= (KSIZE - 1)
                h = jnp.where(pos < valid, jnp.maximum(y, 0.0), 0.0)
            # AdaptiveMaxPool1d(1): global max over length (masked tail is 0 <= ReLU max).
            feats.append(jnp.max(h, axis=1))                       # (TB, 128)

        cat = jnp.concatenate(feats, axis=-1)                      # (TB, NF)
        out = jnp.dot(cat, lw_ref[...],
                      preferred_element_type=jnp.float32) + lb_ref[...]
        out_ref[...] = out.astype(out_ref.dtype)

    return kernel


def init_params(key, block_num=BLOCK_NUM, embed_num=EMBED_NUM):
    """Deterministic synthetic parameters (shapes match the nn.Module)."""
    keys = iter(jax.random.split(key, 64))

    def rnd(shape, scale=0.1):
        return scale * jax.random.normal(next(keys), shape, jnp.float32)

    params = {
        # nn.Linear(1, E): weight (E,1) stored transposed as (1,E); bias as (1,E)
        "embed": (rnd((1, embed_num)), rnd((1, embed_num))),
        "blocks": [],
        # nn.Linear(block_num*128, 64): weight stored as (N, 64); bias (1, 64)
        "linear": (rnd((block_num * CONV_OUT, OUT_DIM)), rnd((1, OUT_DIM))),
    }
    for bi in range(block_num):
        layers = []
        cin = embed_num
        for _ in range(bi + 1):
            # nn.Conv1d weight (Cout, Cin, K) stored as (K, Cin, Cout); bias (1, Cout)
            layers.append((rnd((KSIZE, cin, CONV_OUT)), rnd((1, CONV_OUT))))
            cin = CONV_OUT
        params["blocks"].append(layers)
    return params


def fold_and_flatten(params):
    """Fold embed Linear(1,E) into every block's first conv, fuse those across blocks,
    pack hidden conv weights as (384,128) bf16, pad the final Linear to 128 lanes."""
    ew, eb = params["embed"]                         # (1,E), (1,E)
    wfolds, bfolds, rest = [], [], []
    for layers in params["blocks"]:
        W0, b0 = layers[0]                           # (3, E, 128), (1, 128)
        # Wfold[k,c] = sum_e ew[e]*W0[k,e,c]; bfold[c] = b0[c] + sum_{k,e} eb[e]*W0[k,e,c]
        wfolds.append(jnp.einsum("e,kec->kc", ew[0], W0))
        bfolds.append(b0 + jnp.einsum("e,kec->c", eb[0], W0)[None, :])
        for W, b in layers[1:]:                      # (3, 128, 128), (1, 128)
            rest += [W.reshape(KSIZE * CONV_OUT, CONV_OUT).astype(jnp.bfloat16),
                     b.astype(jnp.float32)]
    flat = [jnp.concatenate(wfolds, axis=-1).astype(jnp.float32),   # (3, NF)
            jnp.concatenate(bfolds, axis=-1).astype(jnp.float32)]   # (1, NF)
    flat += rest
    lw, lb = params["linear"]                        # (NF, 64), (1, 64)
    flat += [jnp.pad(lw, ((0, 0), (0, OUT_PAD - OUT_DIM))).astype(jnp.float32),
             jnp.pad(lb, ((0, 0), (0, OUT_PAD - OUT_DIM))).astype(jnp.float32)]
    return flat


def _vmem_limit_bytes():
    mib = 1024 * 1024
    try:
        cap = pltpu.get_tpu_info().vmem_capacity_bytes
    except Exception:
        cap = 128 * mib
    # Leave headroom for double buffers / internal scratch:
    # ~40 MiB on v7x (64 MiB/TC), ~100 MiB on v5e/v6e (128 MiB).
    return max(32 * mib, min(cap - 24 * mib, 100 * mib))


@functools.partial(jax.jit, static_argnames=("block_num",))
def protein_cnn_forward(x, flat_inputs, block_num=BLOCK_NUM):
    """x: (B, L) f32 raw sequence values; flat_inputs from fold_and_flatten."""
    B, L = x.shape
    assert L - 2 * block_num >= 1, "sequence too short for the deepest block"
    lp = _round_up(L, 8)

    vmem_limit = _vmem_limit_bytes()
    # Rough live activation bytes per batch row inside one grid step: fused first conv
    # (block_num*128 ch, f32) plus ~3 working slabs of 128 ch (f32/f32/bf16).
    bytes_per_row = lp * CONV_OUT * (block_num * 4 + 12)
    tb = (vmem_limit // 2) // max(bytes_per_row, 1)
    tb = max(8, (min(tb, 256) // 8) * 8)
    b8 = _round_up(B, 8)
    tb = min(tb, b8)
    if b8 >= 16:            # keep >=2 grid steps: pipelining + v7x two-TensorCore split
        tb = min(tb, max(8, ((b8 // 2) // 8) * 8))
    b_pad = _round_up(b8, tb)

    xp = jnp.pad(x, ((0, b_pad - B), (0, lp - L)))    # (b_pad, lp), lane-dense

    kernel = make_protein_cnn_kernel(block_num, L, lp)

    in_specs = [pl.BlockSpec((tb, lp), lambda i: (i, 0))]
    for a in flat_inputs:   # weights stay resident across the grid (constant index_map)
        in_specs.append(pl.BlockSpec(a.shape, lambda i, _nd=a.ndim: (0,) * _nd))
    # NOTE: pipeline_mode=pl.Buffered(1) on the resident weight specs would shave a
    # few hundred KiB of double-buffering on v7x; skipped here as a negligible win.

    out = pl.pallas_call(
        kernel,
        grid=(b_pad // tb,),
        in_specs=in_specs,
        out_specs=pl.BlockSpec((tb, OUT_PAD), lambda i: (i, 0)),
        out_shape=jax.ShapeDtypeStruct((b_pad, OUT_PAD), jnp.float32),
        compiler_params=pltpu.CompilerParams(
            dimension_semantics=("parallel",),
            vmem_limit_bytes=int(vmem_limit)),
    )(xp, *flat_inputs)
    return out[:B, :OUT_DIM]


def protein_cnn_ref(x, params):
    """Pure-JAX reference (unfolded weights; same bf16 matmul precision as the kernel)."""
    ew, eb = params["embed"]
    h0 = x[:, :, None] * ew[None, :, :] + eb[None, :, :]          # (B, L, E)
    feats = []
    for layers in params["blocks"]:
        h = h0
        for li, (W, b) in enumerate(layers):
            Lout = h.shape[1] - (KSIZE - 1)
            taps = jnp.concatenate([h[:, k:k + Lout, :] for k in range(KSIZE)], axis=-1)
            Wr = W.reshape(KSIZE * W.shape[1], W.shape[2])
            if li == 0:
                y = jnp.einsum("blc,cd->bld", taps, Wr,
                               preferred_element_type=jnp.float32)
            else:
                y = jnp.einsum("blc,cd->bld", taps.astype(jnp.bfloat16),
                               Wr.astype(jnp.bfloat16),
                               preferred_element_type=jnp.float32)
            h = jnp.maximum(y + b[None, :, :], 0.0)
        feats.append(jnp.max(h, axis=1))
    cat = jnp.concatenate(feats, axis=-1)
    lw, lb = params["linear"]
    return jnp.dot(cat, lw, preferred_element_type=jnp.float32) + lb


if __name__ == "__main__":
    key = jax.random.PRNGKey(0)
    k_x, k_p = jax.random.split(key)

    B, L = 16, 32                     # small; L must exceed 2*block_num
    x = jax.random.normal(k_x, (B, L), jnp.float32)
    params = init_params(k_p)
    flat = fold_and_flatten(params)

    out = protein_cnn_forward(x, flat, block_num=BLOCK_NUM)
    out = jax.block_until_ready(out)

    ref = protein_cnn_ref(x, params)
    assert out.shape == (B, OUT_DIM), out.shape
    err = float(jnp.max(jnp.abs(out - ref)))
    assert jnp.allclose(out, ref, atol=5e-3, rtol=5e-3), err

    print("KERNEL_OK")
</pallas_src>

<mosaic_0001>
module attributes {stable_mosaic.version = 11 : i64} {
  func.func @kernel(%arg0: i32, %arg1: memref<8x32xf32, #tpu.memory_space<vmem>>, %arg2: memref<3x384xf32, #tpu.memory_space<vmem>>, %arg3: memref<1x384xf32, #tpu.memory_space<vmem>>, %arg4: memref<384x128xbf16, #tpu.memory_space<vmem>>, %arg5: memref<1x128xf32, #tpu.memory_space<vmem>>, %arg6: memref<384x128xbf16, #tpu.memory_space<vmem>>, %arg7: memref<1x128xf32, #tpu.memory_space<vmem>>, %arg8: memref<384x128xbf16, #tpu.memory_space<vmem>>, %arg9: memref<1x128xf32, #tpu.memory_space<vmem>>, %arg10: memref<384x128xf32, #tpu.memory_space<vmem>>, %arg11: memref<1x128xf32, #tpu.memory_space<vmem>>, %arg12: memref<8x128xf32, #tpu.memory_space<vmem>>) attributes {dimension_semantics = [#tpu.dimension_semantics<parallel>], iteration_bounds = array<i64: 2>, scalar_prefetch = 0 : i64, scratch_operands = 0 : i64, tpu.core_type = #tpu.core_type<tc>, window_params = [{transform_indices = @transform_0, window_bounds = array<i64: 8, 32>}, {pipeline_mode = #tpu.pipeline_mode<synchronous>, transform_indices = @transform_1, window_bounds = array<i64: 3, 384>}, {pipeline_mode = #tpu.pipeline_mode<synchronous>, transform_indices = @transform_2, window_bounds = array<i64: 1, 384>}, {pipeline_mode = #tpu.pipeline_mode<synchronous>, transform_indices = @transform_3, window_bounds = array<i64: 384, 128>}, {pipeline_mode = #tpu.pipeline_mode<synchronous>, transform_indices = @transform_4, window_bounds = array<i64: 1, 128>}, {pipeline_mode = #tpu.pipeline_mode<synchronous>, transform_indices = @transform_5, window_bounds = array<i64: 384, 128>}, {pipeline_mode = #tpu.pipeline_mode<synchronous>, transform_indices = @transform_6, window_bounds = array<i64: 1, 128>}, {pipeline_mode = #tpu.pipeline_mode<synchronous>, transform_indices = @transform_7, window_bounds = array<i64: 384, 128>}, {pipeline_mode = #tpu.pipeline_mode<synchronous>, transform_indices = @transform_8, window_bounds = array<i64: 1, 128>}, {pipeline_mode = #tpu.pipeline_mode<synchronous>, transform_indices = @transform_9, window_bounds = array<i64: 384, 128>}, {pipeline_mode = #tpu.pipeline_mode<synchronous>, transform_indices = @transform_10, window_bounds = array<i64: 1, 128>}, {transform_indices = @transform_11, window_bounds = array<i64: 8, 128>}]} {
    %c0 = arith.constant 0 : index
    %c0_0 = arith.constant 0 : index
    %0 = vector.load %arg1[%c0, %c0_0] : memref<8x32xf32, #tpu.memory_space<vmem>>, vector<8x32xf32>
    %c0_1 = arith.constant 0 : index
    %c0_2 = arith.constant 0 : index
    %1 = vector.load %arg2[%c0_1, %c0_2] : memref<3x384xf32, #tpu.memory_space<vmem>>, vector<3x384xf32>
    %2 = tpu.iota {dimensions = array<i32: 1>} : vector<1x32x1xi32>
    %3 = vector.shape_cast %0 : vector<8x32xf32> to vector<8x32x1xf32>
    %4 = vector.extract_strided_slice %1 {offsets = [0, 0], sizes = [1, 384], strides = [1, 1]} : vector<3x384xf32> to vector<1x384xf32>
    %5 = vector.shape_cast %4 : vector<1x384xf32> to vector<1x1x384xf32>
    %6 = vector.broadcast %3 : vector<8x32x1xf32> to vector<8x32x384xf32>
    %7 = vector.broadcast %5 : vector<1x1x384xf32> to vector<8x32x384xf32>
    %8 = arith.mulf %6, %7 : vector<8x32x384xf32>
    %9 = vector.extract_strided_slice %0 {offsets = [0, 1], sizes = [8, 31], strides = [1, 1]} : vector<8x32xf32> to vector<8x31xf32>
    %cst = arith.constant 0.000000e+00 : f32
    %10 = vector.broadcast %cst : f32 to vector<8x1xf32>
    %11 = tpu.concatenate %9, %10 in 1 : vector<8x31xf32>, vector<8x1xf32> -> vector<8x32xf32>
    %12 = vector.shape_cast %11 : vector<8x32xf32> to vector<8x32x1xf32>
    %13 = vector.extract_strided_slice %1 {offsets = [1, 0], sizes = [1, 384], strides = [1, 1]} : vector<3x384xf32> to vector<1x384xf32>
    %14 = vector.shape_cast %13 : vector<1x384xf32> to vector<1x1x384xf32>
    %15 = vector.broadcast %12 : vector<8x32x1xf32> to vector<8x32x384xf32>
    %16 = vector.broadcast %14 : vector<1x1x384xf32> to vector<8x32x384xf32>
    %17 = arith.mulf %15, %16 : vector<8x32x384xf32>
    %18 = arith.addf %8, %17 : vector<8x32x384xf32>
    %19 = vector.extract_strided_slice %0 {offsets = [0, 2], sizes = [8, 30], strides = [1, 1]} : vector<8x32xf32> to vector<8x30xf32>
    %cst_3 = arith.constant 0.000000e+00 : f32
    %20 = vector.broadcast %cst_3 : f32 to vector<8x2xf32>
    %21 = tpu.concatenate %19, %20 in 1 : vector<8x30xf32>, vector<8x2xf32> -> vector<8x32xf32>
    %22 = vector.shape_cast %21 : vector<8x32xf32> to vector<8x32x1xf32>
    %23 = vector.extract_strided_slice %1 {offsets = [2, 0], sizes = [1, 384], strides = [1, 1]} : vector<3x384xf32> to vector<1x384xf32>
    %24 = vector.shape_cast %23 : vector<1x384xf32> to vector<1x1x384xf32>
    %25 = vector.broadcast %22 : vector<8x32x1xf32> to vector<8x32x384xf32>
    %26 = vector.broadcast %24 : vector<1x1x384xf32> to vector<8x32x384xf32>
    %27 = arith.mulf %25, %26 : vector<8x32x384xf32>
    %28 = arith.addf %18, %27 : vector<8x32x384xf32>
    %c0_4 = arith.constant 0 : index
    %c0_5 = arith.constant 0 : index
    %29 = vector.load %arg3[%c0_4, %c0_5] : memref<1x384xf32, #tpu.memory_space<vmem>>, vector<1x384xf32>
    %30 = vector.shape_cast %29 : vector<1x384xf32> to vector<1x1x384xf32>
    %31 = vector.broadcast %30 : vector<1x1x384xf32> to vector<8x32x384xf32>
    %32 = arith.addf %28, %31 : vector<8x32x384xf32>
    %c30_i32 = arith.constant 30 : i32
    %33 = vector.broadcast %c30_i32 : i32 to vector<1x32x1xi32>
    %34 = arith.cmpi slt, %2, %33 : vector<1x32x1xi32>
    %cst_6 = arith.constant 0.000000e+00 : f32
    %35 = vector.broadcast %cst_6 : f32 to vector<8x32x384xf32>
    %36 = arith.maximumf %32, %35 : vector<8x32x384xf32>
    %cst_7 = arith.constant 0.000000e+00 : f32
    %37 = vector.shape_cast %34 : vector<1x32x1xi1> to vector<1x32x1xi1>
    %38 = vector.broadcast %37 : vector<1x32x1xi1> to vector<8x32x384xi1>
    %39 = vector.broadcast %cst_7 : f32 to vector<8x32x384xf32>
    %40 = arith.select %38, %36, %39 : vector<8x32x384xi1>, vector<8x32x384xf32>
    %41 = vector.extract_strided_slice %40 {offsets = [0, 0, 0], sizes = [8, 32, 128], strides = [1, 1, 1]} : vector<8x32x384xf32> to vector<8x32x128xf32>
    %cst_8 = arith.constant dense<0xFF800000> : vector<8x128xf32>
    %42 = vector.multi_reduction <maximumf>, %41, %cst_8 [1] : vector<8x32x128xf32> to vector<8x128xf32>
    %43 = vector.extract_strided_slice %40 {offsets = [0, 0, 128], sizes = [8, 32, 128], strides = [1, 1, 1]} : vector<8x32x384xf32> to vector<8x32x128xf32>
    %44 = arith.truncf %43 : vector<8x32x128xf32> to vector<8x32x128xbf16>
    %45 = vector.shape_cast %44 : vector<8x32x128xbf16> to vector<256x128xbf16>
    %c0_9 = arith.constant 0 : index
    %c0_10 = arith.constant 0 : index
    %46 = vector.load %arg4[%c0_9, %c0_10] : memref<384x128xbf16, #tpu.memory_space<vmem>>, vector<128x128xbf16>
    %cst_11 = arith.constant dense<0.000000e+00> : vector<256x128xf32>
    %47 = tpu.matmul %45, %46, %cst_11 {dimension_numbers = #tpu.dot_dimension_numbers<[1], [0], [0], [1], [0, 0, 1, 1], [], []>} : vector<256x128xbf16>, vector<128x128xbf16>, vector<256x128xf32> -> vector<256x128xf32>
    %48 = vector.shape_cast %47 : vector<256x128xf32> to vector<8x32x128xf32>
    %c128 = arith.constant 128 : index
    %c0_12 = arith.constant 0 : index
    %49 = vector.load %arg4[%c128, %c0_12] : memref<384x128xbf16, #tpu.memory_space<vmem>>, vector<128x128xbf16>
    %cst_13 = arith.constant dense<0.000000e+00> : vector<256x128xf32>
    %50 = tpu.matmul %45, %49, %cst_13 {dimension_numbers = #tpu.dot_dimension_numbers<[1], [0], [0], [1], [0, 0, 1, 1], [], []>} : vector<256x128xbf16>, vector<128x128xbf16>, vector<256x128xf32> -> vector<256x128xf32>
    %51 = vector.shape_cast %50 : vector<256x128xf32> to vector<8x32x128xf32>
    %c31_i32 = arith.constant 31 : i32
    %52 = tpu.dynamic_rotate %51 by %c31_i32 dim 1 : vector<8x32x128xf32>, i32 -> vector<8x32x128xf32>
    %53 = arith.addf %48, %52 : vector<8x32x128xf32>
    %c256 = arith.constant 256 : index
    %c0_14 = arith.constant 0 : index
    %54 = vector.load %arg4[%c256, %c0_14] : memref<384x128xbf16, #tpu.memory_space<vmem>>, vector<128x128xbf16>
    %cst_15 = arith.constant dense<0.000000e+00> : vector<256x128xf32>
    %55 = tpu.matmul %45, %54, %cst_15 {dimension_numbers = #tpu.dot_dimension_numbers<[1], [0], [0], [1], [0, 0, 1, 1], [], []>} : vector<256x128xbf16>, vector<128x128xbf16>, vector<256x128xf32> -> vector<256x128xf32>
    %56 = vector.shape_cast %55 : vector<256x128xf32> to vector<8x32x128xf32>
    %c30_i32_16 = arith.constant 30 : i32
    %57 = tpu.dynamic_rotate %56 by %c30_i32_16 dim 1 : vector<8x32x128xf32>, i32 -> vector<8x32x128xf32>
    %58 = arith.addf %53, %57 : vector<8x32x128xf32>
    %c0_17 = arith.constant 0 : index
    %c0_18 = arith.constant 0 : index
    %59 = vector.load %arg5[%c0_17, %c0_18] : memref<1x128xf32, #tpu.memory_space<vmem>>, vector<1x128xf32>
    %60 = vector.shape_cast %59 : vector<1x128xf32> to vector<1x1x128xf32>
    %61 = vector.broadcast %60 : vector<1x1x128xf32> to vector<8x32x128xf32>
    %62 = arith.addf %58, %61 : vector<8x32x128xf32>
    %c28_i32 = arith.constant 28 : i32
    %63 = vector.broadcast %c28_i32 : i32 to vector<1x32x1xi32>
    %64 = arith.cmpi slt, %2, %63 : vector<1x32x1xi32>
    %cst_19 = arith.constant 0.000000e+00 : f32
    %65 = vector.broadcast %cst_19 : f32 to vector<8x32x128xf32>
    %66 = arith.maximumf %62, %65 : vector<8x32x128xf32>
    %cst_20 = arith.constant 0.000000e+00 : f32
    %67 = vector.shape_cast %64 : vector<1x32x1xi1> to vector<1x32x1xi1>
    %68 = vector.broadcast %67 : vector<1x32x1xi1> to vector<8x32x128xi1>
    %69 = vector.broadcast %cst_20 : f32 to vector<8x32x128xf32>
    %70 = arith.select %68, %66, %69 : vector<8x32x128xi1>, vector<8x32x128xf32>
    %cst_21 = arith.constant dense<0xFF800000> : vector<8x128xf32>
    %71 = vector.multi_reduction <maximumf>, %70, %cst_21 [1] : vector<8x32x128xf32> to vector<8x128xf32>
    %72 = vector.extract_strided_slice %40 {offsets = [0, 0, 256], sizes = [8, 32, 128], strides = [1, 1, 1]} : vector<8x32x384xf32> to vector<8x32x128xf32>
    %73 = arith.truncf %72 : vector<8x32x128xf32> to vector<8x32x128xbf16>
    %74 = vector.shape_cast %73 : vector<8x32x128xbf16> to vector<256x128xbf16>
    %c0_22 = arith.constant 0 : index
    %c0_23 = arith.constant 0 : index
    %75 = vector.load %arg6[%c0_22, %c0_23] : memref<384x128xbf16, #tpu.memory_space<vmem>>, vector<128x128xbf16>
    %cst_24 = arith.constant dense<0.000000e+00> : vector<256x128xf32>
    %76 = tpu.matmul %74, %75, %cst_24 {dimension_numbers = #tpu.dot_dimension_numbers<[1], [0], [0], [1], [0, 0, 1, 1], [], []>} : vector<256x128xbf16>, vector<128x128xbf16>, vector<256x128xf32> -> vector<256x128xf32>
    %77 = vector.shape_cast %76 : vector<256x128xf32> to vector<8x32x128xf32>
    %c128_25 = arith.constant 128 : index
    %c0_26 = arith.constant 0 : index
    %78 = vector.load %arg6[%c128_25, %c0_26] : memref<384x128xbf16, #tpu.memory_space<vmem>>, vector<128x128xbf16>
    %cst_27 = arith.constant dense<0.000000e+00> : vector<256x128xf32>
    %79 = tpu.matmul %74, %78, %cst_27 {dimension_numbers = #tpu.dot_dimension_numbers<[1], [0], [0], [1], [0, 0, 1, 1], [], []>} : vector<256x128xbf16>, vector<128x128xbf16>, vector<256x128xf32> -> vector<256x128xf32>
    %80 = vector.shape_cast %79 : vector<256x128xf32> to vector<8x32x128xf32>
    %c31_i32_28 = arith.constant 31 : i32
    %81 = tpu.dynamic_rotate %80 by %c31_i32_28 dim 1 : vector<8x32x128xf32>, i32 -> vector<8x32x128xf32>
    %82 = arith.addf %77, %81 : vector<8x32x128xf32>
    %c256_29 = arith.constant 256 : index
    %c0_30 = arith.constant 0 : index
    %83 = vector.load %arg6[%c256_29, %c0_30] : memref<384x128xbf16, #tpu.memory_space<vmem>>, vector<128x128xbf16>
    %cst_31 = arith.constant dense<0.000000e+00> : vector<256x128xf32>
    %84 = tpu.matmul %74, %83, %cst_31 {dimension_numbers = #tpu.dot_dimension_numbers<[1], [0], [0], [1], [0, 0, 1, 1], [], []>} : vector<256x128xbf16>, vector<128x128xbf16>, vector<256x128xf32> -> vector<256x128xf32>
    %85 = vector.shape_cast %84 : vector<256x128xf32> to vector<8x32x128xf32>
    %c30_i32_32 = arith.constant 30 : i32
    %86 = tpu.dynamic_rotate %85 by %c30_i32_32 dim 1 : vector<8x32x128xf32>, i32 -> vector<8x32x128xf32>
    %87 = arith.addf %82, %86 : vector<8x32x128xf32>
    %c0_33 = arith.constant 0 : index
    %c0_34 = arith.constant 0 : index
    %88 = vector.load %arg7[%c0_33, %c0_34] : memref<1x128xf32, #tpu.memory_space<vmem>>, vector<1x128xf32>
    %89 = vector.shape_cast %88 : vector<1x128xf32> to vector<1x1x128xf32>
    %90 = vector.broadcast %89 : vector<1x1x128xf32> to vector<8x32x128xf32>
    %91 = arith.addf %87, %90 : vector<8x32x128xf32>
    %c28_i32_35 = arith.constant 28 : i32
    %92 = vector.broadcast %c28_i32_35 : i32 to vector<1x32x1xi32>
    %93 = arith.cmpi slt, %2, %92 : vector<1x32x1xi32>
    %cst_36 = arith.constant 0.000000e+00 : f32
    %94 = vector.broadcast %cst_36 : f32 to vector<8x32x128xf32>
    %95 = arith.maximumf %91, %94 : vector<8x32x128xf32>
    %cst_37 = arith.constant 0.000000e+00 : f32
    %96 = vector.shape_cast %93 : vector<1x32x1xi1> to vector<1x32x1xi1>
    %97 = vector.broadcast %96 : vector<1x32x1xi1> to vector<8x32x128xi1>
    %98 = vector.broadcast %cst_37 : f32 to vector<8x32x128xf32>
    %99 = arith.select %97, %95, %98 : vector<8x32x128xi1>, vector<8x32x128xf32>
    %100 = arith.truncf %99 : vector<8x32x128xf32> to vector<8x32x128xbf16>
    %101 = vector.shape_cast %100 : vector<8x32x128xbf16> to vector<256x128xbf16>
    %c0_38 = arith.constant 0 : index
    %c0_39 = arith.constant 0 : index
    %102 = vector.load %arg8[%c0_38, %c0_39] : memref<384x128xbf16, #tpu.memory_space<vmem>>, vector<128x128xbf16>
    %cst_40 = arith.constant dense<0.000000e+00> : vector<256x128xf32>
    %103 = tpu.matmul %101, %102, %cst_40 {dimension_numbers = #tpu.dot_dimension_numbers<[1], [0], [0], [1], [0, 0, 1, 1], [], []>} : vector<256x128xbf16>, vector<128x128xbf16>, vector<256x128xf32> -> vector<256x128xf32>
    %104 = vector.shape_cast %103 : vector<256x128xf32> to vector<8x32x128xf32>
    %c128_41 = arith.constant 128 : index
    %c0_42 = arith.constant 0 : index
    %105 = vector.load %arg8[%c128_41, %c0_42] : memref<384x128xbf16, #tpu.memory_space<vmem>>, vector<128x128xbf16>
    %cst_43 = arith.constant dense<0.000000e+00> : vector<256x128xf32>
    %106 = tpu.matmul %101, %105, %cst_43 {dimension_numbers = #tpu.dot_dimension_numbers<[1], [0], [0], [1], [0, 0, 1, 1], [], []>} : vector<256x128xbf16>, vector<128x128xbf16>, vector<256x128xf32> -> vector<256x128xf32>
    %107 = vector.shape_cast %106 : vector<256x128xf32> to vector<8x32x128xf32>
    %c31_i32_44 = arith.constant 31 : i32
    %108 = tpu.dynamic_rotate %107 by %c31_i32_44 dim 1 : vector<8x32x128xf32>, i32 -> vector<8x32x128xf32>
    %109 = arith.addf %104, %108 : vector<8x32x128xf32>
    %c256_45 = arith.constant 256 : index
    %c0_46 = arith.constant 0 : index
    %110 = vector.load %arg8[%c256_45, %c0_46] : memref<384x128xbf16, #tpu.memory_space<vmem>>, vector<128x128xbf16>
    %cst_47 = arith.constant dense<0.000000e+00> : vector<256x128xf32>
    %111 = tpu.matmul %101, %110, %cst_47 {dimension_numbers = #tpu.dot_dimension_numbers<[1], [0], [0], [1], [0, 0, 1, 1], [], []>} : vector<256x128xbf16>, vector<128x128xbf16>, vector<256x128xf32> -> vector<256x128xf32>
    %112 = vector.shape_cast %111 : vector<256x128xf32> to vector<8x32x128xf32>
    %c30_i32_48 = arith.constant 30 : i32
    %113 = tpu.dynamic_rotate %112 by %c30_i32_48 dim 1 : vector<8x32x128xf32>, i32 -> vector<8x32x128xf32>
    %114 = arith.addf %109, %113 : vector<8x32x128xf32>
    %c0_49 = arith.constant 0 : index
    %c0_50 = arith.constant 0 : index
    %115 = vector.load %arg9[%c0_49, %c0_50] : memref<1x128xf32, #tpu.memory_space<vmem>>, vector<1x128xf32>
    %116 = vector.shape_cast %115 : vector<1x128xf32> to vector<1x1x128xf32>
    %117 = vector.broadcast %116 : vector<1x1x128xf32> to vector<8x32x128xf32>
    %118 = arith.addf %114, %117 : vector<8x32x128xf32>
    %c26_i32 = arith.constant 26 : i32
    %119 = vector.broadcast %c26_i32 : i32 to vector<1x32x1xi32>
    %120 = arith.cmpi slt, %2, %119 : vector<1x32x1xi32>
    %cst_51 = arith.constant 0.000000e+00 : f32
    %121 = vector.broadcast %cst_51 : f32 to vector<8x32x128xf32>
    %122 = arith.maximumf %118, %121 : vector<8x32x128xf32>
    %cst_52 = arith.constant 0.000000e+00 : f32
    %123 = vector.shape_cast %120 : vector<1x32x1xi1> to vector<1x32x1xi1>
    %124 = vector.broadcast %123 : vector<1x32x1xi1> to vector<8x32x128xi1>
    %125 = vector.broadcast %cst_52 : f32 to vector<8x32x128xf32>
    %126 = arith.select %124, %122, %125 : vector<8x32x128xi1>, vector<8x32x128xf32>
    %cst_53 = arith.constant dense<0xFF800000> : vector<8x128xf32>
    %127 = vector.multi_reduction <maximumf>, %126, %cst_53 [1] : vector<8x32x128xf32> to vector<8x128xf32>
    %128 = tpu.concatenate %42, %71, %127 in 1 : vector<8x128xf32>, vector<8x128xf32>, vector<8x128xf32> -> vector<8x384xf32>
    %c0_54 = arith.constant 0 : index
    %c0_55 = arith.constant 0 : index
    %129 = vector.load %arg10[%c0_54, %c0_55] : memref<384x128xf32, #tpu.memory_space<vmem>>, vector<384x128xf32>
    %cst_56 = arith.constant dense<0.000000e+00> : vector<8x128xf32>
    %130 = tpu.matmul %128, %129, %cst_56 {dimension_numbers = #tpu.dot_dimension_numbers<[1], [0], [0], [1], [0, 0, 1, 1], [], []>} : vector<8x384xf32>, vector<384x128xf32>, vector<8x128xf32> -> vector<8x128xf32>
    %c0_57 = arith.constant 0 : index
    %c0_58 = arith.constant 0 : index
    %131 = vector.load %arg11[%c0_57, %c0_58] : memref<1x128xf32, #tpu.memory_space<vmem>>, vector<1x128xf32>
    %132 = vector.broadcast %131 : vector<1x128xf32> to vector<8x128xf32>
    %133 = arith.addf %130, %132 : vector<8x128xf32>
    %c0_59 = arith.constant 0 : index
    %c0_60 = arith.constant 0 : index
    %134 = vector.load %arg12[%c0_59, %c0_60] : memref<8x128xf32, #tpu.memory_space<vmem>>, vector<8x128xf32>
    tpu.vector_store %arg12[%c0_59, %c0_60], %133 {strides = array<i32>} : memref<8x128xf32, #tpu.memory_space<vmem>>, vector<8x128xf32>,
    return
  }
  func.func @transform_0(%arg0: i32) -> (i32, i32) {
    %c0_i32 = arith.constant 0 : i32
    %c0_i32_0 = arith.constant 0 : i32
    return %arg0, %c0_i32 : i32, i32
  }
  func.func @transform_1(%arg0: i32) -> (i32, i32) {
    %c0_i32 = arith.constant 0 : i32
    %c0_i32_0 = arith.constant 0 : i32
    %c0_i32_1 = arith.constant 0 : i32
    return %c0_i32, %c0_i32_0 : i32, i32
  }
  func.func @transform_2(%arg0: i32) -> (i32, i32) {
    %c0_i32 = arith.constant 0 : i32
    %c0_i32_0 = arith.constant 0 : i32
    %c0_i32_1 = arith.constant 0 : i32
    return %c0_i32, %c0_i32_0 : i32, i32
  }
  func.func @transform_3(%arg0: i32) -> (i32, i32) {
    %c0_i32 = arith.constant 0 : i32
    %c0_i32_0 = arith.constant 0 : i32
    %c0_i32_1 = arith.constant 0 : i32
    return %c0_i32, %c0_i32_0 : i32, i32
  }
  func.func @transform_4(%arg0: i32) -> (i32, i32) {
    %c0_i32 = arith.constant 0 : i32
    %c0_i32_0 = arith.constant 0 : i32
    %c0_i32_1 = arith.constant 0 : i32
    return %c0_i32, %c0_i32_0 : i32, i32
  }
  func.func @transform_5(%arg0: i32) -> (i32, i32) {
    %c0_i32 = arith.constant 0 : i32
    %c0_i32_0 = arith.constant 0 : i32
    %c0_i32_1 = arith.constant 0 : i32
    return %c0_i32, %c0_i32_0 : i32, i32
  }
  func.func @transform_6(%arg0: i32) -> (i32, i32) {
    %c0_i32 = arith.constant 0 : i32
    %c0_i32_0 = arith.constant 0 : i32
    %c0_i32_1 = arith.constant 0 : i32
    return %c0_i32, %c0_i32_0 : i32, i32
  }
  func.func @transform_7(%arg0: i32) -> (i32, i32) {
    %c0_i32 = arith.constant 0 : i32
    %c0_i32_0 = arith.constant 0 : i32
    %c0_i32_1 = arith.constant 0 : i32
    return %c0_i32, %c0_i32_0 : i32, i32
  }
  func.func @transform_8(%arg0: i32) -> (i32, i32) {
    %c0_i32 = arith.constant 0 : i32
    %c0_i32_0 = arith.constant 0 : i32
    %c0_i32_1 = arith.constant 0 : i32
    return %c0_i32, %c0_i32_0 : i32, i32
  }
  func.func @transform_9(%arg0: i32) -> (i32, i32) {
    %c0_i32 = arith.constant 0 : i32
    %c0_i32_0 = arith.constant 0 : i32
    %c0_i32_1 = arith.constant 0 : i32
    return %c0_i32, %c0_i32_0 : i32, i32
  }
  func.func @transform_10(%arg0: i32) -> (i32, i32) {
    %c0_i32 = arith.constant 0 : i32
    %c0_i32_0 = arith.constant 0 : i32
    %c0_i32_1 = arith.constant 0 : i32
    return %c0_i32, %c0_i32_0 : i32, i32
  }
  func.func @transform_11(%arg0: i32) -> (i32, i32) {
    %c0_i32 = arith.constant 0 : i32
    %c0_i32_0 = arith.constant 0 : i32
    return %arg0, %c0_i32 : i32, i32
  }
}

</mosaic_0001>

<bundles_post_ra>
// kernel: protein_cnn_forward.1
= control target key start
LH: loop header
LB: loop body
LE: loop exit
PB: predicated region body
PF: predicated region fallthrough
CT: control target
= control target key end

     0   :  { %s10473_s0 = inlined_call_operand.hbm [shape: f32[16,32], index: 0, kind: input, shape index: {}]   ;;  %s10474_s1 = inlined_call_operand.hbm [shape: f32[3,384], index: 1, kind: input, shape index: {}]   ;;  %s10475_s2 = inlined_call_operand.hbm [shape: f32[1,384], index: 2, kind: input, shape index: {}]   ;;  %s10476_s3 = inlined_call_operand.hbm [shape: bf16[384,128], index: 3, kind: input, shape index: {}]   ;;  %s10477_s4 = inlined_call_operand.hbm [shape: f32[1,128], index: 4, kind: input, shape index: {}]   ;;  %s10478_s5 = inlined_call_operand.hbm [shape: bf16[384,128], index: 5, kind: input, shape index: {}]   ;;  %s10479_s6 = inlined_call_operand.hbm [shape: f32[1,128], index: 6, kind: input, shape index: {}]   ;;  %s10480_s7 = inlined_call_operand.hbm [shape: bf16[384,128], index: 7, kind: input, shape index: {}]   ;;  %s10481_s8 = inlined_call_operand.hbm [shape: f32[1,128], index: 8, kind: input, shape index: {}]   ;;  %s10482_s9 = inlined_call_operand.hbm [shape: f32[384,128], index: 9, kind: input, shape index: {}]   ;;  %s10483_s10 = inlined_call_operand.hbm [shape: f32[1,128], index: 10, kind: input, shape index: {}]   ;;  %s10484_s11 = inlined_call_operand.hbm [shape: f32[16,128], index: 11, kind: output, shape index: {}]  }
   0x1   :  { %10541 = sst [smem:[#allocation75_spill]] %s10474_s1 }
   0x2   :  { %10542 = sst [smem:[#allocation76_spill]] %s10476_s3 }
   0x3   :  { %10543 = sst [smem:[#allocation77_spill]] %s10478_s5 }
   0x4   :  { %10544 = sst [smem:[#allocation78_spill]] %s10484_s11 }
   0x5   :  { %16 = vsyncpa [#allocation3], 0 }
   0x6   :  { %18 = vsyncpa [#allocation3 + $0x1], 0 }
   0x7   :  { %19 = vsyncpa [#allocation6], 0 }
   0x8   :  { %20 = vsyncpa [#allocation9], 0 }
   0x9   :  { %21 = vsyncpa [#allocation12], 0 }
   0xa   :  { %22 = vsyncpa [#allocation15], 0 }
   0xb   :  { %23 = vsyncpa [#allocation18], 0 }
   0xc   :  { %24 = vsyncpa [#allocation4], 0 }
   0xd   :  { %26 = vsyncpa [#allocation4 + $0x1], 0  ;;  %s7347_s17 = smov 0   ;;  %s7349_s18 = smov 0  }
   0xe   :  { %s7351_s19 = smov 0   ;;  %s7353_s20 = smov 0  }
   0xf LB: > { %s7265_s21 = smov [#allocation5]   ;;  %s7368_s23 = sadd.s32 4294967295, %s7263_s20   ;;  %s7263_s20 = sphi %s7353_s20, %s10827_s20   ;;  %s7259_s19 = sphi %s7351_s19, %s10826_s19   ;;  %s7255_s18 = sphi %s7349_s18, %s10825_s18   ;;  %s7251_s17 = sphi %s7347_s17, %s10824_s17  }
  0x10   : > { %s312_s22 = sshll.u32 %s7265_s21, 4  ;;  %p5522_p0 = scmp.ge.s32.totalorder %s7263_s20, 1  ;;  %s313_s22 = int_to_ptr.vmem [resolvable:$true] %s312_s22 }
  0x11   : > { %p10485_p1 = scmp.eq.s32.totalorder %s7368_s23, 0  ;;  %p299_p2 = scmp.lt.s32.totalorder %s7263_s20, 3 }
  0x12   : > { %s7266_s25 = smov [#allocation8]   ;;  %s7267_s28 = smov [#allocation11]  }
  0x13   : > { %p7373_p3 = pnand %p5522_p0, %p299_p2  ;;  %s333_s26 = sshll.u32 %s7266_s25, 4  ;;  %s7380_s26 = int_to_ptr.vmem [resolvable:$true] %s333_s26 }
  0x14   : > { %s357_s29 = sshll.u32 %s7267_s28, 4  ;;  %s10548_s1 = sld [smem:[#allocation75_spill]]  ;;  %s7388_s29 = int_to_ptr.vmem [resolvable:$true] %s357_s29 }
  0x15   : > { %s10545_s24 = scalar_select %p7373_p3, 1, 0 }
  0x16   : > { %p6680_p5 = pneg %p7373_p3 }
  0x17   : > { %10546 = sst [smem:[#allocation28_spill]] %s10545_s24 }
  0x18   : > { %p7384_p6 = pnand %p6680_p5, %p10485_p1 }
  0x1a   : > { %s6867_s13 = scalar_lea.hbm %s10548_s1, 192  ;;  %p7398_p8 = pneg %p7384_p6 }
  0x1b   : > { %p6868_p7 = scmp.ne.s32.totalorder %s10548_s1, %s6867_s13  ;;  %p6874_p11 = scmp.lt.u32.totalorder %s6867_s13, %s10548_s1 }
  0x1d   : > { %p6870_p9 = pnand %p7398_p8, %p6868_p7 }
  0x1f   : > { %p6871_p10 = pneg %p6870_p9 }
  0x21   : > { %p6876_p12 = pnand %p6874_p11, %p6871_p10 }
  0x23   : > { %6879 = shalt.err (!%p6876_p12)
}
  0x24   : > { %s6880_s28 = scalar_lea.vmem %s313_s22, 192  ;;  %p6888_p5 = scmp.lt.s32.totalorder %s313_s22, %s313_s22 }
  0x25   : > { %p6881_p13 = scmp.ne.s32.totalorder %s313_s22, %s6880_s28  ;;  %p6889_p4 = scmp.lt.s32.totalorder %s6880_s28, %s6880_s28 }
  0x27   : > { %p6883_p0 = pnand %p6881_p13, %p7398_p8  ;;  %p6890_p1 = por %p6889_p4, %p6888_p5 }
  0x29   : > { %p6884_p2 = pneg %p6883_p0 }
  0x2b   : > { %p6891_p3 = pnand %p6890_p1, %p6884_p2 }
  0x2d   : > { %6894 = shalt.err (!%p6891_p3)
}
  0x2e   : > { %6683 = dma.hbm_to_vmem [thread:$0]  (!%p7384_p6), %s10548_s1, 192, %s313_s22, [#allocation6]  }
  0x2f   : > { %s10550_s3 = sld [smem:[#allocation76_spill]] }
  0x35   : > { %s6895_s15 = scalar_lea.hbm %s10550_s3, 3072 }
  0x36   : > { %p6896_p7 = scmp.ne.s32.totalorder %s10550_s3, %s6895_s15  ;;  %p6902_p1 = scmp.lt.u32.totalorder %s6895_s15, %s10550_s3 }
  0x38   : > { %p6898_p9 = pnand %p6896_p7, %p7398_p8 }
  0x3a   : > { %p6899_p4 = pneg %p6898_p9 }
  0x3c   : > { %p6904_p3 = pnand %p6902_p1, %p6899_p4 }
  0x3e   : > { %6907 = shalt.err (!%p6904_p3)
}
  0x3f   : > { %s6908_s22 = scalar_lea.vmem %s7380_s26, 3072  ;;  %p6916_p13 = scmp.lt.s32.totalorder %s7380_s26, %s7380_s26 }
  0x40   : > { %p6909_p10 = scmp.ne.s32.totalorder %s7380_s26, %s6908_s22  ;;  %p6917_p0 = scmp.lt.s32.totalorder %s6908_s22, %s6908_s22 }
  0x42   : > { %p6911_p11 = pnand %p6909_p10, %p7398_p8  ;;  %p6918_p2 = por %p6917_p0, %p6916_p13 }
  0x44   : > { %p6912_p12 = pneg %p6911_p11 }
  0x46   : > { %p6919_p5 = pnand %p6918_p2, %p6912_p12 }
  0x48   : > { %6922 = shalt.err (!%p6919_p5)
}
  0x49   : > { %s7268_s30 = smov 64   ;;  %s7269_s11 = smov 4  }
  0x4a   : > { %6689 = dma.hbm_to_vmem [thread:$0]  (!%p7384_p6), %s10550_s3, 3072, %s7380_s26, [#allocation9], %s7268_s30, %s7268_s30, %s7269_s11  }
  0x4b   : > { %s10551_s5 = sld [smem:[#allocation77_spill]] }
  0x51   : > { %s6923_s21 = scalar_lea.hbm %s10551_s5, 3072 }
  0x52   : > { %p6924_p7 = scmp.ne.s32.totalorder %s10551_s5, %s6923_s21  ;;  %p6930_p1 = scmp.lt.u32.totalorder %s6923_s21, %s10551_s5 }
  0x54   : > { %p6926_p9 = pnand %p6924_p7, %p7398_p8 }
  0x56   : > { %p6927_p4 = pneg %p6926_p9 }
  0x58   : > { %p6932_p3 = pnand %p6930_p1, %p6927_p4 }
  0x5a   : > { %6935 = shalt.err (!%p6932_p3)
}
  0x5b   : > { %s6936_s26 = scalar_lea.vmem %s7388_s29, 3072  ;;  %p6944_p13 = scmp.lt.s32.totalorder %s7388_s29, %s7388_s29 }
  0x5c   : > { %p6937_p10 = scmp.ne.s32.totalorder %s7388_s29, %s6936_s26  ;;  %p6945_p0 = scmp.lt.s32.totalorder %s6936_s26, %s6936_s26 }
  0x5e   : > { %p6939_p11 = pnand %p6937_p10, %p7398_p8  ;;  %p6946_p2 = por %p6945_p0, %p6944_p13 }
  0x60   : > { %p6940_p12 = pneg %p6939_p11 }
  0x62   : > { %p6947_p5 = pnand %p6946_p2, %p6940_p12 }
  0x64   : > { %6950 = shalt.err (!%p6947_p5)
}
  0x65   : > { %6695 = dma.hbm_to_vmem [thread:$0]  (!%p7384_p6), %s10551_s5, 3072, %s7388_s29, [#allocation12], %s7268_s30, %s7268_s30, %s7269_s11  }
  0x66   : > { %s7270_s13 = smov [#allocation14]   ;;  %s7271_s15 = smov [#allocation17]  }
  0x67   : > { %s381_s14 = sshll.u32 %s7270_s13, 4  ;;  %s405_s21 = sshll.u32 %s7271_s15, 4  ;;  %s382_s14 = int_to_ptr.vmem [resolvable:$true] %s381_s14  ;;  %s406_s21 = int_to_ptr.vmem [resolvable:$true] %s405_s21 }
  0x68   : > { %s6951_s22 = scalar_lea.hbm %s10480_s7, 3072 }
  0x69   : > { %p6952_p7 = scmp.ne.s32.totalorder %s10480_s7, %s6951_s22  ;;  %p6958_p1 = scmp.lt.u32.totalorder %s6951_s22, %s10480_s7 }
  0x6b   : > { %p6954_p9 = pnand %p6952_p7, %p7398_p8 }
  0x6d   : > { %p6955_p4 = pneg %p6954_p9 }
  0x6f   : > { %p6960_p3 = pnand %p6958_p1, %p6955_p4 }
  0x71   : > { %6963 = shalt.err (!%p6960_p3)
}
  0x72   : > { %s6964_s29 = scalar_lea.vmem %s382_s14, 3072  ;;  %p6972_p13 = scmp.lt.s32.totalorder %s382_s14, %s382_s14 }
  0x73   : > { %p6965_p10 = scmp.ne.s32.totalorder %s382_s14, %s6964_s29  ;;  %p6973_p0 = scmp.lt.s32.totalorder %s6964_s29, %s6964_s29 }
  0x75   : > { %p6967_p11 = pnand %p6965_p10, %p7398_p8  ;;  %p6974_p2 = por %p6973_p0, %p6972_p13 }
  0x77   : > { %p6968_p12 = pneg %p6967_p11 }
  0x79   : > { %p6975_p5 = pnand %p6974_p2, %p6968_p12 }
  0x7b   : > { %6978 = shalt.err (!%p6975_p5)
}
  0x7c   : > { %6701 = dma.hbm_to_vmem [thread:$0]  (!%p7384_p6), %s10480_s7, 3072, %s382_s14, [#allocation15], %s7268_s30, %s7268_s30, %s7269_s11  }
  0x7d   : > { %s6979_s15 = scalar_lea.hbm %s10482_s9, 6144 }
  0x7e   : > { %p6980_p7 = scmp.ne.s32.totalorder %s10482_s9, %s6979_s15  ;;  %p6986_p1 = scmp.lt.u32.totalorder %s6979_s15, %s10482_s9 }
  0x80   : > { %p6982_p9 = pnand %p6980_p7, %p7398_p8 }
  0x82   : > { %p6983_p4 = pneg %p6982_p9 }
  0x84   : > { %p6988_p3 = pnand %p6986_p1, %p6983_p4 }
  0x86   : > { %6991 = shalt.err (!%p6988_p3)
}
  0x87   : > { %s6992_s1 = scalar_lea.vmem %s406_s21, 6144  ;;  %p7000_p13 = scmp.lt.s32.totalorder %s406_s21, %s406_s21 }
  0x88   : > { %p6993_p10 = scmp.ne.s32.totalorder %s406_s21, %s6992_s1  ;;  %p7001_p0 = scmp.lt.s32.totalorder %s6992_s1, %s6992_s1 }
  0x8a   : > { %p6995_p11 = pnand %p6993_p10, %p7398_p8  ;;  %p7002_p2 = por %p7001_p0, %p7000_p13 }
  0x8c   : > { %p6996_p12 = pneg %p6995_p11 }
  0x8e   : > { %p7003_p5 = pnand %p7002_p2, %p6996_p12 }
  0x90   : > { %7006 = shalt.err (!%p7003_p5)
}
  0x91   : > { %s7272_s30 = smov 128   ;;  %s7273_s11 = smov 8  }
  0x92   : > { %6707 = dma.hbm_to_vmem [thread:$0]  (!%p7384_p6), %s10482_s9, 6144, %s406_s21, [#allocation18], %s7272_s30, %s7272_s30, %s7273_s11  }
  0x93   : > { %s7274_s3 = smov [#allocation7]   ;;  %s7275_s12 = smov [#allocation10]  }
  0x94   : > { %s323_s24 = sshll.u32 %s7274_s3, 4  ;;  %s347_s13 = sshll.u32 %s7275_s12, 4  ;;  %s324_s24 = int_to_ptr.vmem [resolvable:$true] %s323_s24  ;;  %s348_s13 = int_to_ptr.vmem [resolvable:$true] %s347_s13 }
  0x95   : > { %s7007_s28 = scalar_lea.hbm %s10475_s2, 48 }
  0x96   : > { %p7008_p7 = scmp.ne.s32.totalorder %s10475_s2, %s7007_s28  ;;  %p7014_p1 = scmp.lt.u32.totalorder %s7007_s28, %s10475_s2 }
  0x98   : > { %p7010_p9 = pnand %p7008_p7, %p7398_p8 }
  0x9a   : > { %p7011_p4 = pneg %p7010_p9 }
  0x9c   : > { %p7016_p3 = pnand %p7014_p1, %p7011_p4 }
  0x9e   : > { %7019 = shalt.err (!%p7016_p3)
}
  0x9f   : > { %s7020_s21 = scalar_lea.vmem %s324_s24, 48  ;;  %s7027_s30 = scalar_lea.vmem %s324_s24, 64 }
  0xa0   : > { %p7021_p10 = scmp.ne.s32.totalorder %s324_s24, %s7020_s21  ;;  %p7028_p13 = scmp.lt.s32.totalorder %s324_s24, %s324_s24 }
  0xa1   : > { %p7029_p0 = scmp.lt.s32.totalorder %s7027_s30, %s7020_s21 }
  0xa2   : > { %p7023_p11 = pnand %p7021_p10, %p7398_p8 }
  0xa3   : > { %p7030_p2 = por %p7029_p0, %p7028_p13 }
  0xa4   : > { %p7024_p12 = pneg %p7023_p11 }
  0xa6   : > { %p7031_p5 = pnand %p7030_p2, %p7024_p12 }
  0xa8   : > { %7034 = shalt.err (!%p7031_p5)
}
  0xa9   : > { %6686 = dma.hbm_to_vmem [thread:$0]  (!%p7384_p6), %s10475_s2, 48, %s324_s24, [#allocation6]  }
  0xaa   : > { %s7035_s3 = scalar_lea.hbm %s10477_s4, 16 }
  0xab   : > { %p7036_p7 = scmp.ne.s32.totalorder %s10477_s4, %s7035_s3  ;;  %p7042_p1 = scmp.lt.u32.totalorder %s7035_s3, %s10477_s4 }
  0xad   : > { %p7038_p9 = pnand %p7036_p7, %p7398_p8 }
  0xaf   : > { %p7039_p4 = pneg %p7038_p9 }
  0xb1   : > { %p7044_p3 = pnand %p7042_p1, %p7039_p4 }
  0xb3   : > { %7047 = shalt.err (!%p7044_p3)
}
  0xb4   : > { %s7048_s22 = scalar_lea.vmem %s348_s13, 16  ;;  %s7055_s24 = scalar_lea.vmem %s348_s13, 32 }
  0xb5   : > { %p7049_p10 = scmp.ne.s32.totalorder %s348_s13, %s7048_s22  ;;  %p7056_p13 = scmp.lt.s32.totalorder %s348_s13, %s348_s13 }
  0xb6   : > { %p7057_p0 = scmp.lt.s32.totalorder %s7055_s24, %s7048_s22 }
  0xb7   : > { %p7051_p11 = pnand %p7049_p10, %p7398_p8 }
  0xb8   : > { %p7058_p2 = por %p7057_p0, %p7056_p13 }
  0xb9   : > { %p7052_p12 = pneg %p7051_p11 }
  0xbb   : > { %p7059_p5 = pnand %p7058_p2, %p7052_p12 }
  0xbd   : > { %7062 = shalt.err (!%p7059_p5)
}
  0xbe   : > { %6692 = dma.hbm_to_vmem [thread:$0]  (!%p7384_p6), %s10477_s4, 16, %s348_s13, [#allocation9]  }
  0xbf   : > { %s7276_s21 = smov [#allocation13]   ;;  %s7277_s11 = smov [#allocation16]  }
  0xc0   : > { %s371_s30 = sshll.u32 %s7276_s21, 4  ;;  %s395_s14 = sshll.u32 %s7277_s11, 4  ;;  %s372_s30 = int_to_ptr.vmem [resolvable:$true] %s371_s30  ;;  %s396_s14 = int_to_ptr.vmem [resolvable:$true] %s395_s14 }
  0xc1   : > { %s7063_s3 = scalar_lea.hbm %s10479_s6, 16 }
  0xc2   : > { %p7064_p7 = scmp.ne.s32.totalorder %s10479_s6, %s7063_s3  ;;  %p7070_p1 = scmp.lt.u32.totalorder %s7063_s3, %s10479_s6 }
  0xc4   : > { %p7066_p9 = pnand %p7064_p7, %p7398_p8 }
  0xc6   : > { %p7067_p4 = pneg %p7066_p9 }
  0xc8   : > { %p7072_p3 = pnand %p7070_p1, %p7067_p4 }
  0xca   : > { %7075 = shalt.err (!%p7072_p3)
}
  0xcb   : > { %s7076_s13 = scalar_lea.vmem %s372_s30, 16  ;;  %s7083_s22 = scalar_lea.vmem %s372_s30, 32 }
  0xcc   : > { %p7077_p10 = scmp.ne.s32.totalorder %s372_s30, %s7076_s13  ;;  %p7084_p13 = scmp.lt.s32.totalorder %s372_s30, %s372_s30 }
  0xcd   : > { %p7085_p0 = scmp.lt.s32.totalorder %s7083_s22, %s7076_s13 }
  0xce   : > { %p7079_p11 = pnand %p7077_p10, %p7398_p8 }
  0xcf   : > { %p7086_p2 = por %p7085_p0, %p7084_p13 }
  0xd0   : > { %p7080_p12 = pneg %p7079_p11 }
  0xd2   : > { %p7087_p5 = pnand %p7086_p2, %p7080_p12 }
  0xd4   : > { %7090 = shalt.err (!%p7087_p5)
}
  0xd5   : > { %6698 = dma.hbm_to_vmem [thread:$0]  (!%p7384_p6), %s10479_s6, 16, %s372_s30, [#allocation12]  }
  0xd6   : > { %s7091_s11 = scalar_lea.hbm %s10481_s8, 16 }
  0xd7   : > { %p7092_p7 = scmp.ne.s32.totalorder %s10481_s8, %s7091_s11  ;;  %p7098_p1 = scmp.lt.u32.totalorder %s7091_s11, %s10481_s8 }
  0xd9   : > { %p7094_p9 = pnand %p7092_p7, %p7398_p8 }
  0xdb   : > { %p7095_p4 = pneg %p7094_p9 }
  0xdd   : > { %p7100_p3 = pnand %p7098_p1, %p7095_p4 }
  0xdf   : > { %7103 = shalt.err (!%p7100_p3)
}
  0xe0   : > { %s7104_s15 = scalar_lea.vmem %s396_s14, 16  ;;  %s7111_s30 = scalar_lea.vmem %s396_s14, 32 }
  0xe1   : > { %p7105_p10 = scmp.ne.s32.totalorder %s396_s14, %s7104_s15  ;;  %p7112_p13 = scmp.lt.s32.totalorder %s396_s14, %s396_s14 }
  0xe2   : > { %p7113_p0 = scmp.lt.s32.totalorder %s7111_s30, %s7104_s15 }
  0xe3   : > { %p7107_p11 = pnand %p7105_p10, %p7398_p8 }
  0xe4   : > { %p7114_p2 = por %p7113_p0, %p7112_p13 }
  0xe5   : > { %p7108_p12 = pneg %p7107_p11 }
  0xe7   : > { %p7115_p5 = pnand %p7114_p2, %p7108_p12 }
  0xe9   : > { %7118 = shalt.err (!%p7115_p5)
}
  0xea   : > { %6704 = dma.hbm_to_vmem [thread:$0]  (!%p7384_p6), %s10481_s8, 16, %s396_s14, [#allocation15]  }
  0xeb   : > { %s7278_s13 = smov [#allocation19]   ;;  %s7119_s1 = scalar_lea.hbm %s10483_s10, 16 }
  0xec   : > { %s419_s22 = sshll.u32 %s7278_s13, 4  ;;  %p7120_p7 = scmp.ne.s32.totalorder %s10483_s10, %s7119_s1  ;;  %s420_s22 = int_to_ptr.vmem [resolvable:$true] %s419_s22 }
  0xed   : > { %p7126_p1 = scmp.lt.u32.totalorder %s7119_s1, %s10483_s10 }
  0xee   : > { %p7122_p9 = pnand %p7120_p7, %p7398_p8 }
  0xf0   : > { %p7123_p4 = pneg %p7122_p9 }
  0xf2   : > { %p7128_p3 = pnand %p7126_p1, %p7123_p4 }
  0xf4   : > { %7131 = shalt.err (!%p7128_p3)
}
  0xf5   : > { %s7132_s14 = scalar_lea.vmem %s420_s22, 16  ;;  %s7139_s3 = scalar_lea.vmem %s420_s22, 32 }
  0xf6   : > { %p7133_p10 = scmp.ne.s32.totalorder %s420_s22, %s7132_s14  ;;  %p7140_p13 = scmp.lt.s32.totalorder %s420_s22, %s420_s22 }
  0xf7   : > { %p7141_p0 = scmp.lt.s32.totalorder %s7139_s3, %s7132_s14 }
  0xf8   : > { %p7135_p11 = pnand %p7133_p10, %p7398_p8 }
  0xf9   : > { %p7142_p2 = por %p7141_p0, %p7140_p13 }
  0xfa   : > { %p7136_p12 = pneg %p7135_p11 }
  0xfc   : > { %p7143_p5 = pnand %p7142_p2, %p7136_p12 }
  0xfe   : > { %7146 = shalt.err (!%p7143_p5)
}
  0xff   : > { %6710 = dma.hbm_to_vmem [thread:$0]  (!%p7384_p6), %s10483_s10, 16, %s420_s22, [#allocation18]  }
 0x100   : > { %s5521_s16 = sadd.s32 4294967294, %s7263_s20   ;;  %s7597_s27 = sadd.s32 1, %s7263_s20  }
 0x101   : > { %s36_s30 = ssub.s32 %s7263_s20, %s7597_s27  ;;  %s39_s25 = sadd.s32 1, %s7259_s19 }
 0x102   : > { %p37_p8 = scmp.eq.s32.totalorder %s36_s30, 0  ;;  %p46_p7 = scmp.ne.s32.totalorder %s7259_s19, %s7255_s18 }
 0x103   : > { %p47_p9 = scmp.eq.s32.totalorder %s7263_s20, 0  ;;  %p52_p4 = scmp.ne.s32.totalorder %s7255_s18, %s7251_s17 }
 0x104   : > { %s7608_s28 = scalar_select %p37_p8, %s7259_s19, %s39_s25  }
 0x105   : > { %p7610_p1 = por %p47_p9, %p46_p7  ;;  %p10553_p3 = scmp.eq.s32.totalorder %s7368_s23, 0 }
 0x106   : > { %p286_p10 = scmp.eq.s32.totalorder %s7368_s23, 1  ;;  %p292_p11 = scmp.eq.s32.totalorder %s5521_s16, 1 }
 0x107   : > { %p7616_p6 = por %p10553_p3, %p52_p4  ;;  %p6729_p12 = scmp.lt.s32.totalorder %s7263_s20, 2 }
 0x108   : > { %s430_s24 = sand.u32 1, %s7259_s19   ;;  %p7623_p13 = por %p286_p10, %p46_p7 }
 0x109   : > { %p7627_p0 = por %p292_p11, %p52_p4  ;;  %s5534_s21 = sshll.u32 %s430_s24, 3 }
 0x10a   : > { %s10555_s26 = scalar_select %p7623_p13, 1, 0 }
 0x10b   : > { %s10556_s1 = scalar_select %p7627_p0, 1, 0 }
 0x10c   : > { %s5535_s11 = sshll.u32 %s7263_s20, 7  ;;  %s434_s3 = scalar_lea.vmem [#allocation2], %s5534_s21 }
 0x10d   : > { %s7635_s14 = scalar_lea.hbm %s10473_s0, %s5535_s11  ;;  %s441_s12 = sshll.u32 %s434_s3, 4  ;;  %s7637_s12 = int_to_ptr.vmem [resolvable:$true] %s441_s12 }
 0x10e   : > { %p7641_p2 = pnand %p6729_p12, %p7610_p1  ;;  %s431_s16 = scalar_lea.sflag [#allocation3], %s430_s24 }
 0x10f   : > { %s7147_s30 = scalar_lea.hbm %s7635_s14, 128  ;;  %s7152_s11 = scalar_lea.hbm %s10473_s0, 256 }
 0x110   : > { %p7148_p5 = scmp.ne.s32.totalorder %s7635_s14, %s7147_s30  ;;  %p7149_p8 = pneg %p7641_p2 }
 0x111   : > { %p7153_p4 = scmp.lt.u32.totalorder %s7635_s14, %s10473_s0  ;;  %p7154_p1 = scmp.lt.u32.totalorder %s7152_s11, %s7147_s30 }
 0x112   : > { %p7150_p7 = pnand %p7149_p8, %p7148_p5  ;;  %p7156_p10 = scmp.lt.u32.totalorder %s7147_s30, %s7635_s14 }
 0x113   : > { %p7155_p3 = por %p7154_p1, %p7153_p4 }
 0x114   : > { %p7151_p9 = pneg %p7150_p7 }
 0x115   : > { %p7157_p11 = por %p7156_p10, %p7155_p3 }
 0x117   : > { %p7158_p12 = pnand %p7157_p11, %p7151_p9 }
 0x119   : > { %7161 = shalt.err (!%p7158_p12)
}
 0x11a   : > { %s7162_s24 = scalar_lea.vmem %s7637_s12, 128  ;;  %s7279_s29 = smov [#allocation2]  }
 0x11b   : > { %p7163_p5 = scmp.ne.s32.totalorder %s7637_s12, %s7162_s24  ;;  %s7167_s3 = sshll.u32 %s7279_s29, 4  ;;  %s7168_s3 = int_to_ptr.vmem [resolvable:$false] %s7167_s3 }
 0x11c   : > { %s7169_s25 = scalar_lea.vmem %s7168_s3, 256  ;;  %p7170_p13 = scmp.lt.s32.totalorder %s7637_s12, %s7168_s3 }
 0x11d   : > { %p7165_p7 = pnand %p7163_p5, %p7149_p8  ;;  %p7171_p4 = scmp.lt.s32.totalorder %s7169_s25, %s7162_s24 }
 0x11f   : > { %p7166_p0 = pneg %p7165_p7  ;;  %p7172_p1 = por %p7171_p4, %p7170_p13 }
 0x121   : > { %p7173_p3 = pnand %p7172_p1, %p7166_p0 }
 0x123   : > { %7176 = shalt.err (!%p7173_p3)
}
 0x124   : > { %6714 = dma.hbm_to_vmem [thread:$0]  (!%p7641_p2), %s7635_s14, 128, %s7637_s12, %s431_s16  }
 0x125   : > { %s10558_s30 = sld [smem:[#allocation28_spill]] }
 0x12b   : > { %p10559_p9 = scmp.ne.s32.totalorder %s10558_s30, 0 }
 0x12d   : > { %450 = sbr.rel (%p10559_p9) target bundleno = 1642 (0x66a), region = 64 }
 0x134   : > { %s7673_s21 = sand.u32 1, %s7255_s18  }
 0x135   : > { %s5537_s11 = sshll.u32 %s7673_s21, 3  ;;  %s453_s13 = scalar_lea.sflag [#allocation3], %s7673_s21 }
 0x136   : > { %s456_s5 = scalar_lea.vmem [#allocation2], %s5537_s11 }
 0x137   : > { %7222 = dma.done.wait (%p7616_p6), %s453_s13, 128  }
 0x138   : > { %7224 = vsyncadd (%p7616_p6), %s453_s13, 4294967168  ;;  %p10560_p13 = scmp.eq.s32.totalorder %s7368_s23, 0 }
 0x13a   : > { %7226 = dma.done.wait (%p10560_p13), [#allocation6], 240   ;;  %p10561_p0 = pmov %p10560_p13 }
 0x13c   : > { %7228 = vsyncadd (%p10561_p0), [#allocation6], 4294967056  ;;  %p10562_p2 = pmov %p10561_p0 }
 0x13d   : > { %p10563_p8 = pmov %p10561_p0 }
 0x13e   : > { %7230 = dma.done.wait (%p10562_p2), [#allocation9], 3088  }
 0x13f   : > { %7232 = vsyncadd (%p10563_p8), [#allocation9], 4294964208  ;;  %p10564_p10 = pmov %p10561_p0 }
 0x140   : > { %p10565_p11 = pmov %p10561_p0 }
 0x141   : > { %7234 = dma.done.wait (%p10564_p10), [#allocation12], 3088  }
 0x142   : > { %7236 = vsyncadd (%p10565_p11), [#allocation12], 4294964208  ;;  %p10566_p6 = pmov %p10561_p0 }
 0x143   : > { %p10567_p12 = pmov %p10561_p0 }
 0x144   : > { %7238 = dma.done.wait (%p10566_p6), [#allocation15], 3088  }
 0x145   : > { %7240 = vsyncadd (%p10567_p12), [#allocation15], 4294964208  ;;  %p10568_p5 = pmov %p10561_p0 }
 0x146   : > { %p10569_p7 = pmov %p10561_p0 }
 0x147   : > { %7242 = dma.done.wait (%p10568_p5), [#allocation18], 6160  }
 0x148   : > { %7244 = vsyncadd (%p10569_p7), [#allocation18], 4294961136  ;;  %v539_v0 = vlaneseq  ;;  %v7708_v3 = vld [vmem:[%s456_s5] sm:$0xff]  ;;  %s7280_s22 = smov 127   ;;  %s7281_s14 = smov 126   ;;  %v6797_v19 = vld [vmem:[#allocation8 + $0x10] sm:$0xff]  }
 0x149   : > { %822 = vrot.lane.b32.xlu0 %v7708_v3, %s7280_s22  ;;  %v6793_v15 = vld [vmem:[#allocation8] sm:$0xff]   ;;  %v6795_v17 = vld [vmem:[#allocation8 + $0x8] sm:$0xff]   ;;  %v6798_v20 = vld [vmem:[#allocation8 + $0x50] sm:$0xff]   ;;  %vm825_vm0 = vcmask 252928   ;;  %vm1201_vm1 = vcmask 244736   ;;  %vm7282_vm3 = vmmov 1  }
 0x14a   : > { %v7703_v1 = vshrl.u32 %v539_v0, 7  ;;  %v6794_v16 = vld [vmem:[#allocation8 + $0x40] sm:$0xff]   ;;  %6113 = vmatprep.subr.bf16.mxu0 %v6793_v15  ;;  %v6796_v18 = vld [vmem:[#allocation8 + $0x48] sm:$0xff]   ;;  %v6799_v21 = vld [vmem:[#allocation8 + $0x18] sm:$0xff]   ;;  %vm5099_vm5 = vcmask 1041409   ;;  %vm5101_vm6 = vcmask 1042434  }
 0x14b   : > { %6161 = vmatprep.subr.bf16.mxu1 %v6794_v16  ;;  %6114 = vmatpush3.bf16.msra.mxu0 %v6793_v15  ;;  %v6800_v22 = vld [vmem:[#allocation8 + $0x58] sm:$0xff]   ;;  %v6801_v23 = vld [vmem:[#allocation8 + $0x20] sm:$0xff]   ;;  %v6803_v27 = vld [vmem:[#allocation8 + $0x28] sm:$0xff]   ;;  %vm5103_vm7 = vcmask 1043459   ;;  %vm5105_vm8 = vcmask 1044484   ;;  %vm5107_vm9 = vcmask 1045509  }
 0x14c   : > { %10570 = vst [vmem:[#allocation29_spill] sm:$0xff] %v7703_v1  ;;  %v7706_v2 = vsub.s32 0, %v7703_v1  ;;  %v7714_v5 = vsub.s32 1, %v7703_v1  ;;  %v7720_v7 = vsub.s32 2, %v7703_v1  ;;  %v7725_v9 = vsub.s32 3, %v7703_v1  ;;  %6162 = vmatpush3.bf16.msra.mxu1 %v6794_v16  ;;  %6115 = vmatprep.subr.bf16.mxu0 %v6795_v17  ;;  %v6802_v24 = vld [vmem:[#allocation8 + $0x60] sm:$0xff]  }
 0x14d   : > { %1198 = vrot.lane.b32.xlu0 %v7708_v3, %s7281_s14  ;;  %v7730_v11 = vsub.s32 4, %v7703_v1  ;;  %v7735_v13 = vsub.s32 5, %v7703_v1  ;;  %6163 = vmatprep.subr.bf16.mxu1 %v6796_v18  ;;  %v6804_v28 = vld [vmem:[#allocation8 + $0x68] sm:$0xff]   ;;  %v6805_v32 = vld [vmem:[#allocation8 + $0x30] sm:$0xff]   ;;  %v6807_v35 = vld [vmem:[#allocation8 + $0x38] sm:$0xff]   ;;  %vm5109_vm10 = vcmask 1046534  }
 0x14e   : > { %v547_v4 = vrot.slane %v7708_v3, %v7706_v2  ;;  %v566_v6 = vrot.slane %v7708_v3, %v7714_v5  ;;  %v585_v8 = vrot.slane %v7708_v3, %v7720_v7  ;;  %v604_v10 = vrot.slane %v7708_v3, %v7725_v9  ;;  %v6806_v33 = vld [vmem:[#allocation8 + $0x70] sm:$0xff]   ;;  %v6808_v36 = vld [vmem:[#allocation8 + $0x78] sm:$0xff]   ;;  %s5842_s12 = sshll.u32 %s7368_s23, 7  ;;  %s534_s15 = scalar_lea.vmem [#allocation20], %s5537_s11 }
 0x14f   : > { %v623_v12 = vrot.slane %v7708_v3, %v7730_v11  ;;  %v7739_v14 = vrot.slane %v7708_v3, %v7735_v13  ;;  %6116 = vmatpush3.bf16.msra.mxu0 %v6795_v17  ;;  %v538_v60 = vld [vmem:[#allocation5 + $0x8] sm:$0x7]  ;;  %v537_v61 = vld [vmem:[#allocation5] sm:$0x77]  ;;  %vm5111_vm11 = vcmask 1047559   ;;  %s5356_s16 = sshll.u32 %s534_s15, 4  ;;  %s10431_s16 = int_to_ptr.vmem [resolvable:$true] %s5356_s16 }
 0x150   : > { %549 = vbcast.lane.b32.xlu1 %v547_v4, 256  ;;  %6164 = vmatpush3.bf16.msra.mxu1 %v6796_v18  ;;  %v982_v15 = vrot.slane %v537_v61, %v7714_v5  ;;  %v1358_v17 = vrot.slane %v537_v61, %v7720_v7  ;;  %v986_v18 = vrot.slane %v537_v61, %v7735_v13  ;;  %s10820_s3 = sld [smem:[#allocation78_spill]]  ;;  %s5343_s23 = scalar_lea.sflag [#allocation4], %s7673_s21 }
 0x151   : > { %557 = vbcast.lane.b32.xlu0 %v547_v4, 272  ;;  %6117 = vmatprep.subr.bf16.mxu0 %v6797_v19  ;;  %s7177_s30 = scalar_lea.vmem %s10431_s16, 128  ;;  %p10821_p1 = scmp.ne.s32.totalorder %s10555_s26, 0 }
 0x152   : > { %6165 = vmatprep.subr.bf16.mxu1 %v6798_v20  ;;  %p7178_p4 = scmp.ne.s32.totalorder %s10431_s16, %s7177_s30  ;;  %s7286_s11 = smov [#allocation20]  }
 0x153   : > { %6118 = vmatpush3.bf16.msra.mxu0 %v6797_v19  ;;  %s7181_s13 = sshll.u32 %s7286_s11, 4  ;;  %s7182_s13 = int_to_ptr.vmem [resolvable:$false] %s7181_s13 }
 0x154   : > { %553 = vbcast.lane.b32.xlu1 %v547_v4, 264  ;;  %6166 = vmatpush3.bf16.msra.mxu1 %v6798_v20  ;;  %p7179_p3 = pnand %p7178_p4, %p10821_p1  ;;  %s7183_s5 = scalar_lea.vmem %s7182_s13, 256 }
 0x155   : > { %568 = vbcast.lane.b32.xlu0 %v566_v6, 256  ;;  %6119 = vmatprep.subr.bf16.mxu0 %v6799_v21  ;;  %p7184_p13 = scmp.lt.s32.totalorder %s10431_s16, %s7182_s13  ;;  %p7185_p0 = scmp.lt.s32.totalorder %s7183_s5, %s7177_s30 }
 0x156   : > { %6167 = vmatprep.subr.bf16.mxu1 %v6800_v22  ;;  %s10429_s25 = scalar_lea.hbm %s10820_s3, %s5842_s12  ;;  %p7180_p9 = pneg %p7179_p3 }
 0x157   : > { %6120 = vmatpush3.bf16.msra.mxu0 %v6799_v21  ;;  %p7186_p2 = por %p7185_p0, %p7184_p13 }
 0x158   : > { %561 = vbcast.lane.b32.xlu1 %v547_v4, 280  ;;  %6168 = vmatpush3.bf16.msra.mxu1 %v6800_v22  ;;  %v709_v4 = vrot.slane %v538_v60, %v7706_v2 }
 0x159   : > { %576 = vbcast.lane.b32.xlu0 %v566_v6, 272  ;;  %6121 = vmatprep.subr.bf16.mxu0 %v6801_v23  ;;  %p7187_p8 = pnand %p7186_p2, %p7180_p9 }
 0x15a   : > { %6169 = vmatprep.subr.bf16.mxu1 %v6802_v24  ;;  %v7813_v16 = vrot.slane %v709_v4, %v7706_v2 }
 0x15b   : > { %6122 = vmatpush3.bf16.msra.mxu0 %v6801_v23 }
 0x15c   : > { %572 = vbcast.lane.b32.xlu1 %v566_v6, 264  ;;  %6170 = vmatpush3.bf16.msra.mxu1 %v6802_v24 }
 0x15d   : > { %587 = vbcast.lane.b32.xlu0 %v585_v8, 256  ;;  %6123 = vmatprep.subr.bf16.mxu0 %v6803_v27 }
 0x15e   : > { %6171 = vmatprep.subr.bf16.mxu1 %v6804_v28 }
 0x15f   : > { %6124 = vmatpush3.bf16.msra.mxu0 %v6803_v27 }
 0x160   : > { %580 = vbcast.lane.b32.xlu1 %v566_v6, 280  ;;  %6172 = vmatpush3.bf16.msra.mxu1 %v6804_v28  ;;  %v701_v6 = vrot.slane %v537_v61, %v7706_v2 }
 0x161   : > { %595 = vbcast.lane.b32.xlu0 %v585_v8, 272  ;;  %6125 = vmatprep.subr.bf16.mxu0 %v6805_v32 }
 0x162   : > { %6173 = vmatprep.subr.bf16.mxu1 %v6806_v33 }
 0x163   : > { %6126 = vmatpush3.bf16.msra.mxu0 %v6805_v32  ;;  %v7851_v32 = vrot.slane %v986_v18, %v7714_v5 }
 0x164   : > { %591 = vbcast.lane.b32.xlu1 %v585_v8, 264  ;;  %6174 = vmatpush3.bf16.msra.mxu1 %v6806_v33 }
 0x165   : > { %606 = vbcast.lane.b32.xlu0 %v604_v10, 256  ;;  %6127 = vmatprep.subr.bf16.mxu0 %v6807_v35 }
 0x166   : > { %6175 = vmatprep.subr.bf16.mxu1 %v6808_v36 }
 0x167   : > { %6128 = vmatpush3.bf16.msra.mxu0 %v6807_v35 }
 0x168   : > { %599 = vbcast.lane.b32.xlu1 %v585_v8, 280  ;;  %6176 = vmatpush3.bf16.msra.mxu1 %v6808_v36  ;;  %v705_v8 = vrot.slane %v537_v61, %v7730_v11 }
 0x169   : > { %614 = vbcast.lane.b32.xlu0 %v604_v10, 272 }
 0x16a   : > { %v7821_v20 = vrot.slane %v705_v8, %v7706_v2 }
 0x16c   : > { %610 = vbcast.lane.b32.xlu1 %v604_v10, 264 }
 0x16d   : > { %625 = vbcast.lane.b32.xlu0 %v623_v12, 256 }
 0x170   : > { %618 = vbcast.lane.b32.xlu1 %v604_v10, 280  ;;  %v1574_v10 = vld [vmem:[#allocation7] sm:$0x7] }
 0x171   : > { %633 = vbcast.lane.b32.xlu0 %v623_v12, 272  ;;  %v7829_v24 = vrot.slane %v1574_v10, %v7706_v2 }
 0x174   : > { %629 = vbcast.lane.b32.xlu1 %v623_v12, 264 }
 0x175   : > { %644 = vbcast.lane.b32.xlu0 %v7739_v14, 256 }
 0x178   : > { %637 = vbcast.lane.b32.xlu1 %v623_v12, 280  ;;  %v990_v12 = vrot.slane %v538_v60, %v7714_v5 }
 0x17a   : > { %v7836_v27 = vrot.slane %v990_v12, %v7714_v5 }
 0x17c   : > { %648 = vbcast.lane.b32.xlu1 %v7739_v14, 264 }
 0x1bb   : > { %v823_v25 = vpop.permute.xlu0 %822 }
 0x1bc   : > { %v7743_v26 = vsel %vm825_vm0, %v823_v25, 0.0  ;;  %v679_v25 = vsub.s32 7, %v7703_v1  ;;  %vm7284_vm0 = vmmov 0  }
 0x1bd   : > { %v830_v29 = vrot.slane %v7743_v26, %v7706_v2  ;;  %v849_v37 = vrot.slane %v7743_v26, %v7714_v5  ;;  %v868_v39 = vrot.slane %v7743_v26, %v7720_v7  ;;  %v887_v42 = vrot.slane %v7743_v26, %v7725_v9 }
 0x1be   : > { %v906_v49 = vrot.slane %v7743_v26, %v7730_v11  ;;  %v925_v55 = vrot.slane %v7743_v26, %v7735_v13 }
 0x1bf   : > { %832 = vbcast.lane.b32.xlu0 %v830_v29, 256  ;;  %836 = vbcast.lane.b32.xlu1 %v830_v29, 264  ;;  %v1199_v30 = vpop.permute.xlu0 %1198 }
 0x1c0   : > { %v7747_v31 = vsel %vm1201_vm1, %v1199_v30, 0.0  ;;  %v7845_v30 = vrot.slane %v982_v15, %v7714_v5 }
 0x1c1   : > { %v1206_v34 = vrot.slane %v7747_v31, %v7706_v2  ;;  %v1225_v38 = vrot.slane %v7747_v31, %v7714_v5  ;;  %v1244_v40 = vrot.slane %v7747_v31, %v7720_v7  ;;  %v1263_v44 = vrot.slane %v7747_v31, %v7725_v9 }
 0x1c2   : > { %v7759_v41 = vpop.permute.xlu1 %549  ;;  %v1282_v52 = vrot.slane %v7747_v31, %v7730_v11  ;;  %v1301_v62 = vrot.slane %v7747_v31, %v7735_v13  ;;  %v660_v9 = vsub.s32 6, %v7703_v1  ;;  %v7818_v11 = vrot.slane %v701_v6, %v7706_v2 }
 0x1c3   : > { %840 = vbcast.lane.b32.xlu0 %v830_v29, 272  ;;  %844 = vbcast.lane.b32.xlu1 %v830_v29, 280  ;;  %v7767_v45 = vpop.permute.xlu0 %557  ;;  %v7832_v13 = vrot.slane %v1574_v10, %v7714_v5  ;;  %v7842_v29 = vrot.slane %v1574_v10, %v7720_v7  ;;  %v7848_v2 = vrot.slane %v1358_v17, %v7720_v7 }
 0x1c4   : > { %v1362_v19 = vrot.slane %v537_v61, %v660_v9  ;;  %v661_v21 = vrot.slane %v7708_v3, %v660_v9  ;;  %v7861_v35 = vmul.f32 %v7818_v11, %v7759_v41  ;;  %v7865_v36 = vmul.f32 %v7821_v20, %v7759_v41 }
 0x1c6   : > { %v7763_v43 = vpop.permute.xlu1 %553  ;;  %v7854_v33 = vrot.slane %v1362_v19, %v7720_v7 }
 0x1c7   : > { %1208 = vbcast.lane.b32.xlu0 %v1206_v34, 256  ;;  %1212 = vbcast.lane.b32.xlu1 %v1206_v34, 264  ;;  %v7771_v47 = vpop.permute.xlu0 %568  ;;  %v7873_v5 = vmul.f32 %v7818_v11, %v7763_v43 }
 0x1c8   : > { %v7931_v61 = vmul.f32 %v7813_v16, %v7771_v47 }
 0x1ca   : > { %v7769_v46 = vpop.permute.xlu1 %561 }
 0x1cb   : > { %1216 = vbcast.lane.b32.xlu0 %v1206_v34, 272  ;;  %1220 = vbcast.lane.b32.xlu1 %v1206_v34, 280  ;;  %v7777_v50 = vpop.permute.xlu0 %576  ;;  %v7857_v34 = vrot.slane %v7708_v3, %v679_v25  ;;  %v7877_v3 = vmul.f32 %v7821_v20, %v7763_v43 }
 0x1cc   : > { %v7947_v6 = vmul.f32 %v7818_v11, %v7777_v50  ;;  %v7955_v8 = vmul.f32 %v7813_v16, %v7777_v50 }
 0x1ce   : > { %v7773_v48 = vpop.permute.xlu1 %572 }
 0x1cf   : > { %851 = vbcast.lane.b32.xlu0 %v849_v37, 256  ;;  %855 = vbcast.lane.b32.xlu1 %v849_v37, 264  ;;  %v7783_v53 = vpop.permute.xlu0 %587  ;;  %v7943_v4 = vmul.f32 %v7813_v16, %v7773_v48 }
 0x1d0   : > { %v7971_v12 = vmul.f32 %v7818_v11, %v7783_v53 }
 0x1d2   : > { %v7779_v51 = vpop.permute.xlu1 %580  ;;  %10571 = vst [vmem:[#allocation30_spill] sm:$0xff] %v7971_v12 }
 0x1d3   : > { %859 = vbcast.lane.b32.xlu0 %v849_v37, 272  ;;  %863 = vbcast.lane.b32.xlu1 %v849_v37, 280  ;;  %v7789_v56 = vpop.permute.xlu0 %595  ;;  %v7869_v37 = vmul.f32 %v7813_v16, %v7759_v41  ;;  %v7967_v10 = vmul.f32 %v7813_v16, %v7779_v51 }
 0x1d6   : > { %v7785_v54 = vpop.permute.xlu1 %591 }
 0x1d7   : > { %1227 = vbcast.lane.b32.xlu0 %v1225_v38, 256  ;;  %1231 = vbcast.lane.b32.xlu1 %v1225_v38, 264  ;;  %v7795_v58 = vpop.permute.xlu0 %606  ;;  %v7983_v15 = vmul.f32 %v7818_v11, %v7785_v54  ;;  %v7995_v19 = vmul.f32 %v7813_v16, %v7785_v54 }
 0x1d9   : > { %10574 = vst [vmem:[#allocation33_spill] sm:$0xff] %v7983_v15  ;;  %10576 = vst [vmem:[#allocation35_spill] sm:$0xff] %v7995_v19 }
 0x1da   : > { %v7791_v57 = vpop.permute.xlu1 %599 }
 0x1db   : > { %1235 = vbcast.lane.b32.xlu0 %v1225_v38, 272  ;;  %1239 = vbcast.lane.b32.xlu1 %v1225_v38, 280  ;;  %v7801_v63 = vpop.permute.xlu0 %614  ;;  %v7881_v38 = vrot.slane %v7743_v26, %v679_v25 }
 0x1de   : > { %v7797_v59 = vpop.permute.xlu1 %610 }
 0x1df   : > { %870 = vbcast.lane.b32.xlu0 %v868_v39, 256  ;;  %874 = vbcast.lane.b32.xlu1 %v868_v39, 264  ;;  %v7824_v22 = vpop.permute.xlu0 %625 }
 0x1e2   : > { %v7803_v0 = vpop.permute.xlu1 %618 }
 0x1e3   : > { %878 = vbcast.lane.b32.xlu0 %v868_v39, 272  ;;  %882 = vbcast.lane.b32.xlu1 %v868_v39, 280  ;;  %v7885_v39 = vmul.f32 %v7813_v16, %v7763_v43  ;;  %v7891_v41 = vpop.permute.xlu0 %633  ;;  %v7907_v43 = vmul.f32 %v7813_v16, %v7767_v45 }
 0x1e6   : > { %v7826_v23 = vpop.permute.xlu1 %629 }
 0x1e7   : > { %1246 = vbcast.lane.b32.xlu0 %v1244_v40, 256  ;;  %1250 = vbcast.lane.b32.xlu1 %v1244_v40, 264  ;;  %v7989_v17 = vpop.permute.xlu0 %644 }
 0x1eb   : > { %1254 = vbcast.lane.b32.xlu0 %v1244_v40, 272  ;;  %1258 = vbcast.lane.b32.xlu1 %v1244_v40, 280  ;;  %v7889_v40 = vmul.f32 %v7818_v11, %v7767_v45 }
 0x1ef   : > { %889 = vbcast.lane.b32.xlu0 %v887_v42, 256  ;;  %893 = vbcast.lane.b32.xlu1 %v887_v42, 264 }
 0x1f3   : > { %897 = vbcast.lane.b32.xlu0 %v887_v42, 272  ;;  %901 = vbcast.lane.b32.xlu1 %v887_v42, 280  ;;  %v7893_v42 = vpop.permute.xlu1 %637 }
 0x1f7   : > { %1265 = vbcast.lane.b32.xlu0 %v1263_v44, 256  ;;  %1269 = vbcast.lane.b32.xlu1 %v1263_v44, 264  ;;  %v7991_v18 = vpop.permute.xlu1 %648 }
 0x1fb   : > { %1273 = vbcast.lane.b32.xlu0 %v1263_v44, 272  ;;  %1277 = vbcast.lane.b32.xlu1 %v1263_v44, 280  ;;  %v7896_v44 = vrot.slane %v7747_v31, %v660_v9 }
 0x1ff   : > { %908 = vbcast.lane.b32.xlu0 %v906_v49, 256  ;;  %912 = vbcast.lane.b32.xlu1 %v906_v49, 264 }
 0x203   : > { %916 = vbcast.lane.b32.xlu0 %v906_v49, 272  ;;  %920 = vbcast.lane.b32.xlu1 %v906_v49, 280  ;;  %v7899_v49 = vrot.slane %v7747_v31, %v679_v25  ;;  %v7919_v31 = vmul.f32 %v7813_v16, %v7769_v46  ;;  %v8003_v25 = vmul.f32 %v7821_v20, %v7789_v56 }
 0x205   : > { %10578 = vst [vmem:[#allocation37_spill] sm:$0xff] %v8003_v25  ;;  %v8031_v25 = vmul.f32 %v7813_v16, %v7795_v58 }
 0x207   : > { %1284 = vbcast.lane.b32.xlu0 %v1282_v52, 256  ;;  %1288 = vbcast.lane.b32.xlu1 %v1282_v52, 264  ;;  %10585 = vst [vmem:[#allocation44_spill] sm:$0xff] %v8031_v25  ;;  %v8120_v25 = vmul.f32 %v7821_v20, %v7893_v42 }
 0x209   : > { %10605 = vst [vmem:[#allocation64_spill] sm:$0xff] %v8120_v25  ;;  %v8143_v25 = vld [vmem:[#allocation11] sm:$0xff]  }
 0x20a   : > { %6257 = vmatprep.subr.bf16.mxu1 %v8143_v25 }
 0x20b   : > { %1292 = vbcast.lane.b32.xlu0 %v1282_v52, 272  ;;  %1296 = vbcast.lane.b32.xlu1 %v1282_v52, 280  ;;  %v7911_v52 = vmul.f32 %v7818_v11, %v7769_v46 }
 0x20f   : > { %927 = vbcast.lane.b32.xlu0 %v925_v55, 256  ;;  %931 = vbcast.lane.b32.xlu1 %v925_v55, 264 }
 0x213   : > { %652 = vbcast.lane.b32.xlu0 %v7739_v14, 272  ;;  %656 = vbcast.lane.b32.xlu1 %v7739_v14, 280  ;;  %v1366_v14 = vrot.slane %v538_v60, %v7720_v7  ;;  %v7923_v60 = vmul.f32 %v7818_v11, %v7771_v47 }
 0x215   : > { %v7839_v28 = vrot.slane %v1366_v14, %v7720_v7  ;;  %v944_v7 = vrot.slane %v7743_v26, %v660_v9  ;;  %v7903_v26 = vmul.f32 %v7821_v20, %v7767_v45  ;;  %v7927_v45 = vmul.f32 %v7821_v20, %v7771_v47 }
 0x216   : > { %v7951_v47 = vmul.f32 %v7821_v20, %v7777_v50  ;;  %v7959_v9 = vmul.f32 %v7818_v11, %v7779_v51  ;;  %v7975_v50 = vmul.f32 %v7821_v20, %v7783_v53  ;;  %v7979_v14 = vmul.f32 %v7813_v16, %v7783_v53 }
 0x217   : > { %935 = vbcast.lane.b32.xlu0 %v925_v55, 272  ;;  %939 = vbcast.lane.b32.xlu1 %v925_v55, 280  ;;  %v7915_v55 = vmul.f32 %v7821_v20, %v7769_v46  ;;  %v7939_v46 = vmul.f32 %v7821_v20, %v7773_v48  ;;  %v7999_v53 = vmul.f32 %v7818_v11, %v7789_v56 }
 0x218   : > { %10572 = vst [vmem:[#allocation31_spill] sm:$0xff] %v7975_v50  ;;  %10573 = vst [vmem:[#allocation32_spill] sm:$0xff] %v7979_v14  ;;  %v8019_v50 = vmul.f32 %v7813_v16, %v7791_v57 }
 0x219   : > { %10577 = vst [vmem:[#allocation36_spill] sm:$0xff] %v7999_v53  ;;  %v8023_v53 = vmul.f32 %v7818_v11, %v7795_v58 }
 0x21a   : > { %10582 = vst [vmem:[#allocation41_spill] sm:$0xff] %v8019_v50 }
 0x21b   : > { %1303 = vbcast.lane.b32.xlu0 %v1301_v62, 256  ;;  %1307 = vbcast.lane.b32.xlu1 %v1301_v62, 264  ;;  %10583 = vst [vmem:[#allocation42_spill] sm:$0xff] %v8023_v53  ;;  %v8047_v53 = vmul.f32 %v7818_v11, %v7801_v63 }
 0x21d   : > { %10589 = vst [vmem:[#allocation48_spill] sm:$0xff] %v8047_v53  ;;  %v8067_v53 = vmul.f32 %v7813_v16, %v7803_v0 }
 0x21f   : > { %1311 = vbcast.lane.b32.xlu0 %v1301_v62, 272  ;;  %1315 = vbcast.lane.b32.xlu1 %v1301_v62, 280  ;;  %v7935_v62 = vmul.f32 %v7818_v11, %v7773_v48  ;;  %v7963_v48 = vmul.f32 %v7821_v20, %v7779_v51  ;;  %v7987_v51 = vmul.f32 %v7821_v20, %v7785_v54 }
 0x220   : > { %v8015_v54 = vmul.f32 %v7821_v20, %v7791_v57  ;;  %10594 = vst [vmem:[#allocation53_spill] sm:$0xff] %v8067_v53 }
 0x221   : > { %10575 = vst [vmem:[#allocation34_spill] sm:$0xff] %v7987_v51  ;;  %v8007_v51 = vmul.f32 %v7813_v16, %v7789_v56  ;;  %v8027_v56 = vmul.f32 %v7821_v20, %v7795_v58  ;;  %v8051_v58 = vmul.f32 %v7821_v20, %v7801_v63 }
 0x222   : > { %10581 = vst [vmem:[#allocation40_spill] sm:$0xff] %v8015_v54  ;;  %v8043_v54 = vmul.f32 %v7813_v16, %v7797_v59 }
 0x223   : > { %663 = vbcast.lane.b32.xlu0 %v661_v21, 256  ;;  %667 = vbcast.lane.b32.xlu1 %v661_v21, 264  ;;  %10579 = vst [vmem:[#allocation38_spill] sm:$0xff] %v8007_v51  ;;  %10584 = vst [vmem:[#allocation43_spill] sm:$0xff] %v8027_v56  ;;  %v8055_v56 = vmul.f32 %v7813_v16, %v7801_v63  ;;  %v8075_v63 = vmul.f32 %v7821_v20, %v7824_v22 }
 0x224   : > { %10588 = vst [vmem:[#allocation47_spill] sm:$0xff] %v8043_v54  ;;  %10590 = vst [vmem:[#allocation49_spill] sm:$0xff] %v8051_v58  ;;  %v8071_v58 = vmul.f32 %v7818_v11, %v7824_v22 }
 0x225   : > { %10591 = vst [vmem:[#allocation50_spill] sm:$0xff] %v8055_v56  ;;  %10596 = vst [vmem:[#allocation55_spill] sm:$0xff] %v8075_v63 }
 0x226   : > { %10595 = vst [vmem:[#allocation54_spill] sm:$0xff] %v8071_v58 }
 0x227   : > { %946 = vbcast.lane.b32.xlu0 %v944_v7, 256  ;;  %950 = vbcast.lane.b32.xlu1 %v944_v7, 264 }
 0x22b   : > { %671 = vbcast.lane.b32.xlu0 %v661_v21, 272  ;;  %675 = vbcast.lane.b32.xlu1 %v661_v21, 280  ;;  %v8011_v21 = vmul.f32 %v7818_v11, %v7791_v57  ;;  %v8039_v57 = vmul.f32 %v7821_v20, %v7797_v59 }
 0x22d   : > { %10580 = vst [vmem:[#allocation39_spill] sm:$0xff] %v8011_v21  ;;  %v8035_v21 = vmul.f32 %v7818_v11, %v7797_v59  ;;  %10587 = vst [vmem:[#allocation46_spill] sm:$0xff] %v8039_v57  ;;  %v8059_v57 = vmul.f32 %v7818_v11, %v7803_v0  ;;  %v8063_v59 = vmul.f32 %v7821_v20, %v7803_v0 }
 0x22e   : > { %v8087_v0 = vmul.f32 %v7821_v20, %v7826_v23 }
 0x22f   : > { %10586 = vst [vmem:[#allocation45_spill] sm:$0xff] %v8035_v21  ;;  %954 = vbcast.lane.b32.xlu0 %v944_v7, 272  ;;  %958 = vbcast.lane.b32.xlu1 %v944_v7, 280  ;;  %10592 = vst [vmem:[#allocation51_spill] sm:$0xff] %v8059_v57  ;;  %v8079_v7 = vmul.f32 %v7813_v16, %v7824_v22  ;;  %v8083_v57 = vmul.f32 %v7818_v11, %v7826_v23 }
 0x230   : > { %10593 = vst [vmem:[#allocation52_spill] sm:$0xff] %v8063_v59  ;;  %10599 = vst [vmem:[#allocation58_spill] sm:$0xff] %v8087_v0  ;;  %v8094_v22 = vmul.f32 %v7813_v16, %v7826_v23  ;;  %v8105_v0 = vmul.f32 %v7821_v20, %v7891_v41 }
 0x231   : > { %10597 = vst [vmem:[#allocation56_spill] sm:$0xff] %v8079_v7  ;;  %10598 = vst [vmem:[#allocation57_spill] sm:$0xff] %v8083_v57  ;;  %v833_v59 = vpop.permute.xlu0 %832  ;;  %v837_v56 = vpop.permute.xlu1 %836  ;;  %v8098_v7 = vmul.f32 %v7818_v11, %v7891_v41 }
 0x232   : > { %v1006_v58 = vmul.f32 %v7845_v30, %v833_v59  ;;  %v1008_v53 = vmul.f32 %v7836_v27, %v833_v59  ;;  %v1009_v63 = vmul.f32 %v7845_v30, %v837_v56  ;;  %10600 = vst [vmem:[#allocation59_spill] sm:$0xff] %v8094_v22  ;;  %v1011_v57 = vmul.f32 %v7836_v27, %v837_v56 }
 0x233   : > { %10601 = vst [vmem:[#allocation60_spill] sm:$0xff] %v8098_v7  ;;  %1322 = vbcast.lane.b32.xlu0 %v7896_v44, 256  ;;  %1326 = vbcast.lane.b32.xlu1 %v7896_v44, 264  ;;  %10602 = vst [vmem:[#allocation61_spill] sm:$0xff] %v8105_v0  ;;  %v8112_v22 = vmul.f32 %v7813_v16, %v7891_v41  ;;  %v8116_v7 = vmul.f32 %v7818_v11, %v7893_v42 }
 0x234   : > { %v1102_v54 = vadd.f32 %v1006_v58, %v7861_v35  ;;  %v1104_v21 = vadd.f32 %v1008_v53, %v7869_v37  ;;  %v1105_v23 = vadd.f32 %v1009_v63, %v7873_v5  ;;  %v1107_v0 = vadd.f32 %v1011_v57, %v7885_v39  ;;  %v8141_v57 = vld [vmem:[#allocation8 + $0x80] sm:$0xff]  }
 0x235   : > { %10603 = vst [vmem:[#allocation62_spill] sm:$0xff] %v8112_v22  ;;  %10604 = vst [vmem:[#allocation63_spill] sm:$0xff] %v8116_v7  ;;  %v841_v50 = vpop.permute.xlu0 %840  ;;  %v845_v35 = vpop.permute.xlu1 %844  ;;  %v8125_v37 = vmul.f32 %v7813_v16, %v7893_v42  ;;  %v8132_v58 = vmul.f32 %v7818_v11, %v7989_v17  ;;  %v1007_v63 = vmul.f32 %v7851_v32, %v833_v59  ;;  %v8139_v42 = vadd.s32 24, %v7703_v1 }
 0x236   : > { %v1012_v5 = vmul.f32 %v7845_v30, %v841_v50  ;;  %v1014_v41 = vmul.f32 %v7836_v27, %v841_v50  ;;  %v1015_v53 = vmul.f32 %v7845_v30, %v845_v35  ;;  %v1017_v39 = vmul.f32 %v7836_v27, %v845_v35  ;;  %6209 = vmatprep.subr.bf16.mxu0 %v8141_v57 }
 0x237   : > { %10606 = vst [vmem:[#allocation65_spill] sm:$0xff] %v8125_v37  ;;  %10607 = vst [vmem:[#allocation66_spill] sm:$0xff] %v8132_v58  ;;  %1330 = vbcast.lane.b32.xlu0 %v7896_v44, 272  ;;  %1334 = vbcast.lane.b32.xlu1 %v7896_v44, 280  ;;  %v1013_v37 = vmul.f32 %v7851_v32, %v841_v50  ;;  %v8151_v22 = vmul.f32 %v7821_v20, %v7989_v17  ;;  %vm1690_vm2 = vcmp.lt.s32.totalorder %v8139_v42, 30 }
 0x238   : > { %10608 = vst [vmem:[#allocation67_spill] sm:$0xff] %v8139_v42  ;;  %v1108_v7 = vadd.f32 %v1012_v5, %v7889_v40  ;;  %v1110_v58 = vadd.f32 %v1014_v41, %v7907_v43  ;;  %v1111_v59 = vadd.f32 %v1015_v53, %v7911_v52  ;;  %v1016_v44 = vmul.f32 %v7851_v32, %v845_v35  ;;  %vm8227_vm4 = vmpackc.low %vm1690_vm2, %vm7282_vm3 }
 0x239   : > { %10609 = vst [vmem:[#allocation68_spill] sm:$0xff] %v8151_v22  ;;  %v1113_v1 = vadd.f32 %v1017_v39, %v7919_v31  ;;  %v1209_v51 = vpop.permute.xlu0 %1208  ;;  %v1213_v19 = vpop.permute.xlu1 %1212  ;;  %v8159_v40 = vmul.f32 %v7813_v16, %v7989_v17  ;;  %v1103_v35 = vadd.f32 %v1007_v63, %v7865_v36  ;;  %v1010_v31 = vmul.f32 %v7851_v32, %v837_v56 }
 0x23a   : > { %v1382_v43 = vmul.f32 %v7848_v2, %v1209_v51  ;;  %v1384_v52 = vmul.f32 %v7839_v28, %v1209_v51  ;;  %v1385_v50 = vmul.f32 %v7848_v2, %v1213_v19  ;;  %v1387_v5 = vmul.f32 %v7839_v28, %v1213_v19 }
 0x23b   : > { %10610 = vst [vmem:[#allocation69_spill] sm:$0xff] %v8159_v40  ;;  %682 = vbcast.lane.b32.xlu0 %v7857_v34, 256  ;;  %686 = vbcast.lane.b32.xlu1 %v7857_v34, 264  ;;  %v1109_v41 = vadd.f32 %v1013_v37, %v7903_v26  ;;  %v1112_v40 = vadd.f32 %v1016_v44, %v7915_v55  ;;  %vm2890_vm14 = vcmp.lt.s32.totalorder %v8139_v42, 28 }
 0x23c   : > { %v1478_v17 = vadd.f32 %v1382_v43, %v1102_v54  ;;  %v8170_v53 = vadd.f32 %v1384_v52, %v1104_v21  ;;  %v1481_v39 = vadd.f32 %v1385_v50, %v1105_v23  ;;  %v1383_v36 = vmul.f32 %v7854_v33, %v1209_v51  ;;  %vm9779_vm15 = vmpackc.low %vm2890_vm14, %vm7282_vm3 }
 0x23d   : > { %v1386_v56 = vmul.f32 %v7854_v33, %v1213_v19  ;;  %v8176_v63 = vadd.f32 %v1387_v5, %v1107_v0  ;;  %v1217_v22 = vpop.permute.xlu0 %1216  ;;  %v1221_v15 = vpop.permute.xlu1 %1220 }
 0x23e   : > { %10611 = vst [vmem:[#allocation70_spill] sm:$0xff] %v8170_v53  ;;  %v1591_v14 = vadd.f32 %v7829_v24, %v1478_v17  ;;  %v1594_v26 = vadd.f32 %v7829_v24, %v1481_v39  ;;  %v1388_v21 = vmul.f32 %v7848_v2, %v1217_v22  ;;  %v1389_v54 = vmul.f32 %v7854_v33, %v1217_v22 }
 0x23f   : > { %10612 = vst [vmem:[#allocation71_spill] sm:$0xff] %v8176_v63  ;;  %v1390_v23 = vmul.f32 %v7839_v28, %v1217_v22  ;;  %v1391_v55 = vmul.f32 %v7848_v2, %v1221_v15  ;;  %v1392_v51 = vmul.f32 %v7854_v33, %v1221_v15  ;;  %v1393_v19 = vmul.f32 %v7839_v28, %v1221_v15 }
 0x240   : > { %965 = vbcast.lane.b32.xlu0 %v7881_v38, 256  ;;  %v1691_v0 = vmax.f32 %v1591_v14, 0.0  ;;  %v1694_v37 = vmax.f32 %v1594_v26, 0.0  ;;  %v1484_v44 = vadd.f32 %v1388_v21, %v1108_v7  ;;  %v1485_v43 = vadd.f32 %v1389_v54, %v1109_v41  ;;  %969 = vbcast.lane.b32.xlu1 %v7881_v38, 264 }
 0x241   : > { %v1486_v52 = vadd.f32 %v1390_v23, %v1110_v58  ;;  %v1487_v50 = vadd.f32 %v1391_v55, %v1111_v59  ;;  %v1488_v5 = vadd.f32 %v1392_v51, %v1112_v40  ;;  %v1489_v17 = vadd.f32 %v1393_v19, %v1113_v1  ;;  %v852_v39 = vpop.permute.xlu0 %851  ;;  %v856_v22 = vpop.permute.xlu1 %855 }
 0x242   : > { %v1106_v63 = vadd.f32 %v1010_v31, %v7877_v3  ;;  %v1891_v53 = vmax.f32 %v1691_v0, %v1694_v37  ;;  %v1597_v12 = vadd.f32 %v7829_v24, %v1484_v44  ;;  %v1018_v15 = vmul.f32 %v7845_v30, %v852_v39 }
 0x243   : > { %v1598_v14 = vadd.f32 %v7832_v13, %v1485_v43  ;;  %v1599_v7 = vadd.f32 %v7842_v29, %v1486_v52  ;;  %v1600_v41 = vadd.f32 %v7829_v24, %v1487_v50  ;;  %v1602_v58 = vadd.f32 %v7842_v29, %v1489_v17 }
 0x244   : > { %690 = vbcast.lane.b32.xlu0 %v7857_v34, 272  ;;  %v1479_v1 = vadd.f32 %v1383_v36, %v1103_v35  ;;  %v1482_v59 = vadd.f32 %v1386_v56, %v1106_v63  ;;  %v1697_v40 = vmax.f32 %v1597_v12, 0.0  ;;  %v1020_v3 = vmul.f32 %v7836_v27, %v852_v39  ;;  %694 = vbcast.lane.b32.xlu1 %v7857_v34, 280 }
 0x245   : > { %v1699_v31 = vmax.f32 %v1599_v7, 0.0  ;;  %v1601_v26 = vadd.f32 %v7832_v13, %v1488_v5  ;;  %v1700_v21 = vmax.f32 %v1600_v41, 0.0  ;;  %v1702_v54 = vmax.f32 %v1602_v58, 0.0  ;;  %v860_v23 = vpop.permute.xlu0 %859  ;;  %v864_v55 = vpop.permute.xlu1 %863 }
 0x246   : > { %v8201_v51 = vmul.f32 %v7818_v11, %v7991_v18  ;;  %v1892_v19 = vmax.f32 %v1891_v53, %v1697_v40  ;;  %v1114_v35 = vadd.f32 %v1018_v15, %v7923_v60  ;;  %v1116_v12 = vadd.f32 %v1020_v3, %v7931_v61 }
 0x247   : > { %v1698_v36 = vmax.f32 %v1598_v14, 0.0  ;;  %v1804_v34 = vsel %vm1690_vm2, %v1700_v21, 0.0  ;;  %v8207_v56 = vpack.c.bf16 %v1702_v54, %v1699_v31  ;;  %v1021_v63 = vmul.f32 %v7845_v30, %v856_v22 }
 0x248   : > { %973 = vbcast.lane.b32.xlu0 %v7881_v38, 272  ;;  %v1893_v0 = vmax.f32 %v1892_v19, %v1804_v34  ;;  %v1023_v37 = vmul.f32 %v7836_v27, %v856_v22  ;;  %v1592_v44 = vadd.f32 %v7832_v13, %v1479_v1  ;;  %v1595_v53 = vadd.f32 %v7832_v13, %v1482_v59 }
 0x249   : > { %10613 = vst [vmem:[#allocation72_spill] sm:$0xff] %v8207_v56  ;;  %977 = vbcast.lane.b32.xlu1 %v7881_v38, 280  ;;  %v1701_v60 = vmax.f32 %v1601_v26, 0.0  ;;  %v1019_v61 = vmul.f32 %v7851_v32, %v852_v39  ;;  %v1117_v43 = vadd.f32 %v1021_v63, %v7935_v62  ;;  %v1024_v52 = vmul.f32 %v7845_v30, %v860_v23  ;;  %v1228_v50 = vpop.permute.xlu0 %1227  ;;  %v1232_v5 = vpop.permute.xlu1 %1231 }
 0x24a   : > { %v1894_v17 = vrot.slane %v1893_v0, 4  ;;  %v1119_v15 = vadd.f32 %v1023_v37, %v7943_v4  ;;  %v1692_v14 = vmax.f32 %v1592_v44, 0.0  ;;  %v1695_v7 = vmax.f32 %v1595_v53, 0.0 }
 0x24b   : > { %v1022_v41 = vmul.f32 %v7851_v32, %v856_v22  ;;  %v1026_v58 = vmul.f32 %v7836_v27, %v860_v23  ;;  %v1120_v38 = vadd.f32 %v1024_v52, %v7947_v6  ;;  %v1027_v1 = vmul.f32 %v7845_v30, %v864_v55 }
 0x24c   : > { %1341 = vbcast.lane.b32.xlu0 %v7899_v49, 256  ;;  %v8231_v4 = vpack.c.bf16 %v1695_v7, %v1692_v14  ;;  %v1025_v39 = vmul.f32 %v7851_v32, %v860_v23  ;;  %v1028_v22 = vmul.f32 %v7851_v32, %v864_v55  ;;  %v1029_v6 = vmul.f32 %v7836_v27, %v864_v55  ;;  %v6813_v14 = vld [vmem:[#allocation8 + $0x90] sm:$0xff]  }
 0x24d   : > { %1345 = vbcast.lane.b32.xlu1 %v7899_v49, 264  ;;  %v1122_v59 = vadd.f32 %v1026_v58, %v7955_v8  ;;  %v1123_v40 = vadd.f32 %v1027_v1, %v7959_v9  ;;  %v8239_v3 = vpack.c.bf16 %v1701_v60, %v1698_v36  ;;  %v1394_v31 = vmul.f32 %v7848_v2, %v1228_v50  ;;  %v1236_v26 = vpop.permute.xlu0 %1235  ;;  %v1240_v21 = vpop.permute.xlu1 %1239  ;;  %v6812_v36 = vld [vmem:[#allocation11 + $0x8] sm:$0xff]   ;;  %v6814_v58 = vld [vmem:[#allocation11 + $0x10] sm:$0xff]  }
 0x24e   : > { %10616 = vst [vmem:[#allocation73_spill] sm:$0xff] %v8231_v4  ;;  %v8242_v54 = vmax.f32 %v1893_v0, %v1894_v17  ;;  %v1115_v23 = vadd.f32 %v1019_v61, %v7927_v45  ;;  %6129 = vmatprep.mubr.bf16.mxu0 %v8231_v4  ;;  %6177 = vmatprep.mubr.bf16.mxu1 %v8231_v4  ;;  %v6811_v45 = vld [vmem:[#allocation8 + $0x88] sm:$0xff]  }
 0x24f   : > { %10617 = vst [vmem:[#allocation74_spill] sm:$0xff] %v8239_v3  ;;  %v1125_v55 = vadd.f32 %v1029_v6, %v7967_v10  ;;  %6130 = vmatmul.mubr.msk.bf16.vlgmr.msra.gmra.mrb[0].mxu0 %vm8227_vm4, %v8239_v3  ;;  %6178 = vmatmul.mubr.msk.bf16.vlgmr.msra.gmra.mrb[0].mxu1 %vm8227_vm4, %v8239_v3  ;;  %v1396_v8 = vmul.f32 %v7839_v28, %v1228_v50 }
 0x250   : > { %v1490_v9 = vadd.f32 %v1394_v31, %v1114_v35  ;;  %v1397_v19 = vmul.f32 %v7848_v2, %v1232_v5  ;;  %v1118_v34 = vadd.f32 %v1022_v41, %v7939_v46  ;;  %v1121_v63 = vadd.f32 %v1025_v39, %v7951_v47  ;;  %1349 = vbcast.lane.b32.xlu0 %v7899_v49, 272 }
 0x251   : > { %v1124_v10 = vadd.f32 %v1028_v22, %v7963_v48  ;;  %v1399_v0 = vmul.f32 %v7839_v28, %v1232_v5  ;;  %v8261_v37 = vadd.f32 %v1396_v8, %v1116_v12  ;;  %v1400_v35 = vmul.f32 %v7848_v2, %v1236_v26  ;;  %1353 = vbcast.lane.b32.xlu1 %v7899_v49, 280  ;;  %v871_v60 = vpop.permute.xlu0 %870  ;;  %v8266_v61 = vpop.permute.xlu1 %874 }
 0x252   : > { %v1603_v44 = vadd.f32 %v7829_v24, %v1490_v9  ;;  %v1493_v53 = vadd.f32 %v1397_v19, %v1117_v43  ;;  %v1896_v46 = vrot.slane %v8242_v54, 2  ;;  %v1395_v47 = vmul.f32 %v7854_v33, %v1228_v50  ;;  %6210 = vmatpush3.bf16.msra.mxu0 %v8141_v57  ;;  %6258 = vmatpush3.bf16.msra.mxu1 %v8143_v25 }
 0x253   : > { %v8270_v48 = vadd.f32 %v1399_v0, %v1119_v15  ;;  %v1401_v52 = vmul.f32 %v7854_v33, %v1236_v26  ;;  %v1402_v49 = vmul.f32 %v7839_v28, %v1236_v26  ;;  %v1496_v17 = vadd.f32 %v1400_v35, %v1120_v38  ;;  %6211 = vmatprep.subr.bf16.mxu0 %v6811_v45 }
 0x254   : > { %v1703_v12 = vmax.f32 %v1603_v44, 0.0  ;;  %v1606_v43 = vadd.f32 %v7829_v24, %v1493_v53  ;;  %6259 = vmatprep.subr.bf16.mxu1 %v6812_v36  ;;  %v1398_v7 = vmul.f32 %v7854_v33, %v1232_v5  ;;  %v1403_v15 = vmul.f32 %v7848_v2, %v1240_v21 }
 0x255   : > { %v1497_v50 = vadd.f32 %v1401_v52, %v1121_v63  ;;  %v1404_v41 = vmul.f32 %v7854_v33, %v1240_v21  ;;  %v1498_v1 = vadd.f32 %v1402_v49, %v1122_v59  ;;  %v1609_v25 = vadd.f32 %v7829_v24, %v1496_v17  ;;  %v879_v22 = vpop.permute.xlu0 %878  ;;  %v8282_v6 = vpop.permute.xlu1 %882 }
 0x256   : > { %v1706_v57 = vmax.f32 %v1606_v43, 0.0  ;;  %v1405_v39 = vmul.f32 %v7839_v28, %v1240_v21  ;;  %v1499_v31 = vadd.f32 %v1403_v15, %v1123_v40  ;;  %v1030_v26 = vmul.f32 %v7845_v30, %v871_v60  ;;  %6212 = vmatpush3.bf16.msra.mxu0 %v6811_v45  ;;  %6260 = vmatpush3.bf16.msra.mxu1 %v6812_v36  ;;  %v6815_v21 = vld [vmem:[#allocation8 + $0x98] sm:$0xff]  }
 0x257   : > { %v8285_v38 = vadd.f32 %v7832_v13, %v1497_v50  ;;  %v1500_v5 = vadd.f32 %v1404_v41, %v1124_v10  ;;  %v8289_v9 = vadd.f32 %v7842_v29, %v1498_v1  ;;  %v1709_v59 = vmax.f32 %v1609_v25, 0.0  ;;  %6213 = vmatprep.subr.bf16.mxu0 %v6813_v14  ;;  %6261 = vmatprep.subr.bf16.mxu1 %v6814_v58  ;;  %v6816_v10 = vld [vmem:[#allocation11 + $0x18] sm:$0xff]  }
 0x258   : > { %v1900_v8 = vmax.f32 %v1703_v12, %v1706_v57  ;;  %v1501_v19 = vadd.f32 %v1405_v39, %v1125_v55  ;;  %v8293_v63 = vmul.f32 %v7821_v20, %v7991_v18  ;;  %v1491_v0 = vadd.f32 %v1395_v47, %v1115_v23  ;;  %v10618_v12 = vld [vmem:[#allocation30_spill] sm:$0xff]  ;;  %v10620_v25 = vld [vmem:[#allocation33_spill] sm:$0xff] }
 0x259   : > { %v1494_v44 = vadd.f32 %v1398_v7, %v1118_v34  ;;  %v1612_v40 = vadd.f32 %v7829_v24, %v1499_v31  ;;  %v1613_v53 = vadd.f32 %v7832_v13, %v1500_v5  ;;  %v1032_v55 = vmul.f32 %v7836_v27, %v871_v60  ;;  %v8301_v36 = vpop.permute.xlu0 %1246  ;;  %v8303_v52 = vpop.permute.xlu1 %1250  ;;  %v10619_v7 = vld [vmem:[#allocation32_spill] sm:$0xff] }
 0x25a   : > { %v1901_v45 = vmax.f32 %v1900_v8, %v1709_v59  ;;  %v8298_v35 = vadd.f32 %v7842_v29, %v1501_v19  ;;  %v8307_v23 = vmul.f32 %v7813_v16, %v7991_v18  ;;  %v8310_v34 = vmax.f32 %v8242_v54, %v1896_v46  ;;  %6214 = vmatpush3.bf16.msra.mxu0 %v6813_v14  ;;  %v6817_v18 = vld [vmem:[#allocation8 + $0xa0] sm:$0xff]  }
 0x25b   : > { %v1712_v47 = vmax.f32 %v1612_v40, 0.0  ;;  %v1126_v43 = vadd.f32 %v1030_v26, %v10618_v12  ;;  %v1710_v49 = vmax.f32 %v8285_v38, 0.0  ;;  %v1031_v17 = vmul.f32 %v7851_v32, %v871_v60  ;;  %6262 = vmatpush3.bf16.msra.mxu1 %v6814_v58  ;;  %6215 = vmatprep.subr.bf16.mxu0 %v6815_v21  ;;  %v6818_v60 = vld [vmem:[#allocation11 + $0x20] sm:$0xff]   ;;  %v10622_v40 = vld [vmem:[#allocation36_spill] sm:$0xff] }
 0x25c   : > { %v1128_v50 = vadd.f32 %v1032_v55, %v10619_v7  ;;  %v1033_v15 = vmul.f32 %v7845_v30, %v8266_v61  ;;  %v1035_v46 = vmul.f32 %v7836_v27, %v8266_v61  ;;  %v1604_v14 = vadd.f32 %v7832_v13, %v1491_v0  ;;  %6263 = vmatprep.subr.bf16.mxu1 %v6816_v10  ;;  %v10621_v26 = vld [vmem:[#allocation35_spill] sm:$0xff]  ;;  %v10624_v7 = vld [vmem:[#allocation38_spill] sm:$0xff] }
 0x25d   : > { %v1816_v54 = vsel %vm1690_vm2, %v1712_v47, 0.0  ;;  %v1607_v41 = vadd.f32 %v7832_v13, %v1494_v44  ;;  %v1713_v57 = vmax.f32 %v1613_v53, 0.0  ;;  %v1036_v58 = vmul.f32 %v7845_v30, %v879_v22  ;;  %v1255_v38 = vpop.permute.xlu0 %1254  ;;  %v8326_v31 = vpop.permute.xlu1 %1258 }
 0x25e   : > { %v1902_v1 = vmax.f32 %v1901_v45, %v1816_v54  ;;  %v1129_v39 = vadd.f32 %v1033_v15, %v10620_v25  ;;  %v1034_v5 = vmul.f32 %v7851_v32, %v8266_v61  ;;  %v1131_v8 = vadd.f32 %v1035_v46, %v10621_v26  ;;  %6216 = vmatpush3.bf16.msra.mxu0 %v6815_v21  ;;  %v10625_v54 = vld [vmem:[#allocation39_spill] sm:$0xff] }
 0x25f   : > { %v1704_v59 = vmax.f32 %v1604_v14, 0.0  ;;  %v1707_v19 = vmax.f32 %v1607_v41, 0.0  ;;  %v1038_v44 = vmul.f32 %v7836_v27, %v879_v22  ;;  %v1132_v45 = vadd.f32 %v1036_v58, %v10622_v40  ;;  %6264 = vmatpush3.bf16.msra.mxu1 %v6816_v10  ;;  %6217 = vmatprep.subr.bf16.mxu0 %v6817_v18  ;;  %v10627_v25 = vld [vmem:[#allocation31_spill] sm:$0xff]  ;;  %v10628_v58 = vld [vmem:[#allocation41_spill] sm:$0xff] }
 0x260   : > { %v1903_v0 = vrot.slane %v1902_v1, 4  ;;  %v1039_v53 = vmul.f32 %v7845_v30, %v8282_v6  ;;  %v1037_v47 = vmul.f32 %v7851_v32, %v879_v22  ;;  %v1040_v61 = vmul.f32 %v7851_v32, %v8282_v6  ;;  %6265 = vmatprep.subr.bf16.mxu1 %v6818_v60  ;;  %v6819_v26 = vld [vmem:[#allocation8 + $0xa8] sm:$0xff]  }
 0x261   : > { %v8335_v55 = vpack.c.bf16 %v1707_v19, %v1704_v59  ;;  %v1041_v21 = vmul.f32 %v7836_v27, %v8282_v6  ;;  %v1134_v15 = vadd.f32 %v1038_v44, %v10624_v7  ;;  %v8344_v14 = vpack.c.bf16 %v1713_v57, %v1710_v49  ;;  %v8346_v10 = vpop.permute.xlu0 %889  ;;  %v8348_v41 = vpop.permute.xlu1 %893  ;;  %v10629_v49 = vld [vmem:[#allocation34_spill] sm:$0xff] }
 0x262   : > { %v1904_v12 = vmax.f32 %v1902_v1, %v1903_v0  ;;  %v1135_v46 = vadd.f32 %v1039_v53, %v10625_v54  ;;  %v1127_v22 = vadd.f32 %v1031_v17, %v10627_v25  ;;  %v1406_v1 = vmul.f32 %v7848_v2, %v8301_v36  ;;  %v6820_v0 = vld [vmem:[#allocation11 + $0x28] sm:$0xff]   ;;  %6218 = vmatpush3.bf16.msra.mxu0 %v6817_v18 }
 0x263   : > { %10623 = vst [vmem:[#allocation30_spill] sm:$0xff] %v8335_v55  ;;  %10626 = vst [vmem:[#allocation32_spill] sm:$0xff] %v8344_v14  ;;  %6133 = vmatprep.mubr.bf16.mxu0 %v8335_v55  ;;  %6181 = vmatprep.mubr.bf16.mxu1 %v8335_v55  ;;  %v1137_v6 = vadd.f32 %v1041_v21, %v10628_v58  ;;  %v1130_v57 = vadd.f32 %v1034_v5, %v10629_v49  ;;  %v10630_v21 = vld [vmem:[#allocation37_spill] sm:$0xff]  ;;  %v10631_v54 = vld [vmem:[#allocation40_spill] sm:$0xff] }
 0x264   : > { %6134 = vmatmul.mubr.msk.bf16.gmra.mrb[4].mxu0 %vm8227_vm4, %v8344_v14  ;;  %6182 = vmatmul.mubr.msk.bf16.gmra.mrb[4].mxu1 %vm8227_vm4, %v8344_v14  ;;  %v1408_v17 = vmul.f32 %v7839_v28, %v8301_v36  ;;  %v1409_v19 = vmul.f32 %v7848_v2, %v8303_v52  ;;  %v1905_v44 = vrot.slane %v1904_v12, 2  ;;  %v1502_v40 = vadd.f32 %v1406_v1, %v1126_v43  ;;  %v6821_v55 = vld [vmem:[#allocation8 + $0xb0] sm:$0xff]  }
 0x265   : > { %v1411_v5 = vmul.f32 %v7839_v28, %v8303_v52  ;;  %v1412_v53 = vmul.f32 %v7848_v2, %v1255_v38  ;;  %v1133_v7 = vadd.f32 %v1037_v47, %v10630_v21  ;;  %v1136_v25 = vadd.f32 %v1040_v61, %v10631_v54  ;;  %v8375_v59 = vpop.permute.xlu0 %897  ;;  %v8377_v14 = vpop.permute.xlu1 %901  ;;  %6266 = vmatpush3.bf16.msra.mxu1 %v6818_v60  ;;  %v6822_v47 = vld [vmem:[#allocation11 + $0x30] sm:$0xff]  }
 0x266   : > { %v8373_v58 = vadd.f32 %v1408_v17, %v1128_v50  ;;  %v1505_v49 = vadd.f32 %v1409_v19, %v1129_v39  ;;  %v1407_v43 = vmul.f32 %v7854_v33, %v8301_v36  ;;  %v1615_v1 = vadd.f32 %v7829_v24, %v1502_v40  ;;  %6219 = vmatprep.subr.bf16.mxu0 %v6819_v26 }
 0x267   : > { %v8382_v56 = vadd.f32 %v1411_v5, %v1131_v8  ;;  %v1413_v18 = vmul.f32 %v7854_v33, %v1255_v38  ;;  %v1410_v50 = vmul.f32 %v7854_v33, %v8303_v52  ;;  %v1414_v61 = vmul.f32 %v7839_v28, %v1255_v38  ;;  %6267 = vmatprep.subr.bf16.mxu1 %v6820_v0  ;;  %v6823_v38 = vld [vmem:[#allocation8 + $0xb8] sm:$0xff]  }
 0x268   : > { %v1618_v39 = vadd.f32 %v7829_v24, %v1505_v49  ;;  %v1508_v60 = vadd.f32 %v1412_v53, %v1132_v45  ;;  %v1906_v17 = vmax.f32 %v1904_v12, %v1905_v44  ;;  %v1715_v19 = vmax.f32 %v1615_v1, 0.0  ;;  %6220 = vmatpush3.bf16.msra.mxu0 %v6819_v26  ;;  %v6824_v26 = vld [vmem:[#allocation11 + $0x38] sm:$0xff]  }
 0x269   : > { %10632 = vst [vmem:[#allocation33_spill] sm:$0xff] %v8382_v56  ;;  %v1415_v36 = vmul.f32 %v7848_v2, %v8326_v31  ;;  %v1416_v8 = vmul.f32 %v7854_v33, %v8326_v31  ;;  %v1509_v5 = vadd.f32 %v1413_v18, %v1133_v7  ;;  %v1510_v21 = vadd.f32 %v1414_v61, %v1134_v15  ;;  %v8394_v54 = vpop.permute.xlu0 %1265  ;;  %v8396_v49 = vpop.permute.xlu1 %1269 }
 0x26a   : > { %v1718_v40 = vmax.f32 %v1618_v39, 0.0  ;;  %v1621_v52 = vadd.f32 %v7829_v24, %v1508_v60  ;;  %6268 = vmatpush3.bf16.msra.mxu1 %v6820_v0  ;;  %6221 = vmatprep.subr.bf16.mxu0 %v6821_v55  ;;  %v1503_v45 = vadd.f32 %v1407_v43, %v1127_v22  ;;  %v1417_v12 = vmul.f32 %v7839_v28, %v8326_v31 }
 0x26b   : > { %v1511_v44 = vadd.f32 %v1415_v36, %v1135_v46  ;;  %v1512_v53 = vadd.f32 %v1416_v8, %v1136_v25  ;;  %6269 = vmatprep.subr.bf16.mxu1 %v6822_v47  ;;  %v8401_v15 = vadd.f32 %v7842_v29, %v1510_v21  ;;  %v1042_v18 = vmul.f32 %v7845_v30, %v8346_v10  ;;  %v6825_v36 = vld [vmem:[#allocation11 + $0x40] sm:$0xff]  }
 0x26c   : > { %v1909_v1 = vmax.f32 %v1715_v19, %v1718_v40  ;;  %v1721_v7 = vmax.f32 %v1621_v52, 0.0  ;;  %v1907_v39 = vrot.slane %v1906_v17, 1  ;;  %v1506_v0 = vadd.f32 %v1410_v50, %v1130_v57  ;;  %6222 = vmatpush3.bf16.msra.mxu0 %v6821_v55  ;;  %v10635_v50 = vld [vmem:[#allocation42_spill] sm:$0xff] }
 0x26d   : > { %10633 = vst [vmem:[#allocation35_spill] sm:$0xff] %v8401_v15  ;;  %v1513_v61 = vadd.f32 %v1417_v12, %v1137_v6  ;;  %v1624_v22 = vadd.f32 %v7829_v24, %v1511_v44  ;;  %v1622_v31 = vadd.f32 %v7832_v13, %v1509_v5  ;;  %v1044_v25 = vmul.f32 %v7836_v27, %v8346_v10  ;;  %v8409_v43 = vpop.permute.xlu0 %1273  ;;  %v8411_v60 = vpop.permute.xlu1 %1277  ;;  %v6826_v8 = vld [vmem:[#allocation11 + $0x80] sm:$0xff]  }
 0x26e   : > { %v1910_v46 = vmax.f32 %v1909_v1, %v1721_v7  ;;  %6270 = vmatpush3.bf16.msra.mxu1 %v6822_v47  ;;  %6223 = vmatprep.subr.bf16.mxu0 %v6823_v38  ;;  %v1625_v19 = vadd.f32 %v7832_v13, %v1512_v53  ;;  %v1138_v55 = vadd.f32 %v1042_v18, %v10635_v50  ;;  %v10636_v40 = vrot.slane %v8310_v34, 1  ;;  %v10638_v47 = vld [vmem:[#allocation44_spill] sm:$0xff] }
 0x26f   : > { %v8415_v57 = vadd.f32 %v7842_v29, %v1513_v61  ;;  %v1724_v6 = vmax.f32 %v1624_v22, 0.0  ;;  %6271 = vmatprep.subr.bf16.mxu1 %v6824_v26  ;;  %v1140_v52 = vadd.f32 %v1044_v25, %v10638_v47  ;;  %v1045_v12 = vmul.f32 %v7845_v30, %v8348_v41  ;;  %v10640_v61 = vld [vmem:[#allocation45_spill] sm:$0xff] }
 0x270   : > { %v8421_v5 = vmax.f32 %v8310_v34, %v10636_v40  ;;  %v8427_v44 = vmax.f32 %v1906_v17, %v1907_v39  ;;  %v1047_v1 = vmul.f32 %v7836_v27, %v8348_v41  ;;  %v1616_v7 = vadd.f32 %v7832_v13, %v1503_v45  ;;  %6224 = vmatpush3.bf16.msra.mxu0 %v6823_v38  ;;  %v10641_v39 = vld [vmem:[#allocation47_spill] sm:$0xff] }
 0x271   : > { %10634 = vst [vmem:[#allocation36_spill] sm:$0xff] %v8415_v57  ;;  %v1828_v53 = vsel %vm1690_vm2, %v1724_v6, 0.0  ;;  %v1722_v34 = vmax.f32 %v1622_v31, 0.0  ;;  %v1141_v22 = vadd.f32 %v1045_v12, %v10640_v61  ;;  %v1619_v25 = vadd.f32 %v7832_v13, %v1506_v0  ;;  %v8436_v50 = vpop.permute.xlu0 %908  ;;  %v8438_v40 = vpop.permute.xlu1 %912  ;;  %6305 = vmatprep.subr.bf16.mxu0 %v6825_v36 }
 0x272   : > { %10637 = vst [vmem:[#allocation38_spill] sm:$0xff] %v8421_v5  ;;  %10639 = vst [vmem:[#allocation39_spill] sm:$0xff] %v8427_v44  ;;  %v1911_v18 = vmax.f32 %v1910_v46, %v1828_v53  ;;  %6272 = vmatpush3.bf16.msra.mxu1 %v6824_v26  ;;  %v1725_v17 = vmax.f32 %v1625_v19, 0.0  ;;  %v1143_v6 = vadd.f32 %v1047_v1, %v10641_v39  ;;  %v1716_v47 = vmax.f32 %v1616_v7, 0.0  ;;  %v10642_v19 = vld [vmem:[#allocation48_spill] sm:$0xff]  ;;  %v10644_v53 = vld [vmem:[#allocation50_spill] sm:$0xff] }
 0x273   : > { %v1048_v21 = vmul.f32 %v7845_v30, %v8375_v59  ;;  %6353 = vmatprep.subr.bf16.mxu1 %v6826_v8  ;;  %v1043_v38 = vmul.f32 %v7851_v32, %v8346_v10  ;;  %v1719_v45 = vmax.f32 %v1619_v25, 0.0  ;;  %v1050_v0 = vmul.f32 %v7836_v27, %v8375_v59  ;;  %v10645_v7 = vld [vmem:[#allocation51_spill] sm:$0xff] }
 0x274   : > { %v1051_v31 = vmul.f32 %v7845_v30, %v8377_v14  ;;  %v1046_v26 = vmul.f32 %v7851_v32, %v8348_v41  ;;  %v1049_v46 = vmul.f32 %v7851_v32, %v8375_v59  ;;  %v1053_v36 = vmul.f32 %v7836_v27, %v8377_v14  ;;  %v10646_v59 = vld [vmem:[#allocation53_spill] sm:$0xff] }
 0x275   : > { %v1144_v12 = vadd.f32 %v1048_v21, %v10642_v19  ;;  %v1912_v8 = vrot.slane %v1911_v18, 4  ;;  %v8456_v10 = vpack.c.bf16 %v1719_v45, %v1716_v47  ;;  %v1146_v1 = vadd.f32 %v1050_v0, %v10644_v53  ;;  %v8460_v25 = vpop.permute.xlu0 %916  ;;  %v8462_v39 = vpop.permute.xlu1 %920  ;;  %v10648_v45 = vld [vmem:[#allocation43_spill] sm:$0xff] }
 0x276   : > { %v1147_v61 = vadd.f32 %v1051_v31, %v10645_v7  ;;  %v1052_v41 = vmul.f32 %v7851_v32, %v8377_v14  ;;  %v1149_v44 = vadd.f32 %v1053_v36, %v10646_v59  ;;  %v8467_v21 = vpack.c.bf16 %v1725_v17, %v1722_v34  ;;  %v10649_v17 = vld [vmem:[#allocation46_spill] sm:$0xff]  ;;  %v10650_v59 = vld [vmem:[#allocation49_spill] sm:$0xff] }
 0x277   : > { %10643 = vst [vmem:[#allocation31_spill] sm:$0xff] %v8456_v10  ;;  %v1418_v19 = vmul.f32 %v7848_v2, %v8394_v54  ;;  %v1139_v0 = vadd.f32 %v1043_v38, %v10648_v45  ;;  %6137 = vmatprep.mubr.bf16.mxu0 %v8456_v10  ;;  %6185 = vmatprep.mubr.bf16.mxu1 %v8456_v10 }
 0x278   : > { %10647 = vst [vmem:[#allocation41_spill] sm:$0xff] %v8467_v21  ;;  %v1420_v31 = vmul.f32 %v7839_v28, %v8394_v54  ;;  %v1421_v14 = vmul.f32 %v7848_v2, %v8396_v49  ;;  %v1142_v36 = vadd.f32 %v1046_v26, %v10649_v17  ;;  %6138 = vmatmul.mubr.msk.bf16.gmra.mrb[8].mxu0 %vm8227_vm4, %v8467_v21  ;;  %v10652_v17 = vld [vmem:[#allocation52_spill] sm:$0xff] }
 0x279   : > { %6186 = vmatmul.mubr.msk.bf16.gmra.mrb[8].mxu1 %vm8227_vm4, %v8467_v21  ;;  %v1514_v38 = vadd.f32 %v1418_v19, %v1138_v55  ;;  %v1423_v53 = vmul.f32 %v7839_v28, %v8396_v49  ;;  %v1913_v7 = vmax.f32 %v1911_v18, %v1912_v8  ;;  %v1145_v45 = vadd.f32 %v1049_v46, %v10650_v59  ;;  %v8492_v10 = vpop.permute.xlu0 %1284  ;;  %v8494_v26 = vpop.permute.xlu1 %1288 }
 0x27a   : > { %v8490_v47 = vadd.f32 %v1420_v31, %v1140_v52  ;;  %v1517_v34 = vadd.f32 %v1421_v14, %v1141_v22  ;;  %v1148_v5 = vadd.f32 %v1052_v41, %v10652_v17  ;;  %v1424_v55 = vmul.f32 %v7848_v2, %v8409_v43 }
 0x27b   : > { %v1627_v3 = vadd.f32 %v7829_v24, %v1514_v38  ;;  %v8498_v4 = vadd.f32 %v1423_v53, %v1143_v6  ;;  %v1419_v18 = vmul.f32 %v7854_v33, %v8394_v54  ;;  %v1425_v22 = vmul.f32 %v7854_v33, %v8409_v43 }
 0x27c   : > { %10651 = vst [vmem:[#allocation34_spill] sm:$0xff] %v8490_v47  ;;  %v1630_v52 = vadd.f32 %v7829_v24, %v1517_v34  ;;  %v1426_v46 = vmul.f32 %v7839_v28, %v8409_v43  ;;  %v1520_v41 = vadd.f32 %v1424_v55, %v1144_v12  ;;  %v1427_v6 = vmul.f32 %v7848_v2, %v8411_v60 }
 0x27d   : > { %10653 = vst [vmem:[#allocation37_spill] sm:$0xff] %v8498_v4  ;;  %v1727_v8 = vmax.f32 %v1627_v3, 0.0  ;;  %v1428_v19 = vmul.f32 %v7854_v33, %v8411_v60  ;;  %v1422_v31 = vmul.f32 %v7854_v33, %v8396_v49  ;;  %v1521_v14 = vadd.f32 %v1425_v22, %v1145_v45  ;;  %v8515_v38 = vpop.permute.xlu0 %1292  ;;  %v8517_v53 = vpop.permute.xlu1 %1296 }
 0x27e   : > { %v1730_v54 = vmax.f32 %v1630_v52, 0.0  ;;  %v1522_v34 = vadd.f32 %v1426_v46, %v1146_v1  ;;  %v1633_v43 = vadd.f32 %v7829_v24, %v1520_v41  ;;  %v1429_v3 = vmul.f32 %v7839_v28, %v8411_v60  ;;  %v10660_v46 = vld [vmem:[#allocation62_spill] sm:$0xff] }
 0x27f   : > { %v1523_v12 = vadd.f32 %v1427_v6, %v1147_v61  ;;  %v1524_v59 = vadd.f32 %v1428_v19, %v1148_v5  ;;  %v1914_v17 = vrot.slane %v1913_v7, 2  ;;  %v1054_v49 = vmul.f32 %v7845_v30, %v8436_v50 }
 0x280   : > { %v1918_v55 = vmax.f32 %v1727_v8, %v1730_v54  ;;  %v8523_v21 = vadd.f32 %v7842_v29, %v1522_v34  ;;  %v1634_v1 = vadd.f32 %v7832_v13, %v1521_v14  ;;  %v1733_v45 = vmax.f32 %v1633_v43, 0.0  ;;  %v10654_v34 = vld [vmem:[#allocation54_spill] sm:$0xff] }
 0x281   : > { %v1525_v52 = vadd.f32 %v1429_v3, %v1149_v44  ;;  %v1636_v22 = vadd.f32 %v7829_v24, %v1523_v12  ;;  %v1515_v41 = vadd.f32 %v1419_v18, %v1139_v0  ;;  %v1518_v60 = vadd.f32 %v1422_v31, %v1142_v36  ;;  %v8532_v61 = vpop.permute.xlu0 %927  ;;  %v8534_v8 = vpop.permute.xlu1 %931  ;;  %v10655_v0 = vld [vmem:[#allocation56_spill] sm:$0xff] }
 0x282   : > { %v1056_v5 = vmul.f32 %v7836_v27, %v8436_v50  ;;  %v1919_v6 = vmax.f32 %v1918_v55, %v1733_v45  ;;  %v1637_v19 = vadd.f32 %v7832_v13, %v1524_v59  ;;  %v8540_v14 = vmax.f32 %v1913_v7, %v1914_v17  ;;  %v10656_v7 = vld [vmem:[#allocation57_spill] sm:$0xff] }
 0x283   : > { %v8538_v54 = vadd.f32 %v7842_v29, %v1525_v52  ;;  %v1736_v44 = vmax.f32 %v1636_v22, 0.0  ;;  %v1150_v43 = vadd.f32 %v1054_v49, %v10654_v34  ;;  %v1057_v18 = vmul.f32 %v7845_v30, %v8438_v40 }
 0x284   : > { %v1152_v36 = vadd.f32 %v1056_v5, %v10655_v0  ;;  %v1734_v31 = vmax.f32 %v1634_v1, 0.0  ;;  %v1055_v12 = vmul.f32 %v7851_v32, %v8436_v50  ;;  %v1059_v59 = vmul.f32 %v7836_v27, %v8438_v40 }
 0x285   : > { %v1840_v3 = vsel %vm1690_vm2, %v1736_v44, 0.0  ;;  %v1153_v17 = vadd.f32 %v1057_v18, %v10656_v7  ;;  %v1628_v49 = vadd.f32 %v7832_v13, %v1515_v41  ;;  %v1631_v45 = vadd.f32 %v7832_v13, %v1518_v60  ;;  %v8555_v52 = vpop.permute.xlu0 %652  ;;  %v8557_v22 = vpop.permute.xlu1 %656  ;;  %v10657_v44 = vld [vmem:[#allocation59_spill] sm:$0xff] }
 0x286   : > { %v1920_v55 = vmax.f32 %v1919_v6, %v1840_v3  ;;  %v1737_v1 = vmax.f32 %v1637_v19, 0.0  ;;  %v1058_v5 = vmul.f32 %v7851_v32, %v8438_v40  ;;  %v1155_v50 = vadd.f32 %v1059_v59, %v10657_v44  ;;  %v10658_v3 = vld [vmem:[#allocation60_spill] sm:$0xff] }
 0x287   : > { %v1060_v34 = vmul.f32 %v7845_v30, %v8460_v25  ;;  %v1728_v0 = vmax.f32 %v1628_v49, 0.0  ;;  %v1731_v18 = vmax.f32 %v1631_v45, 0.0  ;;  %v1062_v41 = vmul.f32 %v7836_v27, %v8460_v25 }
 0x288   : > { %v1921_v6 = vrot.slane %v1920_v55, 4  ;;  %v1061_v60 = vmul.f32 %v7851_v32, %v8460_v25  ;;  %v1063_v19 = vmul.f32 %v7845_v30, %v8462_v39  ;;  %v1064_v40 = vmul.f32 %v7851_v32, %v8462_v39  ;;  %v10661_v25 = vld [vmem:[#allocation55_spill] sm:$0xff] }
 0x289   : > { %v1156_v7 = vadd.f32 %v1060_v34, %v10658_v3  ;;  %v8573_v44 = vpack.c.bf16 %v1731_v18, %v1728_v0  ;;  %v1158_v49 = vadd.f32 %v1062_v41, %v10660_v46  ;;  %v1065_v45 = vmul.f32 %v7836_v27, %v8462_v39  ;;  %v8578_v4 = vpop.permute.xlu0 %935  ;;  %v8580_v47 = vpop.permute.xlu1 %939  ;;  %v10662_v3 = vld [vmem:[#allocation63_spill] sm:$0xff]  ;;  %v10664_v0 = vld [vmem:[#allocation58_spill] sm:$0xff]  ;;  %v10665_v39 = vld [vmem:[#allocation65_spill] sm:$0xff] }
 0x28a   : > { %v1922_v59 = vmax.f32 %v1920_v55, %v1921_v6  ;;  %v1151_v34 = vadd.f32 %v1055_v12, %v10661_v25  ;;  %v1159_v57 = vadd.f32 %v1063_v19, %v10662_v3  ;;  %v8584_v15 = vpack.c.bf16 %v1737_v1, %v1734_v31  ;;  %v10666_v19 = vld [vmem:[#allocation61_spill] sm:$0xff] }
 0x28b   : > { %10659 = vst [vmem:[#allocation40_spill] sm:$0xff] %v8573_v44  ;;  %v1430_v55 = vmul.f32 %v7848_v2, %v8492_v10  ;;  %v1154_v18 = vadd.f32 %v1058_v5, %v10664_v0  ;;  %6141 = vmatprep.mubr.bf16.mxu0 %v8573_v44  ;;  %6189 = vmatprep.mubr.bf16.mxu1 %v8573_v44  ;;  %v1916_v12 = vrot.slane %v8540_v14, 1 }
 0x28c   : > { %10663 = vst [vmem:[#allocation42_spill] sm:$0xff] %v8584_v15  ;;  %v1923_v6 = vrot.slane %v1922_v59, 2  ;;  %v1161_v46 = vadd.f32 %v1065_v45, %v10665_v39  ;;  %v1432_v41 = vmul.f32 %v7839_v28, %v8492_v10  ;;  %v1157_v31 = vadd.f32 %v1061_v60, %v10666_v19  ;;  %6142 = vmatmul.mubr.msk.bf16.gmra.mrb[12].mxu0 %vm8227_vm4, %v8584_v15  ;;  %v10667_v45 = vld [vmem:[#allocation64_spill] sm:$0xff] }
 0x28d   : > { %6190 = vmatmul.mubr.msk.bf16.gmra.mrb[12].mxu1 %vm8227_vm4, %v8584_v15  ;;  %v1526_v1 = vadd.f32 %v1430_v55, %v1150_v43  ;;  %v1433_v5 = vmul.f32 %v7848_v2, %v8494_v26  ;;  %v1160_v25 = vadd.f32 %v1064_v40, %v10667_v45  ;;  %v1431_v3 = vmul.f32 %v7854_v33, %v8492_v10  ;;  %v8611_v39 = vpop.permute.xlu0 %1303  ;;  %v8613_v19 = vpop.permute.xlu1 %1307 }
 0x28e   : > { %v8607_v0 = vadd.f32 %v1432_v41, %v1152_v36  ;;  %v1435_v60 = vmul.f32 %v7839_v28, %v8494_v26  ;;  %v1434_v43 = vmul.f32 %v7854_v33, %v8494_v26  ;;  %v1436_v40 = vmul.f32 %v7848_v2, %v8515_v38 }
 0x28f   : > { %v1639_v15 = vadd.f32 %v7829_v24, %v1526_v1  ;;  %v1529_v55 = vadd.f32 %v1433_v5, %v1153_v17  ;;  %v1924_v45 = vmax.f32 %v1922_v59, %v1923_v6  ;;  %v1437_v36 = vmul.f32 %v7854_v33, %v8515_v38 }
 0x290   : > { %10668 = vst [vmem:[#allocation44_spill] sm:$0xff] %v8607_v0  ;;  %v8620_v10 = vadd.f32 %v1435_v60, %v1155_v50  ;;  %v1438_v41 = vmul.f32 %v7839_v28, %v8515_v38  ;;  %v1532_v1 = vadd.f32 %v1436_v40, %v1156_v7  ;;  %v1439_v26 = vmul.f32 %v7848_v2, %v8517_v53 }
 0x291   : > { %v1739_v44 = vmax.f32 %v1639_v15, 0.0  ;;  %v1642_v0 = vadd.f32 %v7829_v24, %v1529_v55  ;;  %v1527_v17 = vadd.f32 %v1431_v3, %v1151_v34  ;;  %v1533_v5 = vadd.f32 %v1437_v36, %v1157_v31  ;;  %v8631_v59 = vpop.permute.xlu0 %1311  ;;  %v8633_v6 = vpop.permute.xlu1 %1315 }
 0x292   : > { %10669 = vst [vmem:[#allocation45_spill] sm:$0xff] %v8620_v10  ;;  %v1534_v56 = vadd.f32 %v1438_v41, %v1158_v49  ;;  %v1440_v50 = vmul.f32 %v7854_v33, %v8517_v53  ;;  %v1645_v38 = vadd.f32 %v7829_v24, %v1532_v1  ;;  %v1441_v15 = vmul.f32 %v7839_v28, %v8517_v53 }
 0x293   : > { %v1742_v60 = vmax.f32 %v1642_v0, 0.0  ;;  %v1535_v7 = vadd.f32 %v1439_v26, %v1159_v57  ;;  %v1925_v55 = vrot.slane %v1924_v45, 1  ;;  %v1646_v40 = vadd.f32 %v7832_v13, %v1533_v5 }
 0x294   : > { %v8640_v34 = vadd.f32 %v7842_v29, %v1534_v56  ;;  %v1536_v49 = vadd.f32 %v1440_v50, %v1160_v25  ;;  %v1745_v3 = vmax.f32 %v1645_v38, 0.0  ;;  %v1537_v36 = vadd.f32 %v1441_v15, %v1161_v46 }
 0x295   : > { %v1927_v31 = vmax.f32 %v1739_v44, %v1742_v60  ;;  %v1648_v41 = vadd.f32 %v7829_v24, %v1535_v7  ;;  %v1530_v10 = vadd.f32 %v1434_v43, %v1154_v18  ;;  %v1066_v1 = vmul.f32 %v7845_v30, %v8532_v61  ;;  %v8648_v53 = vpop.permute.xlu0 %663  ;;  %v8650_v26 = vpop.permute.xlu1 %667 }
 0x296   : > { %v1649_v0 = vadd.f32 %v7832_v13, %v1536_v49  ;;  %v1067_v57 = vmul.f32 %v7851_v32, %v8532_v61  ;;  %v8653_v44 = vadd.f32 %v7842_v29, %v1537_v36  ;;  %v1068_v18 = vmul.f32 %v7836_v27, %v8532_v61 }
 0x297   : > { %v1928_v56 = vmax.f32 %v1927_v31, %v1745_v3  ;;  %v1748_v46 = vmax.f32 %v1648_v41, 0.0  ;;  %v8658_v25 = vmax.f32 %v8540_v14, %v1916_v12  ;;  %v1069_v50 = vmul.f32 %v7845_v30, %v8534_v8  ;;  %v10672_v14 = vld [vmem:[#allocation66_spill] sm:$0xff]  ;;  %v10673_v41 = vld [vmem:[#allocation68_spill] sm:$0xff] }
 0x298   : > { %v8664_v60 = vmax.f32 %v1924_v45, %v1925_v55  ;;  %v1746_v38 = vmax.f32 %v1646_v40, 0.0  ;;  %v1070_v7 = vmul.f32 %v7851_v32, %v8534_v8  ;;  %v1749_v61 = vmax.f32 %v1649_v0, 0.0  ;;  %v10674_v55 = vld [vmem:[#allocation69_spill] sm:$0xff] }
 0x299   : > { %10670 = vst [vmem:[#allocation47_spill] sm:$0xff] %v8658_v25  ;;  %v1852_v15 = vsel %vm1690_vm2, %v1748_v46, 0.0  ;;  %v1162_v12 = vadd.f32 %v1066_v1, %v10672_v14  ;;  %v1640_v31 = vadd.f32 %v7832_v13, %v1527_v17  ;;  %v8672_v3 = vpop.permute.xlu0 %946  ;;  %v8674_v36 = vpop.permute.xlu1 %950  ;;  %v1163_v45 = vadd.f32 %v1067_v57, %v10673_v41 }
 0x29a   : > { %10671 = vst [vmem:[#allocation48_spill] sm:$0xff] %v8664_v60  ;;  %v1929_v49 = vmax.f32 %v1928_v56, %v1852_v15  ;;  %v1164_v40 = vadd.f32 %v1068_v18, %v10674_v55  ;;  %v1071_v46 = vmul.f32 %v7836_v27, %v8534_v8  ;;  %v1643_v5 = vadd.f32 %v7832_v13, %v1530_v10 }
 0x29b   : > { %v1165_v0 = vadd.f32 %v1069_v50, %v8201_v51  ;;  %v8683_v1 = vadd.f32 %v1070_v7, %v8293_v63  ;;  %v1740_v17 = vmax.f32 %v1640_v31, 0.0  ;;  %v791_v15 = vmul.f32 %v7818_v11, %v8555_v52 }
 0x29c   : > { %v1930_v43 = vrot.slane %v1929_v49, 4  ;;  %v1743_v56 = vmax.f32 %v1643_v5, 0.0  ;;  %v792_v57 = vmul.f32 %v7821_v20, %v8555_v52  ;;  %v793_v18 = vmul.f32 %v7813_v16, %v8555_v52 }
 0x29d   : > { %v794_v10 = vmul.f32 %v7818_v11, %v8557_v22  ;;  %v8695_v51 = vpack.c.bf16 %v1749_v61, %v1746_v38  ;;  %v1072_v63 = vmul.f32 %v7845_v30, %v8578_v4  ;;  %v8699_v5 = vpop.permute.xlu0 %671  ;;  %v8701_v50 = vpop.permute.xlu1 %675  ;;  %v1073_v14 = vmul.f32 %v7851_v32, %v8578_v4 }
 0x29e   : > { %v8691_v8 = vmax.f32 %v1929_v49, %v1930_v43  ;;  %v8703_v7 = vpack.c.bf16 %v1743_v56, %v1740_v17  ;;  %v1074_v52 = vmul.f32 %v7836_v27, %v8578_v4  ;;  %v1075_v43 = vmul.f32 %v7845_v30, %v8580_v47 }
 0x29f   : > { %10675 = vst [vmem:[#allocation50_spill] sm:$0xff] %v8695_v51  ;;  %v796_v38 = vmul.f32 %v7813_v16, %v8557_v22  ;;  %v1168_v61 = vadd.f32 %v1072_v63, %v791_v15  ;;  %v1076_v49 = vmul.f32 %v7851_v32, %v8580_v47  ;;  %v1077_v31 = vmul.f32 %v7836_v27, %v8580_v47 }
 0x2a0   : > { %10676 = vst [vmem:[#allocation51_spill] sm:$0xff] %v8703_v7  ;;  %v1167_v55 = vadd.f32 %v1071_v46, %v8307_v23  ;;  %6145 = vmatprep.mubr.bf16.mxu0 %v8703_v7  ;;  %6193 = vmatprep.mubr.bf16.mxu1 %v8703_v7  ;;  %v1170_v4 = vadd.f32 %v1074_v52, %v793_v18  ;;  %v1932_v56 = vrot.slane %v8691_v8, 2 }
 0x2a1   : > { %v1171_v17 = vadd.f32 %v1075_v43, %v794_v10  ;;  %v795_v15 = vmul.f32 %v7821_v20, %v8557_v22  ;;  %6146 = vmatmul.mubr.msk.bf16.gmra.mrb[16].mxu0 %vm8227_vm4, %v8695_v51  ;;  %6194 = vmatmul.mubr.msk.bf16.gmra.mrb[16].mxu1 %vm8227_vm4, %v8695_v51  ;;  %v1173_v23 = vadd.f32 %v1077_v31, %v796_v38  ;;  %v8732_v46 = vpop.permute.xlu0 %954  ;;  %v8734_v18 = vpop.permute.xlu1 %958 }
 0x2a2   : > { %v1442_v47 = vmul.f32 %v7848_v2, %v8611_v39  ;;  %v1169_v10 = vadd.f32 %v1073_v14, %v792_v57  ;;  %v1443_v22 = vmul.f32 %v7854_v33, %v8611_v39  ;;  %v1444_v63 = vmul.f32 %v7839_v28, %v8611_v39 }
 0x2a3   : > { %v1445_v52 = vmul.f32 %v7848_v2, %v8613_v19  ;;  %v1172_v43 = vadd.f32 %v1076_v49, %v795_v15  ;;  %v1447_v38 = vmul.f32 %v7839_v28, %v8613_v19  ;;  %v1448_v31 = vmul.f32 %v7848_v2, %v8631_v59 }
 0x2a4   : > { %v1538_v41 = vadd.f32 %v1442_v47, %v1162_v12  ;;  %v1539_v51 = vadd.f32 %v1443_v22, %v1163_v45  ;;  %v8746_v7 = vadd.f32 %v1444_v63, %v1164_v40  ;;  %v1446_v57 = vmul.f32 %v7854_v33, %v8613_v19 }
 0x2a5   : > { %v1541_v14 = vadd.f32 %v1445_v52, %v1165_v0  ;;  %v8751_v60 = vadd.f32 %v1447_v38, %v1167_v55  ;;  %v1449_v12 = vmul.f32 %v7854_v33, %v8631_v59  ;;  %v1450_v49 = vmul.f32 %v7839_v28, %v8631_v59  ;;  %v8757_v15 = vpop.permute.xlu0 %1322  ;;  %v8764_v0 = vpop.permute.xlu1 %1326 }
 0x2a6   : > { %10677 = vst [vmem:[#allocation53_spill] sm:$0xff] %v8746_v7  ;;  %v1651_v39 = vadd.f32 %v7829_v24, %v1538_v41  ;;  %v1544_v40 = vadd.f32 %v1448_v31, %v1168_v61  ;;  %v1451_v47 = vmul.f32 %v7848_v2, %v8633_v6  ;;  %v1452_v19 = vmul.f32 %v7854_v33, %v8633_v6 }
 0x2a7   : > { %10678 = vst [vmem:[#allocation43_spill] sm:$0xff] %v8751_v60  ;;  %v1654_v45 = vadd.f32 %v7829_v24, %v1541_v14  ;;  %v1545_v55 = vadd.f32 %v1449_v12, %v1169_v10  ;;  %v1546_v22 = vadd.f32 %v1450_v49, %v1170_v4  ;;  %v1453_v63 = vmul.f32 %v7839_v28, %v8633_v6 }
 0x2a8   : > { %v1751_v41 = vmax.f32 %v1651_v39, 0.0  ;;  %v1657_v52 = vadd.f32 %v7829_v24, %v1544_v40  ;;  %v1547_v38 = vadd.f32 %v1451_v47, %v1171_v17  ;;  %v1548_v14 = vadd.f32 %v1452_v19, %v1172_v43 }
 0x2a9   : > { %v1754_v59 = vmax.f32 %v1654_v45, 0.0  ;;  %v1542_v61 = vadd.f32 %v1446_v57, %v8683_v1  ;;  %v1658_v31 = vadd.f32 %v7832_v13, %v1545_v55  ;;  %v8772_v25 = vadd.f32 %v7842_v29, %v1546_v22  ;;  %v8776_v6 = vpop.permute.xlu0 %1330  ;;  %v8789_v40 = vpop.permute.xlu1 %1334 }
 0x2aa   : > { %v1549_v60 = vadd.f32 %v1453_v63, %v1173_v23  ;;  %v1757_v39 = vmax.f32 %v1657_v52, 0.0  ;;  %v1660_v4 = vadd.f32 %v7829_v24, %v1547_v38  ;;  %v1661_v10 = vadd.f32 %v7832_v13, %v1548_v14 }
 0x2ab   : > { %v1936_v7 = vmax.f32 %v1751_v41, %v1754_v59  ;;  %v8780_v17 = vmax.f32 %v8691_v8, %v1932_v56  ;;  %v797_v43 = vmul.f32 %v7818_v11, %v8648_v53  ;;  %v1758_v23 = vmax.f32 %v1658_v31, 0.0 }
 0x2ac   : > { %v8783_v1 = vadd.f32 %v7842_v29, %v1549_v60  ;;  %v1760_v49 = vmax.f32 %v1660_v4, 0.0  ;;  %v798_v45 = vmul.f32 %v7821_v20, %v8648_v53  ;;  %v1761_v47 = vmax.f32 %v1661_v10, 0.0 }
 0x2ad   : > { %v1937_v57 = vmax.f32 %v1936_v7, %v1757_v39  ;;  %v799_v19 = vmul.f32 %v7813_v16, %v8648_v53  ;;  %v800_v8 = vmul.f32 %v7818_v11, %v8650_v26  ;;  %v801_v60 = vmul.f32 %v7821_v20, %v8650_v26 }
 0x2ae   : > { %v1864_v56 = vsel %vm1690_vm2, %v1760_v49, 0.0  ;;  %v1652_v7 = vadd.f32 %v7832_v13, %v1539_v51  ;;  %v1655_v41 = vadd.f32 %v7832_v13, %v1542_v61  ;;  %v1078_v55 = vmul.f32 %v7845_v30, %v8672_v3  ;;  %v8811_v61 = vpop.permute.xlu0 %682 }
 0x2af   : > { %v1938_v22 = vmax.f32 %v1937_v57, %v1864_v56  ;;  %v1079_v53 = vmul.f32 %v7851_v32, %v8672_v3  ;;  %v1080_v63 = vmul.f32 %v7836_v27, %v8672_v3  ;;  %v1081_v59 = vmul.f32 %v7845_v30, %v8674_v36 }
 0x2b0   : > { %v1752_v52 = vmax.f32 %v1652_v7, 0.0  ;;  %v1755_v38 = vmax.f32 %v1655_v41, 0.0  ;;  %v1174_v14 = vadd.f32 %v1078_v55, %v797_v43  ;;  %v1082_v51 = vmul.f32 %v7851_v32, %v8674_v36  ;;  %v8822_v43 = vpop.permute.xlu1 %686 }
 0x2b1   : > { %v1939_v31 = vrot.slane %v1938_v22, 4  ;;  %v802_v39 = vmul.f32 %v7813_v16, %v8650_v26  ;;  %v1176_v4 = vadd.f32 %v1080_v63, %v799_v19  ;;  %v1083_v10 = vmul.f32 %v7836_v27, %v8674_v36 }
 0x2b2   : > { %v8818_v57 = vpack.c.bf16 %v1755_v38, %v1752_v52  ;;  %v1177_v49 = vadd.f32 %v1081_v59, %v800_v8  ;;  %v8820_v56 = vpack.c.bf16 %v1761_v47, %v1758_v23  ;;  %v1175_v41 = vadd.f32 %v1079_v53, %v798_v45  ;;  %v8858_v52 = vpop.permute.xlu0 %965 }
 0x2b3   : > { %v8824_v7 = vmax.f32 %v1938_v22, %v1939_v31  ;;  %v8826_v55 = vadd.f32 %v1082_v51, %v801_v60  ;;  %v1179_v12 = vadd.f32 %v1083_v10, %v802_v39  ;;  %v803_v36 = vmul.f32 %v7818_v11, %v8699_v5 }
 0x2b4   : > { %10679 = vst [vmem:[#allocation46_spill] sm:$0xff] %v8818_v57  ;;  %10680 = vst [vmem:[#allocation49_spill] sm:$0xff] %v8820_v56  ;;  %6149 = vmatprep.mubr.bf16.mxu0 %v8818_v57  ;;  %6197 = vmatprep.mubr.bf16.mxu1 %v8818_v57  ;;  %v805_v23 = vmul.f32 %v7813_v16, %v8699_v5  ;;  %v806_v47 = vmul.f32 %v7818_v11, %v8701_v50  ;;  %v8867_v26 = vpop.permute.xlu1 %969 }
 0x2b5   : > { %6150 = vmatmul.mubr.msk.bf16.gmra.mrb[20].mxu0 %vm8227_vm4, %v8820_v56  ;;  %6198 = vmatmul.mubr.msk.bf16.gmra.mrb[20].mxu1 %vm8227_vm4, %v8820_v56  ;;  %v808_v19 = vmul.f32 %v7813_v16, %v8701_v50  ;;  %v1084_v8 = vmul.f32 %v7845_v30, %v8732_v46  ;;  %v1085_v60 = vmul.f32 %v7851_v32, %v8732_v46  ;;  %v1941_v39 = vrot.slane %v8824_v7, 2 }
 0x2b6   : > { %v1086_v22 = vmul.f32 %v7836_v27, %v8732_v46  ;;  %v1087_v53 = vmul.f32 %v7845_v30, %v8734_v18  ;;  %v1088_v63 = vmul.f32 %v7851_v32, %v8734_v18  ;;  %v1089_v59 = vmul.f32 %v7836_v27, %v8734_v18 }
 0x2b7   : > { %v804_v38 = vmul.f32 %v7821_v20, %v8699_v5  ;;  %v807_v51 = vmul.f32 %v7821_v20, %v8701_v50  ;;  %v1180_v31 = vadd.f32 %v1084_v8, %v803_v36  ;;  %v1454_v46 = vmul.f32 %v7848_v2, %v8757_v15 }
 0x2b8   : > { %v1182_v10 = vadd.f32 %v1086_v22, %v805_v23  ;;  %v1183_v3 = vadd.f32 %v1087_v53, %v806_v47  ;;  %v1185_v45 = vadd.f32 %v1089_v59, %v808_v19  ;;  %v1456_v56 = vmul.f32 %v7839_v28, %v8757_v15 }
 0x2b9   : > { %v1181_v18 = vadd.f32 %v1085_v60, %v804_v38  ;;  %v1550_v57 = vadd.f32 %v1454_v46, %v1174_v14  ;;  %v1457_v5 = vmul.f32 %v7848_v2, %v8764_v0  ;;  %v1184_v50 = vadd.f32 %v1088_v63, %v807_v51  ;;  %v8890_v38 = vpop.permute.xlu0 %690 }
 0x2ba   : > { %v1459_v36 = vmul.f32 %v7839_v28, %v8764_v0  ;;  %v1460_v8 = vmul.f32 %v7848_v2, %v8776_v6  ;;  %v1461_v23 = vmul.f32 %v7854_v33, %v8776_v6  ;;  %v1455_v47 = vmul.f32 %v7854_v33, %v8757_v15 }
 0x2bb   : > { %v8881_v19 = vadd.f32 %v1456_v56, %v1176_v4  ;;  %v1663_v14 = vadd.f32 %v7829_v24, %v1550_v57  ;;  %v1553_v60 = vadd.f32 %v1457_v5, %v1177_v49  ;;  %v1458_v22 = vmul.f32 %v7854_v33, %v8764_v0 }
 0x2bc   : > { %v8886_v53 = vadd.f32 %v1459_v36, %v1179_v12  ;;  %v1462_v63 = vmul.f32 %v7839_v28, %v8776_v6  ;;  %v1556_v59 = vadd.f32 %v1460_v8, %v1180_v31  ;;  %v1557_v15 = vadd.f32 %v1461_v23, %v1181_v18  ;;  %v8900_v6 = vpop.permute.xlu1 %694 }
 0x2bd   : > { %v1763_v51 = vmax.f32 %v1663_v14, 0.0  ;;  %v1666_v46 = vadd.f32 %v7829_v24, %v1553_v60  ;;  %v1463_v4 = vmul.f32 %v7848_v2, %v8789_v40  ;;  %v1464_v0 = vmul.f32 %v7854_v33, %v8789_v40 }
 0x2be   : > { %v1558_v57 = vadd.f32 %v1462_v63, %v1182_v10  ;;  %v1669_v49 = vadd.f32 %v7829_v24, %v1556_v59  ;;  %v1465_v12 = vmul.f32 %v7839_v28, %v8789_v40  ;;  %v1551_v56 = vadd.f32 %v1455_v47, %v1175_v41 }
 0x2bf   : > { %v1766_v31 = vmax.f32 %v1666_v46, 0.0  ;;  %v1670_v5 = vadd.f32 %v7832_v13, %v1557_v15  ;;  %v1559_v36 = vadd.f32 %v1463_v4, %v1183_v3  ;;  %v1560_v10 = vadd.f32 %v1464_v0, %v1184_v50  ;;  %v974_v46 = vpop.permute.xlu0 %973 }
 0x2c0   : > { %v8904_v18 = vadd.f32 %v7842_v29, %v1558_v57  ;;  %v1769_v8 = vmax.f32 %v1669_v49, 0.0  ;;  %v1561_v23 = vadd.f32 %v1465_v12, %v1185_v45  ;;  %v8907_v14 = vmax.f32 %v8824_v7, %v1941_v39  ;;  %v978_v4 = vpop.permute.xlu1 %977 }
 0x2c1   : > { %v1554_v60 = vadd.f32 %v1458_v22, %v8826_v55  ;;  %v1945_v63 = vmax.f32 %v1763_v51, %v1766_v31  ;;  %v1672_v40 = vadd.f32 %v7829_v24, %v1559_v36  ;;  %v1770_v59 = vmax.f32 %v1670_v5, 0.0 }
 0x2c2   : > { %10681 = vst [vmem:[#allocation52_spill] sm:$0xff] %v8907_v14  ;;  %v1673_v41 = vadd.f32 %v7832_v13, %v1560_v10  ;;  %v8913_v47 = vadd.f32 %v7842_v29, %v1561_v23  ;;  %v809_v3 = vmul.f32 %v7818_v11, %v8811_v61  ;;  %v810_v7 = vmul.f32 %v7821_v20, %v8811_v61 }
 0x2c3   : > { %v1946_v50 = vmax.f32 %v1945_v63, %v1769_v8  ;;  %v1772_v45 = vmax.f32 %v1672_v40, 0.0  ;;  %v811_v55 = vmul.f32 %v7813_v16, %v8811_v61  ;;  %v812_v22 = vmul.f32 %v7818_v11, %v8822_v43 }
 0x2c4   : > { %v1773_v39 = vmax.f32 %v1673_v41, 0.0  ;;  %v813_v51 = vmul.f32 %v7821_v20, %v8822_v43  ;;  %v1664_v15 = vadd.f32 %v7832_v13, %v1551_v56  ;;  %v1667_v49 = vadd.f32 %v7832_v13, %v1554_v60 }
 0x2c5   : > { %v1876_v57 = vsel %vm1690_vm2, %v1772_v45, 0.0  ;;  %v1090_v0 = vmul.f32 %v7845_v30, %v8858_v52  ;;  %v1091_v61 = vmul.f32 %v7851_v32, %v8858_v52  ;;  %v1092_v5 = vmul.f32 %v7836_v27, %v8858_v52 }
 0x2c6   : > { %v1947_v12 = vmax.f32 %v1946_v50, %v1876_v57  ;;  %v1764_v31 = vmax.f32 %v1664_v15, 0.0  ;;  %v1093_v56 = vmul.f32 %v7845_v30, %v8867_v26  ;;  %v814_v36 = vmul.f32 %v7813_v16, %v8822_v43  ;;  %v1342_v50 = vpop.permute.xlu0 %1341 }
 0x2c7   : > { %v1767_v8 = vmax.f32 %v1667_v49, 0.0  ;;  %v1186_v10 = vadd.f32 %v1090_v0, %v809_v3  ;;  %v1094_v23 = vmul.f32 %v7851_v32, %v8867_v26  ;;  %v1188_v63 = vadd.f32 %v1092_v5, %v811_v55  ;;  %v1346_v49 = vpop.permute.xlu1 %1345 }
 0x2c8   : > { %v1948_v60 = vrot.slane %v1947_v12, 4  ;;  %v1095_v40 = vmul.f32 %v7836_v27, %v8867_v26  ;;  %v1189_v41 = vadd.f32 %v1093_v56, %v812_v22  ;;  %v1187_v52 = vadd.f32 %v1091_v61, %v810_v7 }
 0x2c9   : > { %v8943_v45 = vpack.c.bf16 %v1767_v8, %v1764_v31  ;;  %v1190_v15 = vadd.f32 %v1094_v23, %v813_v51  ;;  %v8945_v57 = vpack.c.bf16 %v1773_v39, %v1770_v59  ;;  %v815_v3 = vmul.f32 %v7818_v11, %v8890_v38 }
 0x2ca   : > { %v8947_v14 = vmax.f32 %v1947_v12, %v1948_v60  ;;  %v8949_v43 = vadd.f32 %v1095_v40, %v814_v36  ;;  %v817_v55 = vmul.f32 %v7813_v16, %v8890_v38  ;;  %v816_v59 = vmul.f32 %v7821_v20, %v8890_v38  ;;  %v1350_v8 = vpop.permute.xlu0 %1349 }
 0x2cb   : > { %6153 = vmatprep.mubr.bf16.mxu0 %v8943_v45  ;;  %6201 = vmatprep.mubr.bf16.mxu1 %v8943_v45  ;;  %v818_v7 = vmul.f32 %v7818_v11, %v8900_v6  ;;  %v820_v39 = vmul.f32 %v7813_v16, %v8900_v6  ;;  %v1096_v51 = vmul.f32 %v7845_v30, %v974_v46  ;;  %v1354_v22 = vpop.permute.xlu1 %1353 }
 0x2cc   : > { %6154 = vmatmul.mubr.msk.bf16.gmra.mrb[24].mxu0 %vm8227_vm4, %v8945_v57  ;;  %6202 = vmatmul.mubr.msk.bf16.gmra.mrb[24].mxu1 %vm8227_vm4, %v8945_v57  ;;  %v1097_v38 = vmul.f32 %v7851_v32, %v974_v46  ;;  %v1098_v0 = vmul.f32 %v7836_v27, %v974_v46  ;;  %v1099_v11 = vmul.f32 %v7845_v30, %v978_v4  ;;  %v1950_v23 = vrot.slane %v8947_v14, 2 }
 0x2cd   : > { %v1100_v16 = vmul.f32 %v7851_v32, %v978_v4  ;;  %v1101_v61 = vmul.f32 %v7836_v27, %v978_v4  ;;  %v1466_v12 = vmul.f32 %v7848_v2, %v1342_v50  ;;  %v819_v31 = vmul.f32 %v7821_v20, %v8900_v6 }
 0x2ce   : > { %v1192_v5 = vadd.f32 %v1096_v51, %v815_v3  ;;  %v1194_v56 = vadd.f32 %v1098_v0, %v817_v55  ;;  %v1467_v36 = vmul.f32 %v7854_v33, %v1342_v50  ;;  %v1195_v60 = vadd.f32 %v1099_v11, %v818_v7 }
 0x2cf   : > { %v1197_v46 = vadd.f32 %v1101_v61, %v820_v39  ;;  %v1468_v30 = vmul.f32 %v7839_v28, %v1342_v50  ;;  %v1193_v40 = vadd.f32 %v1097_v38, %v816_v59  ;;  %v1562_v32 = vadd.f32 %v1466_v12, %v1186_v10 }
 0x2d0   : > { %v1469_v27 = vmul.f32 %v7848_v2, %v1346_v49  ;;  %v1470_v4 = vmul.f32 %v7854_v33, %v1346_v49  ;;  %v1196_v26 = vadd.f32 %v1100_v16, %v819_v31  ;;  %v1563_v20 = vadd.f32 %v1467_v36, %v1187_v52 }
 0x2d1   : > { %v1472_v6 = vmul.f32 %v7848_v2, %v1350_v8  ;;  %v1473_v3 = vmul.f32 %v7854_v33, %v1350_v8  ;;  %v8987_v55 = vadd.f32 %v1468_v30, %v1188_v63  ;;  %v1675_v7 = vadd.f32 %v7829_v24, %v1562_v32 }
 0x2d2   : > { %v1565_v39 = vadd.f32 %v1469_v27, %v1189_v41  ;;  %v1474_v50 = vmul.f32 %v7839_v28, %v1350_v8  ;;  %v1566_v59 = vadd.f32 %v1470_v4, %v1190_v15  ;;  %v1475_v38 = vmul.f32 %v7848_v2, %v1354_v22 }
 0x2d3   : > { %v1568_v10 = vadd.f32 %v1472_v6, %v1192_v5  ;;  %v1569_v51 = vadd.f32 %v1473_v3, %v1193_v40  ;;  %v1775_v0 = vmax.f32 %v1675_v7, 0.0  ;;  %v1476_v16 = vmul.f32 %v7854_v33, %v1354_v22 }
 0x2d4   : > { %v1678_v11 = vadd.f32 %v7829_v24, %v1565_v39  ;;  %v1570_v52 = vadd.f32 %v1474_v50, %v1194_v56  ;;  %v1477_v12 = vmul.f32 %v7839_v28, %v1354_v22  ;;  %v1571_v41 = vadd.f32 %v1475_v38, %v1195_v60 }
 0x2d5   : > { %v1681_v61 = vadd.f32 %v7829_v24, %v1568_v10  ;;  %v1682_v63 = vadd.f32 %v7832_v13, %v1569_v51  ;;  %v1572_v5 = vadd.f32 %v1476_v16, %v1196_v26  ;;  %v1676_v2 = vadd.f32 %v7832_v13, %v1563_v20  ;;  %v10682_v26 = vld [vmem:[#allocation70_spill] sm:$0xff] }
 0x2d6   : > { %v1778_v31 = vmax.f32 %v1678_v11, 0.0  ;;  %v8998_v15 = vadd.f32 %v7842_v29, %v1570_v52  ;;  %v1471_v36 = vmul.f32 %v7839_v28, %v1346_v49  ;;  %v1573_v56 = vadd.f32 %v1477_v12, %v1197_v46  ;;  %v10683_v46 = vld [vmem:[#allocation71_spill] sm:$0xff] }
 0x2d7   : > { %v1781_v8 = vmax.f32 %v1681_v61, 0.0  ;;  %v1684_v33 = vadd.f32 %v7829_v24, %v1571_v41  ;;  %v1782_v40 = vmax.f32 %v1682_v63, 0.0  ;;  %v1685_v32 = vadd.f32 %v7832_v13, %v1572_v5  ;;  %v10686_v63 = vld [vmem:[#allocation33_spill] sm:$0xff]  ;;  %v10687_v12 = vld [vmem:[#allocation35_spill] sm:$0xff]  ;;  %v10689_v41 = vld [vmem:[#allocation36_spill] sm:$0xff] }
 0x2d8   : > { %v1954_v30 = vmax.f32 %v1775_v0, %v1778_v31  ;;  %v1679_v22 = vadd.f32 %v7832_v13, %v1566_v59  ;;  %v9006_v60 = vadd.f32 %v7842_v29, %v1573_v56  ;;  %v1776_v4 = vmax.f32 %v1676_v2, 0.0  ;;  %v10691_v5 = vld [vmem:[#allocation34_spill] sm:$0xff] }
 0x2d9   : > { %v1784_v27 = vmax.f32 %v1684_v33, 0.0  ;;  %v1593_v20 = vadd.f32 %v7842_v29, %v10682_v26  ;;  %v1785_v28 = vmax.f32 %v1685_v32, 0.0  ;;  %v1596_v24 = vadd.f32 %v7842_v29, %v10683_v46  ;;  %v10693_v33 = vld [vmem:[#allocation73_spill] sm:$0xff] }
 0x2da   : > { %v1955_v6 = vmax.f32 %v1954_v30, %v1781_v8  ;;  %v1779_v49 = vmax.f32 %v1679_v22, 0.0  ;;  %v1567_v3 = vadd.f32 %v1471_v36, %v8949_v43  ;;  %v1605_v39 = vadd.f32 %v7842_v29, %v8261_v37  ;;  %v10692_v36 = vld [vmem:[#allocation37_spill] sm:$0xff] }
 0x2db   : > { %v1888_v7 = vsel %vm1690_vm2, %v1784_v27, 0.0  ;;  %v1693_v13 = vmax.f32 %v1593_v20, 0.0  ;;  %v9019_v10 = vpack.c.bf16 %v1785_v28, %v1782_v40  ;;  %v1696_v51 = vmax.f32 %v1596_v24, 0.0  ;;  %v10696_v27 = vld [vmem:[#allocation44_spill] sm:$0xff] }
 0x2dc   : > { %v1956_v50 = vmax.f32 %v1955_v6, %v1888_v7  ;;  %v9017_v59 = vpack.c.bf16 %v1779_v49, %v1776_v4  ;;  %v1608_v38 = vadd.f32 %v7842_v29, %v8270_v48  ;;  %v1705_v0 = vmax.f32 %v1605_v39, 0.0 }
 0x2dd   : > { %v10684_v11 = vmax.f32 %v8289_v9, 0.0  ;;  %v10685_v43 = vmax.f32 %v8298_v35, 0.0  ;;  %v1617_v16 = vadd.f32 %v7842_v29, %v8373_v58  ;;  %v1783_v37 = vmax.f32 %v8998_v15, 0.0 }
 0x2de   : > { %6157 = vmatprep.mubr.bf16.mxu0 %v9017_v59  ;;  %6205 = vmatprep.mubr.bf16.mxu1 %v9017_v59  ;;  %v9034_v61 = vpack.c.bf16 %v1696_v51, %v1693_v13  ;;  %v1620_v48 = vadd.f32 %v7842_v29, %v10686_v63  ;;  %v10688_v9 = vmax.f32 %v10687_v12, 0.0  ;;  %v10690_v35 = vmax.f32 %v10689_v41, 0.0  ;;  %v10700_v51 = vld [vmem:[#allocation53_spill] sm:$0xff] }
 0x2df   : > { %v9027_v52 = vpack.c.bf16 %v10685_v43, %v10684_v11  ;;  %6158 = vmatmul.mubr.msk.bf16.gmra.mrb[28].mxu0 %vm8227_vm4, %v9019_v10  ;;  %6206 = vmatmul.mubr.msk.bf16.gmra.mrb[28].mxu1 %vm8227_vm4, %v9019_v10  ;;  %v1708_v58 = vmax.f32 %v1608_v38, 0.0  ;;  %v1717_v15 = vmax.f32 %v1617_v16, 0.0  ;;  %v1629_v2 = vadd.f32 %v7842_v29, %v10691_v5 }
 0x2e0   : > { %v9042_v31 = vpack.c.bf16 %v10690_v35, %v10688_v9  ;;  %v1632_v8 = vadd.f32 %v7842_v29, %v10692_v36  ;;  %v1786_v56 = vmax.f32 %v9006_v60, 0.0  ;;  %6225 = vmatprep.mubr.bf16.mxu0 %v10693_v33  ;;  %6273 = vmatprep.mubr.bf16.mxu1 %v9034_v61  ;;  %v1720_v30 = vmax.f32 %v1620_v48, 0.0  ;;  %v10697_v60 = vld [vmem:[#allocation45_spill] sm:$0xff]  ;;  %v10706_v36 = vld [vmem:[#allocation74_spill] sm:$0xff] }
 0x2e1   : > { %v10694_v40 = vmax.f32 %v8523_v21, 0.0  ;;  %v10695_v32 = vmax.f32 %v8538_v54, 0.0  ;;  %v1641_v4 = vadd.f32 %v7842_v29, %v10696_v27  ;;  %v9065_v26 = vpack.c.bf16 %v1708_v58, %v1705_v0  ;;  %v10701_v0 = vld [vmem:[#allocation43_spill] sm:$0xff] }
 0x2e2   : > { %v1729_v20 = vmax.f32 %v1629_v2, 0.0  ;;  %v1732_v6 = vmax.f32 %v1632_v8, 0.0  ;;  %v1644_v28 = vadd.f32 %v7842_v29, %v10697_v60  ;;  %v1957_v49 = vrot.slane %v1956_v50, 4  ;;  %v6827_v58 = vld [vmem:[#allocation11 + $0x48] sm:$0xff]   ;;  %v6866_v27 = vld [vmem:[#allocation11 + $0x80] sm:$0xff]   ;;  %v6830_v60 = vld [vmem:[#allocation11 + $0x90] sm:$0xff]  }
 0x2e3   : > { %v9061_v22 = vpack.c.bf16 %v10695_v32, %v10694_v40  ;;  %v9069_v46 = vpack.c.bf16 %v1720_v30, %v1717_v15  ;;  %v1741_v24 = vmax.f32 %v1641_v4, 0.0  ;;  %v10698_v21 = vmax.f32 %v8640_v34, 0.0  ;;  %v6828_v15 = vld [vmem:[#allocation11 + $0x88] sm:$0xff]   ;;  %v6865_v40 = vld [vmem:[#allocation11 + $0x40] sm:$0xff]   ;;  %v6829_v4 = vld [vmem:[#allocation11 + $0x50] sm:$0xff]  }
 0x2e4   : > { %v10699_v54 = vmax.f32 %v8653_v44, 0.0  ;;  %v9077_v13 = vpack.c.bf16 %v1732_v6, %v1729_v20  ;;  %v1744_v39 = vmax.f32 %v1644_v28, 0.0  ;;  %v1653_v38 = vadd.f32 %v7842_v29, %v10700_v51  ;;  %v10712_v20 = vld [vmem:[#allocation39_spill] sm:$0xff] }
 0x2e5   : > { %v1656_v11 = vadd.f32 %v7842_v29, %v10701_v0  ;;  %v10702_v43 = vmax.f32 %v8772_v25, 0.0  ;;  %v10703_v16 = vmax.f32 %v8783_v1, 0.0  ;;  %v1665_v34 = vadd.f32 %v7842_v29, %v8881_v19 }
 0x2e6   : > { %v9075_v7 = vpack.c.bf16 %v10699_v54, %v10698_v21  ;;  %v1668_v44 = vadd.f32 %v7842_v29, %v8886_v53  ;;  %v10704_v48 = vmax.f32 %v8904_v18, 0.0  ;;  %v10705_v12 = vmax.f32 %v8913_v47, 0.0  ;;  %v10707_v47 = vld [vmem:[#allocation72_spill] sm:$0xff] }
 0x2e7   : > { %v9087_v63 = vpack.c.bf16 %v10703_v16, %v10702_v43  ;;  %v9099_v41 = vpack.c.bf16 %v1744_v39, %v1741_v24  ;;  %v1753_v35 = vmax.f32 %v1653_v38, 0.0  ;;  %v1756_v25 = vmax.f32 %v1656_v11, 0.0  ;;  %6226 = vmatmul.mubr.msk.bf16.vlgmr.msra.gmra.mrb[32].mxu0 %vm8227_vm4, %v10706_v36  ;;  %6274 = vmatmul.mubr.msk.bf16.vlgmr.msra.gmra.mrb[32].mxu1 %vm8227_vm4, %v10707_v47  ;;  %v10714_v21 = vld [vmem:[#allocation48_spill] sm:$0xff]  ;;  %v6831_v11 = vld [vmem:[#allocation11 + $0x58] sm:$0xff]  }
 0x2e8   : > { %v9097_v9 = vpack.c.bf16 %v10705_v12, %v10704_v48  ;;  %v1677_v1 = vadd.f32 %v7842_v29, %v8987_v55  ;;  %v1765_v5 = vmax.f32 %v1665_v34, 0.0  ;;  %v1768_v19 = vmax.f32 %v1668_v44, 0.0  ;;  %6306 = vmatpush3.bf16.msra.mxu0 %v6865_v40  ;;  %6277 = vmatprep.mubr.bf16.mxu1 %v9065_v26  ;;  %v6832_v43 = vld [vmem:[#allocation11 + $0x98] sm:$0xff]   ;;  %v10715_v34 = vld [vmem:[#allocation32_spill] sm:$0xff]  ;;  %v10716_v44 = vld [vmem:[#allocation31_spill] sm:$0xff] }
 0x2e9   : > { %v1680_v2 = vadd.f32 %v7842_v29, %v1567_v3  ;;  %v9104_v53 = vpack.c.bf16 %v1786_v56, %v1783_v37  ;;  %v1958_v18 = vmax.f32 %v1956_v50, %v1957_v49  ;;  %v9112_v8 = vpack.c.bf16 %v1756_v25, %v1753_v35  ;;  %v10709_v29 = vld [vmem:[#allocation30_spill] sm:$0xff]  ;;  %v10710_v37 = vld [vmem:[#allocation52_spill] sm:$0xff]  ;;  %6354 = vmatpush3.bf16.msra.mxu1 %v6866_v27  ;;  %v10721_v40 = vld [vmem:[#allocation51_spill] sm:$0xff] }
 0x2ea   : > { %v1777_v55 = vmax.f32 %v1677_v1, 0.0  ;;  %v10708_v33 = vrot.slane %v8780_v17, 1  ;;  %6229 = vmatprep.mubr.bf16.mxu0 %v10709_v29  ;;  %v9118_v3 = vpack.c.bf16 %v1768_v19, %v1765_v5  ;;  %v1943_v56 = vrot.slane %v10710_v37, 1  ;;  %6307 = vmatprep.subr.bf16.mxu0 %v6827_v58  ;;  %v6833_v12 = vld [vmem:[#allocation11 + $0x60] sm:$0xff]   ;;  %v10718_v19 = vld [vmem:[#allocation41_spill] sm:$0xff] }
 0x2eb   : > { %v1780_v50 = vmax.f32 %v1680_v2, 0.0  ;;  %v1951_v32 = vmax.f32 %v8947_v14, %v1950_v23  ;;  %6355 = vmatprep.subr.bf16.mxu1 %v6828_v15  ;;  %v10713_v14 = vld [vmem:[#allocation47_spill] sm:$0xff]  ;;  %v1959_v39 = vrot.slane %v1958_v18, 2  ;;  %v10719_v2 = vld [vmem:[#allocation40_spill] sm:$0xff]  ;;  %v10722_v29 = vld [vmem:[#allocation50_spill] sm:$0xff] }
 0x2ec   : > { %v1935_v30 = vmax.f32 %v8780_v17, %v10708_v33  ;;  %v10711_v17 = vld [vmem:[#allocation38_spill] sm:$0xff]  ;;  %v1944_v49 = vmax.f32 %v10710_v37, %v1943_v56  ;;  %6308 = vmatpush3.bf16.msra.mxu0 %v6827_v58  ;;  %v6835_v58 = vld [vmem:[#allocation11 + $0x68] sm:$0xff]   ;;  %v6838_v36 = vld [vmem:[#allocation11 + $0xb0] sm:$0xff]  }
 0x2ed   : > { %v5100_v6 = vsel %vm5099_vm5, %v10712_v20, %v10711_v17  ;;  %v9128_v28 = vpack.c.bf16 %v1780_v50, %v1777_v55  ;;  %v1952_v24 = vrot.slane %v1951_v32, 1  ;;  %6356 = vmatpush3.bf16.msra.mxu1 %v6828_v15  ;;  %6309 = vmatprep.subr.bf16.mxu0 %v6829_v4  ;;  %v1960_v48 = vmax.f32 %v1958_v18, %v1959_v39  ;;  %v6834_v35 = vld [vmem:[#allocation11 + $0xa0] sm:$0xff]   ;;  %v6836_v15 = vld [vmem:[#allocation11 + $0xa8] sm:$0xff]   ;;  %v6837_v18 = vld [vmem:[#allocation11 + $0x70] sm:$0xff]  }
 0x2ee   : > { %v5102_v23 = vsel %vm5101_vm6, %v10713_v14, %v5100_v6  ;;  %6357 = vmatprep.subr.bf16.mxu1 %v6830_v60  ;;  %v6839_v55 = vld [vmem:[#allocation11 + $0x78] sm:$0xff]  }
 0x2ef   : > { %v5104_v54 = vsel %vm5103_vm7, %v10714_v21, %v5102_v23  ;;  %v1953_v51 = vmax.f32 %v1951_v32, %v1952_v24  ;;  %6230 = vmatmul.mubr.msk.bf16.gmra.mrb[36].mxu0 %vm8227_vm4, %v10715_v34  ;;  %6278 = vmatmul.mubr.msk.bf16.gmra.mrb[36].mxu1 %vm8227_vm4, %v9027_v52  ;;  %v1961_v25 = vrot.slane %v1960_v48, 1  ;;  %v6840_v33 = vld [vmem:[#allocation11 + $0xb8] sm:$0xff]  }
 0x2f0   : > { %v5106_v38 = vsel %vm5105_vm8, %v1935_v30, %v5104_v54  ;;  %6233 = vmatprep.mubr.bf16.mxu0 %v10716_v44  ;;  %6281 = vmatprep.mubr.bf16.mxu1 %v9069_v46  ;;  %v10720_v30 = vld [vmem:[#allocation42_spill] sm:$0xff]  ;;  %v10724_v37 = vld [vmem:[#allocation49_spill] sm:$0xff] }
 0x2f1   : > { %v5108_v0 = vsel %vm5107_vm9, %v1944_v49, %v5106_v38  ;;  %6310 = vmatpush3.bf16.msra.mxu0 %v6829_v4  ;;  %6358 = vmatpush3.bf16.msra.mxu1 %v6830_v60  ;;  %v1962_v1 = vmax.f32 %v1960_v48, %v1961_v25  ;;  %v10723_v50 = vld [vmem:[#allocation46_spill] sm:$0xff]  ;;  %v10725_v27 = vld [vmem:[#allocation29_spill] sm:$0xff] }
 0x2f2   : > { %v5110_v16 = vsel %vm5109_vm10, %v1953_v51, %v5108_v0  ;;  %6311 = vmatprep.subr.bf16.mxu0 %v6831_v11  ;;  %6359 = vmatprep.subr.bf16.mxu1 %v6832_v43  ;;  %vm2461_vm12 = vcmp.lt.s32.totalorder %v10725_v27, 7  ;;  %vm2783_vm13 = vcmp.lt.s32.totalorder %v10725_v27, 6 }
 0x2f3   : > { %v9147_v5 = vsel %vm5111_vm11, %v1962_v1, %v5110_v16 }
 0x2f4   : > { %10717 = vst [vmem:[#allocation54_spill] sm:$0xff] %v9147_v5 }
 0x2f5   : > { %6312 = vmatpush3.bf16.msra.mxu0 %v6831_v11  ;;  %6360 = vmatpush3.bf16.msra.mxu1 %v6832_v43 }
 0x2f6   : > { %6313 = vmatprep.subr.bf16.mxu0 %v6833_v12  ;;  %6361 = vmatprep.subr.bf16.mxu1 %v6834_v35 }
 0x2f7   : > { %6234 = vmatmul.mubr.msk.bf16.gmra.mrb[40].mxu0 %vm8227_vm4, %v10718_v19  ;;  %6282 = vmatmul.mubr.msk.bf16.gmra.mrb[40].mxu1 %vm8227_vm4, %v9042_v31 }
 0x2f8   : > { %6237 = vmatprep.mubr.bf16.mxu0 %v10719_v2  ;;  %6285 = vmatprep.mubr.bf16.mxu1 %v9077_v13 }
 0x2f9   : > { %6314 = vmatpush3.bf16.msra.mxu0 %v6833_v12  ;;  %6362 = vmatpush3.bf16.msra.mxu1 %v6834_v35 }
 0x2fa   : > { %6315 = vmatprep.subr.bf16.mxu0 %v6835_v58  ;;  %6363 = vmatprep.subr.bf16.mxu1 %v6836_v15 }
 0x2fd   : > { %6316 = vmatpush3.bf16.msra.mxu0 %v6835_v58  ;;  %6364 = vmatpush3.bf16.msra.mxu1 %v6836_v15 }
 0x2fe   : > { %6317 = vmatprep.subr.bf16.mxu0 %v6837_v18  ;;  %6365 = vmatprep.subr.bf16.mxu1 %v6838_v36 }
 0x2ff   : > { %6238 = vmatmul.mubr.msk.bf16.gmra.mrb[44].mxu0 %vm8227_vm4, %v10720_v30  ;;  %6286 = vmatmul.mubr.msk.bf16.gmra.mrb[44].mxu1 %vm8227_vm4, %v9061_v22 }
 0x300   : > { %6241 = vmatprep.mubr.bf16.mxu0 %v10721_v40  ;;  %6289 = vmatprep.mubr.bf16.mxu1 %v9099_v41 }
 0x301   : > { %6318 = vmatpush3.bf16.msra.mxu0 %v6837_v18  ;;  %6366 = vmatpush3.bf16.msra.mxu1 %v6838_v36 }
 0x302   : > { %6319 = vmatprep.subr.bf16.mxu0 %v6839_v55  ;;  %6367 = vmatprep.subr.bf16.mxu1 %v6840_v33 }
 0x305   : > { %6320 = vmatpush3.bf16.msra.mxu0 %v6839_v55  ;;  %6368 = vmatpush3.bf16.msra.mxu1 %v6840_v33 }
 0x307   : > { %6242 = vmatmul.mubr.msk.bf16.gmra.mrb[48].mxu0 %vm8227_vm4, %v10722_v29  ;;  %6290 = vmatmul.mubr.msk.bf16.gmra.mrb[48].mxu1 %vm8227_vm4, %v9075_v7 }
 0x308   : > { %6245 = vmatprep.mubr.bf16.mxu0 %v10723_v50  ;;  %6293 = vmatprep.mubr.bf16.mxu1 %v9112_v8 }
 0x30f   : > { %6246 = vmatmul.mubr.msk.bf16.gmra.mrb[52].mxu0 %vm8227_vm4, %v10724_v37  ;;  %6294 = vmatmul.mubr.msk.bf16.gmra.mrb[52].mxu1 %vm8227_vm4, %v9087_v63 }
 0x310   : > { %6249 = vmatprep.mubr.bf16.mxu0 %v8943_v45  ;;  %6297 = vmatprep.mubr.bf16.mxu1 %v9118_v3 }
 0x317   : > { %6250 = vmatmul.mubr.msk.bf16.gmra.mrb[56].mxu0 %vm8227_vm4, %v8945_v57  ;;  %6298 = vmatmul.mubr.msk.bf16.gmra.mrb[56].mxu1 %vm8227_vm4, %v9097_v9 }
 0x318   : > { %6253 = vmatprep.mubr.bf16.mxu0 %v9017_v59  ;;  %6301 = vmatprep.mubr.bf16.mxu1 %v9128_v28 }
 0x31f   : > { %6254 = vmatmul.mubr.msk.bf16.gmra.mrb[60].mxu0 %vm8227_vm4, %v9019_v10  ;;  %6302 = vmatmul.mubr.msk.bf16.gmra.mrb[60].mxu1 %vm8227_vm4, %v9104_v53 }
 0x320   : > { %6321 = vmatprep.mubr.bf16.mxu0 %v9034_v61  ;;  %6369 = vmatprep.mubr.bf16.mxu1 %v9034_v61 }
 0x322   : > { %v6131_v45 = vpop.f32.mrb[0].mxu0  ;;  %v6179_v57 = vpop.f32.mrb[0].mxu1 }
 0x323   : > { %v2077_v56 = vpop.f32.mrb[1].mxu0  ;;  %v2302_v32 = vpop.f32.mrb[1].mxu1  ;;  %v2445_v20 = vrot.slane %v6179_v57, 1 }
 0x324   : > { %v2429_v59 = vrot.slane %v2302_v32, 1  ;;  %v6132_v4 = vpop.f32.mrb[2].mxu0  ;;  %v6180_v17 = vpop.f32.mrb[2].mxu1 }
 0x325   : > { %v2453_v6 = vrot.slane %v6180_v17, 1  ;;  %v2080_v10 = vpop.f32.mrb[3].mxu0  ;;  %v2305_v60 = vpop.f32.mrb[3].mxu1 }
 0x326   : > { %v2437_v49 = vrot.slane %v2305_v60, 1 }
 0x327   : > { %6322 = vmatmul.mubr.msk.bf16.vlgmr.msra.gmra.mrb[64].mxu0 %vm8227_vm4, %v10707_v47  ;;  %6370 = vmatmul.mubr.msk.bf16.vlgmr.msra.gmra.mrb[64].mxu1 %vm8227_vm4, %v10707_v47  ;;  %v2462_v61 = vsel %vm2461_vm12, %v2445_v20, %v2453_v6  ;;  %v2486_v24 = vsel %vm2461_vm12, %v2453_v6, %v2429_v59 }
 0x328   : > { %6325 = vmatprep.mubr.bf16.mxu0 %v9065_v26  ;;  %6373 = vmatprep.mubr.bf16.mxu1 %v9065_v26  ;;  %v9210_v14 = vadd.f32 %v6131_v45, %v2462_v61  ;;  %v9212_v23 = vadd.f32 %v6132_v4, %v2486_v24  ;;  %v2470_v21 = vsel %vm2461_vm12, %v2437_v49, %v2445_v20 }
 0x329   : > { %v2478_v47 = vsel %vm2461_vm12, %v2429_v59, %v2437_v49  ;;  %v9218_v54 = vadd.f32 %v2470_v21, %v2080_v10  ;;  %v6842_v21 = vld [vmem:[#allocation14 + $0x8] sm:$0xff]  }
 0x32a   : > { %v9220_v39 = vadd.f32 %v2478_v47, %v2077_v56 }
 0x32f   : > { %6326 = vmatmul.mubr.msk.bf16.gmra.mrb[68].mxu0 %vm8227_vm4, %v9027_v52  ;;  %6374 = vmatmul.mubr.msk.bf16.gmra.mrb[68].mxu1 %vm8227_vm4, %v9027_v52 }
 0x330   : > { %6329 = vmatprep.mubr.bf16.mxu0 %v9069_v46  ;;  %6377 = vmatprep.mubr.bf16.mxu1 %v9069_v46 }
 0x337   : > { %v6135_v26 = vpop.f32.mrb[4].mxu0  ;;  %v6183_v51 = vpop.f32.mrb[4].mxu1  ;;  %6330 = vmatmul.mubr.msk.bf16.gmra.mrb[72].mxu0 %vm8227_vm4, %v9042_v31  ;;  %6378 = vmatmul.mubr.msk.bf16.gmra.mrb[72].mxu1 %vm8227_vm4, %v9042_v31 }
 0x338   : > { %v2093_v38 = vpop.f32.mrb[5].mxu0  ;;  %v2318_v0 = vpop.f32.mrb[5].mxu1  ;;  %6333 = vmatprep.mubr.bf16.mxu0 %v9077_v13  ;;  %6381 = vmatprep.mubr.bf16.mxu1 %v9077_v13  ;;  %v2446_v46 = vrot.slane %v6183_v51, 1 }
 0x339   : > { %v2430_v52 = vrot.slane %v2318_v0, 1  ;;  %v6136_v11 = vpop.f32.mrb[6].mxu0  ;;  %v6184_v43 = vpop.f32.mrb[6].mxu1 }
 0x33a   : > { %v2454_v16 = vrot.slane %v6184_v43, 1  ;;  %v2096_v34 = vpop.f32.mrb[7].mxu0  ;;  %v2321_v44 = vpop.f32.mrb[7].mxu1  ;;  %v6844_v43 = vld [vmem:[#allocation14 + $0x18] sm:$0xff]  }
 0x33b   : > { %v2438_v48 = vrot.slane %v2321_v44, 1 }
 0x33c   : > { %v2463_v12 = vsel %vm2461_vm12, %v2446_v46, %v2454_v16  ;;  %v2487_v31 = vsel %vm2461_vm12, %v2454_v16, %v2430_v52 }
 0x33d   : > { %v9242_v35 = vadd.f32 %v6135_v26, %v2463_v12  ;;  %v9244_v25 = vadd.f32 %v6136_v11, %v2487_v31  ;;  %v2471_v13 = vsel %vm2461_vm12, %v2438_v48, %v2446_v46  ;;  %v2479_v1 = vsel %vm2461_vm12, %v2430_v52, %v2438_v48  ;;  %v6843_v11 = vld [vmem:[#allocation14 + $0x10] sm:$0xff]  }
 0x33e   : > { %v9250_v58 = vadd.f32 %v2479_v1, %v2093_v38  ;;  %v9252_v15 = vadd.f32 %v2471_v13, %v2096_v34 }
 0x33f   : > { %6334 = vmatmul.mubr.msk.bf16.gmra.mrb[76].mxu0 %vm8227_vm4, %v9061_v22  ;;  %6382 = vmatmul.mubr.msk.bf16.gmra.mrb[76].mxu1 %vm8227_vm4, %v9061_v22 }
 0x340   : > { %6337 = vmatprep.mubr.bf16.mxu0 %v9099_v41  ;;  %6385 = vmatprep.mubr.bf16.mxu1 %v9099_v41 }
 0x347   : > { %6338 = vmatmul.mubr.msk.bf16.gmra.mrb[80].mxu0 %vm8227_vm4, %v9075_v7  ;;  %6386 = vmatmul.mubr.msk.bf16.gmra.mrb[80].mxu1 %vm8227_vm4, %v9075_v7 }
 0x348   : > { %6341 = vmatprep.mubr.bf16.mxu0 %v9112_v8  ;;  %6389 = vmatprep.mubr.bf16.mxu1 %v9112_v8 }
 0x34b   : > { %v6139_v19 = vpop.f32.mrb[8].mxu0 }
 0x34c   : > { %v6187_v2 = vpop.f32.mrb[8].mxu1  ;;  %v2109_v18 = vpop.f32.mrb[9].mxu0 }
 0x34d   : > { %v2334_v22 = vpop.f32.mrb[9].mxu1  ;;  %v6140_v55 = vpop.f32.mrb[10].mxu0  ;;  %v2447_v41 = vrot.slane %v6187_v2, 1 }
 0x34e   : > { %v2431_v36 = vrot.slane %v2334_v22, 1  ;;  %v6188_v33 = vpop.f32.mrb[10].mxu1  ;;  %v2112_v40 = vpop.f32.mrb[11].mxu0  ;;  %v6846_v22 = vld [vmem:[#allocation14 + $0x40] sm:$0xff]  }
 0x34f   : > { %v2455_v30 = vrot.slane %v6188_v33, 1  ;;  %v2337_v29 = vpop.f32.mrb[11].mxu1  ;;  %6342 = vmatmul.mubr.msk.bf16.gmra.mrb[84].mxu0 %vm8227_vm4, %v9087_v63  ;;  %6390 = vmatmul.mubr.msk.bf16.gmra.mrb[84].mxu1 %vm8227_vm4, %v9087_v63 }
 0x350   : > { %v2439_v7 = vrot.slane %v2337_v29, 1  ;;  %6345 = vmatprep.mubr.bf16.mxu0 %v9118_v3  ;;  %6393 = vmatprep.mubr.bf16.mxu1 %v9118_v3  ;;  %v6841_v3 = vld [vmem:[#allocation14] sm:$0xff]  }
 0x351   : > { %v2464_v8 = vsel %vm2461_vm12, %v2447_v41, %v2455_v30  ;;  %v2488_v50 = vsel %vm2461_vm12, %v2455_v30, %v2431_v36  ;;  %6401 = vmatprep.subr.bf16.mxu0 %v6841_v3  ;;  %6449 = vmatprep.subr.bf16.mxu1 %v6846_v22 }
 0x352   : > { %v9282_v37 = vadd.f32 %v6139_v19, %v2464_v8  ;;  %v9284_v45 = vadd.f32 %v6140_v55, %v2488_v50  ;;  %v2472_v57 = vsel %vm2461_vm12, %v2439_v7, %v2447_v41  ;;  %v2480_v63 = vsel %vm2461_vm12, %v2431_v36, %v2439_v7  ;;  %6402 = vmatpush3.bf16.msra.mxu0 %v6841_v3  ;;  %v6847_v7 = vld [vmem:[#allocation14 + $0x48] sm:$0xff]   ;;  %v6850_v3 = vld [vmem:[#allocation14 + $0x58] sm:$0xff]  }
 0x353   : > { %v9290_v56 = vadd.f32 %v2480_v63, %v2109_v18  ;;  %v9292_v32 = vadd.f32 %v2472_v57, %v2112_v40  ;;  %6403 = vmatprep.subr.bf16.mxu0 %v6842_v21  ;;  %v6845_v18 = vld [vmem:[#allocation14 + $0x20] sm:$0xff]   ;;  %v6848_v8 = vld [vmem:[#allocation14 + $0x28] sm:$0xff]   ;;  %6450 = vmatpush3.bf16.msra.mxu1 %v6846_v22  ;;  %v6849_v63 = vld [vmem:[#allocation14 + $0x50] sm:$0xff]  }
 0x354   : > { %6451 = vmatprep.subr.bf16.mxu1 %v6847_v7 }
 0x356   : > { %6404 = vmatpush3.bf16.msra.mxu0 %v6842_v21 }
 0x357   : > { %6346 = vmatmul.mubr.msk.bf16.gmra.mrb[88].mxu0 %vm8227_vm4, %v9097_v9  ;;  %6394 = vmatmul.mubr.msk.bf16.gmra.mrb[88].mxu1 %vm8227_vm4, %v9097_v9 }
 0x358   : > { %6349 = vmatprep.mubr.bf16.mxu0 %v9128_v28  ;;  %6397 = vmatprep.mubr.bf16.mxu1 %v9128_v28 }
 0x359   : > { %6405 = vmatprep.subr.bf16.mxu0 %v6843_v11  ;;  %6452 = vmatpush3.bf16.msra.mxu1 %v6847_v7 }
 0x35a   : > { %6406 = vmatpush3.bf16.msra.mxu0 %v6843_v11  ;;  %6453 = vmatprep.subr.bf16.mxu1 %v6849_v63 }
 0x35b   : > { %6407 = vmatprep.subr.bf16.mxu0 %v6844_v43 }
 0x35d   : > { %6454 = vmatpush3.bf16.msra.mxu1 %v6849_v63 }
 0x35e   : > { %6408 = vmatpush3.bf16.msra.mxu0 %v6844_v43  ;;  %6455 = vmatprep.subr.bf16.mxu1 %v6850_v3 }
 0x35f   : > { %v6143_v59 = vpop.f32.mrb[12].mxu0  ;;  %6350 = vmatmul.mubr.msk.bf16.gmra.mrb[92].mxu0 %vm8227_vm4, %v9104_v53  ;;  %6398 = vmatmul.mubr.msk.bf16.gmra.mrb[92].mxu1 %vm8227_vm4, %v9104_v53 }
 0x360   : > { %v6191_v4 = vpop.f32.mrb[12].mxu1  ;;  %v2125_v17 = vpop.f32.mrb[13].mxu0  ;;  %6409 = vmatprep.subr.bf16.mxu0 %v6845_v18 }
 0x361   : > { %v2350_v20 = vpop.f32.mrb[13].mxu1  ;;  %v6144_v9 = vpop.f32.mrb[14].mxu0  ;;  %v2448_v60 = vrot.slane %v6191_v4, 1  ;;  %6456 = vmatpush3.bf16.msra.mxu1 %v6850_v3 }
 0x362   : > { %v2432_v6 = vrot.slane %v2350_v20, 1  ;;  %v6192_v10 = vpop.f32.mrb[14].mxu1  ;;  %v2128_v49 = vpop.f32.mrb[15].mxu0  ;;  %6410 = vmatpush3.bf16.msra.mxu0 %v6845_v18  ;;  %v6852_v20 = vld [vmem:[#allocation14 + $0x60] sm:$0xff]  }
 0x363   : > { %v2456_v28 = vrot.slane %v6192_v10, 1  ;;  %v2353_v61 = vpop.f32.mrb[15].mxu1  ;;  %6411 = vmatprep.subr.bf16.mxu0 %v6848_v8  ;;  %6457 = vmatprep.subr.bf16.mxu1 %v6852_v20 }
 0x364   : > { %v2440_v24 = vrot.slane %v2353_v61, 1 }
 0x365   : > { %v2465_v47 = vsel %vm2461_vm12, %v2448_v60, %v2456_v28  ;;  %v2489_v62 = vsel %vm2461_vm12, %v2456_v28, %v2432_v6  ;;  %6458 = vmatpush3.bf16.msra.mxu1 %v6852_v20 }
 0x366   : > { %v9312_v53 = vadd.f32 %v6143_v59, %v2465_v47  ;;  %v9314_v26 = vadd.f32 %v6144_v9, %v2489_v62  ;;  %v2473_v51 = vsel %vm2461_vm12, %v2440_v24, %v2448_v60  ;;  %v2481_v38 = vsel %vm2461_vm12, %v2432_v6, %v2440_v24  ;;  %6412 = vmatpush3.bf16.msra.mxu0 %v6848_v8  ;;  %v6851_v59 = vld [vmem:[#allocation14 + $0x30] sm:$0xff]   ;;  %v6853_v6 = vld [vmem:[#allocation14 + $0x68] sm:$0xff]   ;;  %v6854_v9 = vld [vmem:[#allocation14 + $0x38] sm:$0xff]  }
 0x367   : > { %v9320_v0 = vadd.f32 %v2481_v38, %v2125_v17  ;;  %v9322_v52 = vadd.f32 %v2473_v51, %v2128_v49  ;;  %6413 = vmatprep.subr.bf16.mxu0 %v6851_v59  ;;  %6459 = vmatprep.subr.bf16.mxu1 %v6853_v6 }
 0x369   : > { %6460 = vmatpush3.bf16.msra.mxu1 %v6853_v6 }
 0x36a   : > { %6414 = vmatpush3.bf16.msra.mxu0 %v6851_v59 }
 0x36b   : > { %6415 = vmatprep.subr.bf16.mxu0 %v6854_v9 }
 0x36e   : > { %6416 = vmatpush3.bf16.msra.mxu0 %v6854_v9 }
 0x374   : > { %v6147_v46 = vpop.f32.mrb[16].mxu0  ;;  %v6195_v16 = vpop.f32.mrb[16].mxu1 }
 0x375   : > { %v2141_v34 = vpop.f32.mrb[17].mxu0  ;;  %v2366_v44 = vpop.f32.mrb[17].mxu1  ;;  %v2449_v13 = vrot.slane %v6195_v16, 1 }
 0x376   : > { %v2433_v48 = vrot.slane %v2366_v44, 1  ;;  %v6148_v12 = vpop.f32.mrb[18].mxu0  ;;  %v6196_v31 = vpop.f32.mrb[18].mxu1  ;;  %v6855_v44 = vld [vmem:[#allocation14 + $0x70] sm:$0xff]  }
 0x377   : > { %v2457_v1 = vrot.slane %v6196_v31, 1  ;;  %v2144_v19 = vpop.f32.mrb[19].mxu0  ;;  %v2369_v2 = vpop.f32.mrb[19].mxu1  ;;  %6461 = vmatprep.subr.bf16.mxu1 %v6855_v44  ;;  %v6856_v31 = vld [vmem:[#allocation14 + $0x78] sm:$0xff]  }
 0x378   : > { %v2441_v36 = vrot.slane %v2369_v2, 1  ;;  %6462 = vmatpush3.bf16.msra.mxu1 %v6855_v44 }
 0x379   : > { %v2466_v55 = vsel %vm2461_vm12, %v2449_v13, %v2457_v1  ;;  %v2490_v33 = vsel %vm2461_vm12, %v2457_v1, %v2433_v48  ;;  %6463 = vmatprep.subr.bf16.mxu1 %v6856_v31 }
 0x37a   : > { %v9328_v41 = vadd.f32 %v6147_v46, %v2466_v55  ;;  %v9330_v30 = vadd.f32 %v6148_v12, %v2490_v33  ;;  %v2474_v40 = vsel %vm2461_vm12, %v2441_v36, %v2449_v13  ;;  %v2482_v29 = vsel %vm2461_vm12, %v2433_v48, %v2441_v36  ;;  %v9356_v13 = vld [vmem:[#allocation14 + $0x80] sm:$0xff]  }
 0x37b   : > { %v9336_v50 = vadd.f32 %v2482_v29, %v2141_v34  ;;  %v9338_v57 = vadd.f32 %v2474_v40, %v2144_v19  ;;  %10726 = vst [vmem:[#allocation56_spill] sm:$0xff] %v9356_v13  ;;  %6497 = vmatprep.subr.bf16.mxu0 %v9356_v13 }
 0x37c   : > { %6464 = vmatpush3.bf16.msra.mxu1 %v6856_v31 }
 0x388   : > { %v6151_v4 = vpop.f32.mrb[20].mxu0  ;;  %v6199_v17 = vpop.f32.mrb[20].mxu1 }
 0x389   : > { %v2157_v10 = vpop.f32.mrb[21].mxu0  ;;  %v2382_v60 = vpop.f32.mrb[21].mxu1  ;;  %v2450_v24 = vrot.slane %v6199_v17, 1 }
 0x38a   : > { %v2434_v28 = vrot.slane %v2382_v60, 1  ;;  %v6152_v49 = vpop.f32.mrb[22].mxu0  ;;  %v6200_v61 = vpop.f32.mrb[22].mxu1 }
 0x38b   : > { %v2458_v21 = vrot.slane %v6200_v61, 1  ;;  %v2160_v47 = vpop.f32.mrb[23].mxu0  ;;  %v2385_v62 = vpop.f32.mrb[23].mxu1 }
 0x38c   : > { %v2442_v51 = vrot.slane %v2385_v62, 1 }
 0x38d   : > { %v2467_v38 = vsel %vm2461_vm12, %v2450_v24, %v2458_v21  ;;  %v2491_v11 = vsel %vm2461_vm12, %v2458_v21, %v2434_v28 }
 0x38e   : > { %v9344_v43 = vadd.f32 %v6151_v4, %v2467_v38  ;;  %v9346_v46 = vadd.f32 %v6152_v49, %v2491_v11  ;;  %v2475_v16 = vsel %vm2461_vm12, %v2442_v51, %v2450_v24  ;;  %v2483_v34 = vsel %vm2461_vm12, %v2434_v28, %v2442_v51 }
 0x38f   : > { %v9352_v48 = vadd.f32 %v2483_v34, %v2157_v10  ;;  %v9354_v12 = vadd.f32 %v2475_v16, %v2160_v47 }
 0x39f   : > { %v6155_v1 = vpop.f32.mrb[24].mxu0  ;;  %v6203_v19 = vpop.f32.mrb[24].mxu1 }
 0x3a0   : > { %v2173_v2 = vpop.f32.mrb[25].mxu0  ;;  %v2398_v18 = vpop.f32.mrb[25].mxu1  ;;  %v2451_v33 = vrot.slane %v6203_v19, 1 }
 0x3a1   : > { %v2435_v22 = vrot.slane %v2398_v18, 1  ;;  %v6156_v36 = vpop.f32.mrb[26].mxu0  ;;  %v6204_v55 = vpop.f32.mrb[26].mxu1  ;;  %v5163_v18 = vld [vmem:[#allocation17 + $0x88] sm:$0xff] }
 0x3a2   : > { %v2459_v40 = vrot.slane %v6204_v55, 1  ;;  %v2176_v29 = vpop.f32.mrb[27].mxu0  ;;  %v2401_v7 = vpop.f32.mrb[27].mxu1 }
 0x3a3   : > { %v2443_v8 = vrot.slane %v2401_v7, 1 }
 0x3a4   : > { %v2468_v63 = vsel %vm2461_vm12, %v2451_v33, %v2459_v40  ;;  %v2492_v3 = vsel %vm2461_vm12, %v2459_v40, %v2435_v22 }
 0x3a5   : > { %v9363_v59 = vadd.f32 %v6155_v1, %v2468_v63  ;;  %v9365_v4 = vadd.f32 %v6156_v36, %v2492_v3  ;;  %v2476_v17 = vsel %vm2461_vm12, %v2443_v8, %v2451_v33  ;;  %v2484_v20 = vsel %vm2461_vm12, %v2435_v22, %v2443_v8 }
 0x3a6   : > { %v9371_v6 = vadd.f32 %v2484_v20, %v2173_v2  ;;  %v9373_v9 = vadd.f32 %v2476_v17, %v2176_v29  ;;  %v5162_v2 = vld [vmem:[#allocation17 + $0x80] sm:$0xff] }
 0x3a7   : > { %v6580_v55 = vpack.c.bf16 %v5163_v18, %v5162_v2 }
 0x3a9   : > { %6581 = vmatprep.subr.bf16.mxu1 %v6580_v55 }
 0x3b2   : > { %v6159_v10 = vpop.f32.mrb[28].mxu0  ;;  %v6207_v60 = vpop.f32.mrb[28].mxu1 }
 0x3b3   : > { %v2189_v28 = vpop.f32.mrb[29].mxu0  ;;  %v2414_v49 = vpop.f32.mrb[29].mxu1  ;;  %v2452_v47 = vrot.slane %v6207_v60, 1 }
 0x3b4   : > { %v2436_v61 = vrot.slane %v2414_v49, 1  ;;  %v6160_v24 = vpop.f32.mrb[30].mxu0  ;;  %v6208_v21 = vpop.f32.mrb[30].mxu1 }
 0x3b5   : > { %v2460_v62 = vrot.slane %v6208_v21, 1  ;;  %v2192_v51 = vpop.f32.mrb[31].mxu0  ;;  %v2417_v38 = vpop.f32.mrb[31].mxu1 }
 0x3b6   : > { %v2444_v11 = vrot.slane %v2417_v38, 1 }
 0x3b7   : > { %v2469_v16 = vsel %vm2461_vm12, %v2452_v47, %v2460_v62  ;;  %v2493_v34 = vsel %vm2461_vm12, %v2460_v62, %v2436_v61 }
 0x3b8   : > { %v9379_v44 = vadd.f32 %v6159_v10, %v2469_v16  ;;  %v9381_v31 = vadd.f32 %v6160_v24, %v2493_v34  ;;  %v2477_v1 = vsel %vm2461_vm12, %v2444_v11, %v2452_v47  ;;  %v2485_v19 = vsel %vm2461_vm12, %v2436_v61, %v2444_v11  ;;  %v9404_v24 = vld [vmem:[#allocation10] ss:$0 sm:$0xff] }
 0x3b9   : > { %v9387_v22 = vadd.f32 %v2485_v19, %v2189_v28  ;;  %v9389_v36 = vadd.f32 %v2477_v1, %v2192_v51 }
 0x3ba   : > { %v6227_v33 = vpop.f32.mrb[32].mxu0  ;;  %v9391_v40 = vpop.f32.mrb[32].mxu1 }
 0x3bb   : > { %v2624_v29 = vpop.f32.mrb[33].mxu0  ;;  %v9393_v7 = vpop.f32.mrb[33].mxu1  ;;  %v2767_v17 = vrot.slane %v6227_v33, 2 }
 0x3bc   : > { %v2751_v8 = vrot.slane %v2624_v29, 2  ;;  %v6228_v63 = vpop.f32.mrb[34].mxu0  ;;  %v9396_v3 = vpop.f32.mrb[34].mxu1 }
 0x3bd   : > { %v2775_v20 = vrot.slane %v6228_v63, 2  ;;  %v2627_v10 = vpop.f32.mrb[35].mxu0  ;;  %v9398_v60 = vpop.f32.mrb[35].mxu1 }
 0x3be   : > { %v2759_v28 = vrot.slane %v2627_v10, 2 }
 0x3bf   : > { %v2784_v49 = vsel %vm2783_vm13, %v2767_v17, %v2775_v20  ;;  %v2808_v61 = vsel %vm2783_vm13, %v2775_v20, %v2751_v8 }
 0x3c0   : > { %v2818_v21 = vadd.f32 %v2784_v49, %v9210_v14  ;;  %v2819_v47 = vadd.f32 %v2808_v61, %v9212_v23  ;;  %v2792_v62 = vsel %vm2783_vm13, %v2759_v28, %v2767_v17  ;;  %v2800_v51 = vsel %vm2783_vm13, %v2751_v8, %v2759_v28 }
 0x3c1   : > { %v2816_v38 = vadd.f32 %v2800_v51, %v9220_v39  ;;  %v2817_v11 = vadd.f32 %v2792_v62, %v9218_v54  ;;  %v9431_v62 = vld [vmem:[#allocation17] sm:$0xff]  ;;  %v9433_v51 = vld [vmem:[#allocation17 + $0x8] sm:$0xff] }
 0x3c2   : > { %v2858_v16 = vadd.f32 %v9404_v24, %v2819_v47  ;;  %v6231_v34 = vpop.f32.mrb[36].mxu0  ;;  %v9415_v1 = vpop.f32.mrb[36].mxu1  ;;  %v2857_v19 = vadd.f32 %v9404_v24, %v2818_v21  ;;  %10727 = vst [vmem:[#allocation57_spill] sm:$0xff] %v9431_v62  ;;  %10728 = vst [vmem:[#allocation59_spill] sm:$0xff] %v9433_v51 }
 0x3c3   : > { %v2855_v14 = vadd.f32 %v9404_v24, %v2816_v38  ;;  %v2856_v23 = vadd.f32 %v9404_v24, %v2817_v11  ;;  %v2640_v2 = vpop.f32.mrb[37].mxu0  ;;  %v9420_v18 = vpop.f32.mrb[37].mxu1  ;;  %v2768_v8 = vrot.slane %v6231_v34, 2 }
 0x3c4   : > { %v2752_v55 = vrot.slane %v2640_v2, 2  ;;  %v6232_v33 = vpop.f32.mrb[38].mxu0  ;;  %v9422_v29 = vpop.f32.mrb[38].mxu1  ;;  %v2894_v10 = vmax.f32 %v2858_v16, 0.0  ;;  %v2893_v49 = vmax.f32 %v2857_v19, 0.0  ;;  %v9441_v19 = vld [vmem:[#allocation17 + $0x90] sm:$0xff] }
 0x3c5   : > { %v2891_v39 = vmax.f32 %v2855_v14, 0.0  ;;  %v2892_v54 = vmax.f32 %v2856_v23, 0.0  ;;  %v2776_v63 = vrot.slane %v6232_v33, 2  ;;  %v2643_v17 = vpop.f32.mrb[39].mxu0  ;;  %v9424_v20 = vpop.f32.mrb[39].mxu1  ;;  %10729 = vst [vmem:[#allocation60_spill] sm:$0xff] %v9441_v19 }
 0x3c6   : > { %v2760_v28 = vrot.slane %v2643_v17, 2  ;;  %v9443_v14 = vld [vmem:[#allocation17 + $0x98] sm:$0xff]  ;;  %v9445_v23 = vld [vmem:[#allocation17 + $0x10] sm:$0xff] }
 0x3c7   : > { %v2963_v61 = vmax.f32 %v2891_v39, %v2892_v54  ;;  %v2785_v21 = vsel %vm2783_vm13, %v2768_v8, %v2776_v63  ;;  %v2809_v47 = vsel %vm2783_vm13, %v2776_v63, %v2752_v55  ;;  %10730 = vst [vmem:[#allocation62_spill] sm:$0xff] %v9443_v14  ;;  %10731 = vst [vmem:[#allocation55_spill] sm:$0xff] %v9445_v23  ;;  %v9453_v54 = vld [vmem:[#allocation17 + $0xa8] sm:$0xff] }
 0x3c8   : > { %v2822_v38 = vadd.f32 %v2785_v21, %v9242_v35  ;;  %v2823_v11 = vadd.f32 %v2809_v47, %v9244_v25  ;;  %v2793_v16 = vsel %vm2783_vm13, %v2760_v28, %v2768_v8  ;;  %v2801_v34 = vsel %vm2783_vm13, %v2752_v55, %v2760_v28  ;;  %v9449_v35 = vld [vmem:[#allocation17 + $0x18] sm:$0xff]  ;;  %v9451_v25 = vld [vmem:[#allocation17 + $0xa0] sm:$0xff]  ;;  %10733 = vst [vmem:[#allocation58_spill] sm:$0xff] %v9453_v54 }
 0x3c9   : > { %v2964_v2 = vmax.f32 %v2963_v61, %v2893_v49  ;;  %v2820_v33 = vadd.f32 %v2801_v34, %v9250_v58  ;;  %v2821_v39 = vadd.f32 %v2793_v16, %v9252_v15  ;;  %10732 = vst [vmem:[#allocation63_spill] sm:$0xff] %v9451_v25  ;;  %v2934_v55 = vsel %vm2890_vm14, %v2894_v10, 0.0 }
 0x3ca   : > { %v2861_v8 = vadd.f32 %v9404_v24, %v2822_v38  ;;  %v2862_v63 = vadd.f32 %v9404_v24, %v2823_v11  ;;  %v6235_v17 = vpop.f32.mrb[40].mxu0  ;;  %v9459_v28 = vpop.f32.mrb[40].mxu1  ;;  %v9469_v38 = vld [vmem:[#allocation17 + $0x20] sm:$0xff]  ;;  %v9471_v11 = vld [vmem:[#allocation17 + $0x28] sm:$0xff] }
 0x3cb   : > { %v2965_v15 = vmax.f32 %v2964_v2, %v2934_v55  ;;  %v2859_v49 = vadd.f32 %v9404_v24, %v2820_v33  ;;  %v2860_v61 = vadd.f32 %v9404_v24, %v2821_v39  ;;  %v2656_v21 = vpop.f32.mrb[41].mxu0  ;;  %v9465_v47 = vpop.f32.mrb[41].mxu1  ;;  %10735 = vst [vmem:[#allocation61_spill] sm:$0xff] %v9469_v38  ;;  %10736 = vst [vmem:[#allocation64_spill] sm:$0xff] %v9471_v11  ;;  %v2769_v16 = vrot.slane %v6235_v17, 2 }
 0x3cc   : > { %10734 = vst [vmem:[#allocation65_spill] sm:$0xff] %v9465_v47  ;;  %v2753_v34 = vrot.slane %v2656_v21, 2  ;;  %v6236_v5 = vpop.f32.mrb[42].mxu0  ;;  %v9473_v13 = vpop.f32.mrb[42].mxu1  ;;  %v2897_v14 = vmax.f32 %v2861_v8, 0.0  ;;  %v2898_v51 = vmax.f32 %v2862_v63, 0.0 }
 0x3cd   : > { %10737 = vst [vmem:[#allocation66_spill] sm:$0xff] %v9473_v13  ;;  %v2966_v39 = vrot.slane %v2965_v15, 4  ;;  %v2895_v55 = vmax.f32 %v2859_v49, 0.0  ;;  %v2896_v58 = vmax.f32 %v2860_v61, 0.0  ;;  %v2777_v62 = vrot.slane %v6236_v5, 2  ;;  %v2659_v10 = vpop.f32.mrb[43].mxu0 }
 0x3ce   : > { %v9479_v19 = vpop.f32.mrb[43].mxu1  ;;  %v2761_v17 = vrot.slane %v2659_v10, 2  ;;  %v9487_v49 = vld [vmem:[#allocation17 + $0xb0] sm:$0xff]  ;;  %v9489_v5 = vld [vmem:[#allocation17 + $0xb8] sm:$0xff] }
 0x3cf   : > { %v2967_v47 = vmax.f32 %v2965_v15, %v2966_v39  ;;  %v2972_v13 = vmax.f32 %v2895_v55, %v2896_v58  ;;  %v2786_v2 = vsel %vm2783_vm13, %v2769_v16, %v2777_v62  ;;  %v2810_v33 = vsel %vm2783_vm13, %v2777_v62, %v2753_v34  ;;  %10738 = vst [vmem:[#allocation68_spill] sm:$0xff] %v9487_v49  ;;  %v9497_v15 = vld [vmem:[#allocation17 + $0x30] sm:$0xff]  ;;  %v9499_v10 = vld [vmem:[#allocation17 + $0x38] sm:$0xff]  ;;  %v9501_v39 = vld [vmem:[#allocation17 + $0xc0] sm:$0xff] }
 0x3d0   : > { %10739 = vst [vmem:[#allocation69_spill] sm:$0xff] %v9489_v5  ;;  %v2826_v61 = vadd.f32 %v2786_v2, %v9282_v37  ;;  %v2827_v8 = vadd.f32 %v2810_v33, %v9284_v45  ;;  %v2794_v63 = vsel %vm2783_vm13, %v2761_v17, %v2769_v16  ;;  %v2802_v58 = vsel %vm2783_vm13, %v2753_v34, %v2761_v17  ;;  %v9505_v2 = vld [vmem:[#allocation17 + $0xc8] sm:$0xff]  ;;  %v9507_v45 = vld [vmem:[#allocation17 + $0x40] sm:$0xff] }
 0x3d1   : > { %10740 = vst [vmem:[#allocation70_spill] sm:$0xff] %v9497_v15  ;;  %10741 = vst [vmem:[#allocation71_spill] sm:$0xff] %v9499_v10  ;;  %v2968_v62 = vrot.slane %v2967_v47, 2  ;;  %v2973_v55 = vmax.f32 %v2972_v13, %v2897_v14  ;;  %v2824_v21 = vadd.f32 %v2802_v58, %v9290_v56  ;;  %v2825_v37 = vadd.f32 %v2794_v63, %v9292_v32  ;;  %v9509_v16 = vld [vmem:[#allocation17 + $0x48] sm:$0xff]  ;;  %v9519_v32 = vld [vmem:[#allocation17 + $0xd0] sm:$0xff] }
 0x3d2   : > { %10742 = vst [vmem:[#allocation33_spill] sm:$0xff] %v9501_v39  ;;  %10743 = vst [vmem:[#allocation35_spill] sm:$0xff] %v9505_v2  ;;  %v2938_v34 = vsel %vm2890_vm14, %v2898_v51, 0.0  ;;  %v2865_v33 = vadd.f32 %v9404_v24, %v2826_v61  ;;  %v2866_v17 = vadd.f32 %v9404_v24, %v2827_v8  ;;  %v6239_v38 = vpop.f32.mrb[44].mxu0  ;;  %v9515_v11 = vpop.f32.mrb[44].mxu1  ;;  %v9521_v13 = vld [vmem:[#allocation17 + $0xd8] sm:$0xff] }
 0x3d3   : > { %10744 = vst [vmem:[#allocation36_spill] sm:$0xff] %v9507_v45  ;;  %10745 = vst [vmem:[#allocation34_spill] sm:$0xff] %v9509_v16  ;;  %v2969_v14 = vmax.f32 %v2967_v47, %v2968_v62  ;;  %v2974_v63 = vmax.f32 %v2973_v55, %v2938_v34  ;;  %v2863_v58 = vadd.f32 %v9404_v24, %v2824_v21  ;;  %v2672_v25 = vpop.f32.mrb[45].mxu0  ;;  %v9525_v61 = vpop.f32.mrb[45].mxu1  ;;  %v9539_v39 = vld [vmem:[#allocation17 + $0x50] sm:$0xff]  ;;  %v9541_v47 = vld [vmem:[#allocation17 + $0x58] sm:$0xff] }
 0x3d4   : > { %10746 = vst [vmem:[#allocation37_spill] sm:$0xff] %v9515_v11  ;;  %10747 = vst [vmem:[#allocation73_spill] sm:$0xff] %v9519_v32  ;;  %v2864_v51 = vadd.f32 %v9404_v24, %v2825_v37  ;;  %v2754_v8 = vrot.slane %v2672_v25, 2  ;;  %v6240_v54 = vpop.f32.mrb[46].mxu0  ;;  %v9527_v23 = vpop.f32.mrb[46].mxu1  ;;  %v2902_v5 = vmax.f32 %v2866_v17, 0.0 }
 0x3d5   : > { %10748 = vst [vmem:[#allocation44_spill] sm:$0xff] %v9521_v13  ;;  %10749 = vst [vmem:[#allocation45_spill] sm:$0xff] %v9525_v61  ;;  %v2975_v62 = vrot.slane %v2974_v63, 4  ;;  %v2899_v21 = vmax.f32 %v2863_v58, 0.0  ;;  %v2675_v37 = vpop.f32.mrb[47].mxu0  ;;  %v9535_v34 = vpop.f32.mrb[47].mxu1 }
 0x3d6   : > { %10750 = vst [vmem:[#allocation53_spill] sm:$0xff] %v9527_v23  ;;  %v2900_v55 = vmax.f32 %v2864_v51, 0.0  ;;  %v2770_v61 = vrot.slane %v6239_v38, 2  ;;  %v2778_v23 = vrot.slane %v6240_v54, 2  ;;  %v2762_v11 = vrot.slane %v2675_v37, 2  ;;  %10751 = vst [vmem:[#allocation43_spill] sm:$0xff] %v9539_v39 }
 0x3d7   : > { %v2970_v56 = vrot.slane %v2969_v14, 1  ;;  %v2976_v15 = vmax.f32 %v2974_v63, %v2975_v62  ;;  %v2901_v10 = vmax.f32 %v2865_v33, 0.0  ;;  %10752 = vst [vmem:[#allocation74_spill] sm:$0xff] %v9541_v47  ;;  %v2942_v37 = vsel %vm2890_vm14, %v2902_v5, 0.0 }
 0x3d8   : > { %v2981_v49 = vmax.f32 %v2899_v21, %v2900_v55  ;;  %v2787_v58 = vsel %vm2783_vm13, %v2770_v61, %v2778_v23  ;;  %v2811_v51 = vsel %vm2783_vm13, %v2778_v23, %v2754_v8  ;;  %v2795_v17 = vsel %vm2783_vm13, %v2762_v11, %v2770_v61  ;;  %v9553_v21 = vld [vmem:[#allocation17 + $0xe0] sm:$0xff]  ;;  %v9555_v55 = vld [vmem:[#allocation17 + $0xe8] sm:$0xff] }
 0x3d9   : > { %v2803_v54 = vsel %vm2783_vm13, %v2754_v8, %v2762_v11  ;;  %v2977_v38 = vrot.slane %v2976_v15, 2  ;;  %v2830_v33 = vadd.f32 %v2787_v58, %v9312_v53  ;;  %v2831_v62 = vadd.f32 %v2811_v51, %v9314_v26  ;;  %10753 = vst [vmem:[#allocation72_spill] sm:$0xff] %v9553_v21 }
 0x3da   : > { %v2982_v63 = vmax.f32 %v2981_v49, %v2901_v10  ;;  %v2828_v23 = vadd.f32 %v2803_v54, %v9320_v0  ;;  %v2829_v61 = vadd.f32 %v2795_v17, %v9322_v52  ;;  %v6243_v25 = vpop.f32.mrb[48].mxu0  ;;  %v9561_v32 = vpop.f32.mrb[48].mxu1 }
 0x3db   : > { %v2978_v53 = vmax.f32 %v2976_v15, %v2977_v38  ;;  %v2869_v26 = vadd.f32 %v9404_v24, %v2830_v33  ;;  %v2870_v10 = vadd.f32 %v9404_v24, %v2831_v62  ;;  %v2688_v8 = vpop.f32.mrb[49].mxu0  ;;  %v9567_v58 = vpop.f32.mrb[49].mxu1  ;;  %v2971_v62 = vmax.f32 %v2969_v14, %v2970_v56 }
 0x3dc   : > { %v2983_v49 = vmax.f32 %v2982_v63, %v2942_v37  ;;  %v2867_v5 = vadd.f32 %v9404_v24, %v2828_v23  ;;  %v2868_v0 = vadd.f32 %v9404_v24, %v2829_v61  ;;  %v2755_v52 = vrot.slane %v2688_v8, 2  ;;  %v6244_v51 = vpop.f32.mrb[50].mxu0  ;;  %v9571_v17 = vpop.f32.mrb[50].mxu1 }
 0x3dd   : > { %v2979_v15 = vrot.slane %v2978_v53, 1  ;;  %v2771_v63 = vrot.slane %v6243_v25, 2  ;;  %v2691_v33 = vpop.f32.mrb[51].mxu0  ;;  %v9575_v37 = vpop.f32.mrb[51].mxu1  ;;  %v2779_v47 = vrot.slane %v6244_v51, 2  ;;  %v2905_v61 = vmax.f32 %v2869_v26, 0.0 }
 0x3de   : > { %v2984_v38 = vrot.slane %v2983_v49, 4  ;;  %v2903_v11 = vmax.f32 %v2867_v5, 0.0  ;;  %v2904_v39 = vmax.f32 %v2868_v0, 0.0  ;;  %v2763_v23 = vrot.slane %v2691_v33, 2 }
 0x3df   : > { %v2906_v8 = vmax.f32 %v2870_v10, 0.0  ;;  %v2980_v45 = vmax.f32 %v2978_v53, %v2979_v15  ;;  %v2788_v2 = vsel %vm2783_vm13, %v2771_v63, %v2779_v47  ;;  %v2812_v54 = vsel %vm2783_vm13, %v2779_v47, %v2755_v52 }
 0x3e0   : > { %v2985_v13 = vmax.f32 %v2983_v49, %v2984_v38  ;;  %v2990_v16 = vmax.f32 %v2903_v11, %v2904_v39  ;;  %v2796_v25 = vsel %vm2783_vm13, %v2763_v23, %v2771_v63  ;;  %v2834_v56 = vadd.f32 %v2788_v2, %v9328_v41 }
 0x3e1   : > { %v2835_v14 = vadd.f32 %v2812_v54, %v9330_v30  ;;  %v2804_v49 = vsel %vm2783_vm13, %v2755_v52, %v2763_v23  ;;  %v2833_v11 = vadd.f32 %v2796_v25, %v9338_v57  ;;  %v5122_v47 = vsel %vm5099_vm5, %v2980_v45, %v2971_v62  ;;  %v9604_v25 = vld [vmem:[#allocation17 + $0x60] sm:$0xff] }
 0x3e2   : > { %v2986_v21 = vrot.slane %v2985_v13, 2  ;;  %v2991_v26 = vmax.f32 %v2990_v16, %v2905_v61  ;;  %v2832_v39 = vadd.f32 %v2804_v49, %v9336_v50  ;;  %v6247_v53 = vpop.f32.mrb[52].mxu0  ;;  %v9589_v10 = vpop.f32.mrb[52].mxu1  ;;  %v2946_v0 = vsel %vm2890_vm14, %v2906_v8, 0.0  ;;  %10754 = vst [vmem:[#allocation30_spill] sm:$0xff] %v9604_v25 }
 0x3e3   : > { %v2873_v41 = vadd.f32 %v9404_v24, %v2834_v56  ;;  %v2874_v30 = vadd.f32 %v9404_v24, %v2835_v14  ;;  %v2704_v2 = vpop.f32.mrb[53].mxu0  ;;  %v9596_v52 = vpop.f32.mrb[53].mxu1  ;;  %v2872_v57 = vadd.f32 %v9404_v24, %v2833_v11  ;;  %v9606_v56 = vld [vmem:[#allocation17 + $0x68] sm:$0xff] }
 0x3e4   : > { %v2987_v5 = vmax.f32 %v2985_v13, %v2986_v21  ;;  %v2992_v16 = vmax.f32 %v2991_v26, %v2946_v0  ;;  %v2871_v50 = vadd.f32 %v9404_v24, %v2832_v39  ;;  %v2756_v51 = vrot.slane %v2704_v2, 2  ;;  %v6248_v54 = vpop.f32.mrb[54].mxu0  ;;  %v9600_v15 = vpop.f32.mrb[54].mxu1  ;;  %v9614_v2 = vld [vmem:[#allocation17 + $0xf0] sm:$0xff] }
 0x3e5   : > { %v2909_v45 = vmax.f32 %v2873_v41, 0.0  ;;  %v2772_v13 = vrot.slane %v6247_v53, 2  ;;  %v2780_v21 = vrot.slane %v6248_v54, 2  ;;  %v2707_v38 = vpop.f32.mrb[55].mxu0  ;;  %v9602_v63 = vpop.f32.mrb[55].mxu1  ;;  %v2908_v61 = vmax.f32 %v2872_v57, 0.0 }
 0x3e6   : > { %v2988_v33 = vrot.slane %v2987_v5, 1  ;;  %v2993_v62 = vrot.slane %v2992_v16, 4  ;;  %v2907_v23 = vmax.f32 %v2871_v50, 0.0  ;;  %v2764_v8 = vrot.slane %v2707_v38, 2  ;;  %10755 = vst [vmem:[#allocation52_spill] sm:$0xff] %v9614_v2  ;;  %v9616_v50 = vld [vmem:[#allocation17 + $0xf8] sm:$0xff] }
 0x3e7   : > { %v2910_v14 = vmax.f32 %v2874_v30, 0.0  ;;  %v2789_v49 = vsel %vm2783_vm13, %v2772_v13, %v2780_v21  ;;  %v2813_v26 = vsel %vm2783_vm13, %v2780_v21, %v2756_v51 }
 0x3e8   : > { %v2989_v39 = vmax.f32 %v2987_v5, %v2988_v33  ;;  %v2994_v11 = vmax.f32 %v2992_v16, %v2993_v62  ;;  %v2999_v53 = vmax.f32 %v2907_v23, %v2908_v61  ;;  %v2838_v0 = vadd.f32 %v2789_v49, %v9344_v43  ;;  %v9627_v16 = vld [vmem:[#allocation17 + $0x70] sm:$0xff]  ;;  %v9629_v43 = vld [vmem:[#allocation17 + $0x78] sm:$0xff] }
 0x3e9   : > { %v2839_v41 = vadd.f32 %v2813_v26, %v9346_v46  ;;  %v2797_v30 = vsel %vm2783_vm13, %v2764_v8, %v2772_v13  ;;  %v2805_v57 = vsel %vm2783_vm13, %v2756_v51, %v2764_v8  ;;  %10756 = vst [vmem:[#allocation38_spill] sm:$0xff] %v9627_v16  ;;  %10757 = vst [vmem:[#allocation39_spill] sm:$0xff] %v9629_v43  ;;  %v2950_v51 = vsel %vm2890_vm14, %v2910_v14, 0.0 }
 0x3ea   : > { %v9625_v5 = vsel %vm5101_vm6, %v2989_v39, %v5122_v47  ;;  %v2995_v46 = vrot.slane %v2994_v11, 2  ;;  %v3000_v21 = vmax.f32 %v2999_v53, %v2909_v45  ;;  %v2877_v38 = vadd.f32 %v9404_v24, %v2838_v0  ;;  %v6251_v13 = vpop.f32.mrb[56].mxu0  ;;  %v9633_v62 = vpop.f32.mrb[56].mxu1 }
 0x3eb   : > { %v2878_v33 = vadd.f32 %v9404_v24, %v2839_v41  ;;  %v2836_v23 = vadd.f32 %v2805_v57, %v9352_v48  ;;  %v2837_v47 = vadd.f32 %v2797_v30, %v9354_v12  ;;  %v2720_v61 = vpop.f32.mrb[57].mxu0  ;;  %v9639_v8 = vpop.f32.mrb[57].mxu1  ;;  %v2773_v26 = vrot.slane %v6251_v13, 2 }
 0x3ec   : > { %v3001_v49 = vmax.f32 %v3000_v21, %v2950_v51  ;;  %v2757_v39 = vrot.slane %v2720_v61, 2  ;;  %v6252_v53 = vpop.f32.mrb[58].mxu0  ;;  %v9643_v0 = vpop.f32.mrb[58].mxu1  ;;  %v2996_v54 = vmax.f32 %v2994_v11, %v2995_v46  ;;  %v2913_v45 = vmax.f32 %v2877_v38, 0.0 }
 0x3ed   : > { %v2875_v14 = vadd.f32 %v9404_v24, %v2836_v23  ;;  %v2876_v48 = vadd.f32 %v9404_v24, %v2837_v47  ;;  %v2781_v12 = vrot.slane %v6252_v53, 2  ;;  %v2723_v30 = vpop.f32.mrb[59].mxu0  ;;  %v9649_v57 = vpop.f32.mrb[59].mxu1  ;;  %v2914_v21 = vmax.f32 %v2878_v33, 0.0 }
 0x3ee   : > { %v3002_v25 = vrot.slane %v3001_v49, 4  ;;  %v2765_v13 = vrot.slane %v2723_v30, 2 }
 0x3ef   : > { %v2911_v51 = vmax.f32 %v2875_v14, 0.0  ;;  %v2912_v61 = vmax.f32 %v2876_v48, 0.0  ;;  %v2790_v2 = vsel %vm2783_vm13, %v2773_v26, %v2781_v12  ;;  %v2814_v41 = vsel %vm2783_vm13, %v2781_v12, %v2757_v39 }
 0x3f0   : > { %v3003_v23 = vmax.f32 %v3001_v49, %v3002_v25  ;;  %v2842_v47 = vadd.f32 %v2790_v2, %v9363_v59  ;;  %v2843_v53 = vadd.f32 %v2814_v41, %v9365_v4  ;;  %v2798_v11 = vsel %vm2783_vm13, %v2765_v13, %v2773_v26 }
 0x3f1   : > { %v3008_v46 = vmax.f32 %v2911_v51, %v2912_v61  ;;  %v2806_v38 = vsel %vm2783_vm13, %v2757_v39, %v2765_v13  ;;  %v2841_v33 = vadd.f32 %v2798_v11, %v9373_v9  ;;  %v2997_v14 = vrot.slane %v2996_v54, 1 }
 0x3f2   : > { %v2881_v48 = vadd.f32 %v9404_v24, %v2842_v47  ;;  %v2882_v30 = vadd.f32 %v9404_v24, %v2843_v53  ;;  %v2840_v25 = vadd.f32 %v2806_v38, %v9371_v6  ;;  %v6255_v49 = vpop.f32.mrb[60].mxu0  ;;  %v9665_v59 = vpop.f32.mrb[60].mxu1  ;;  %v3004_v4 = vrot.slane %v3003_v23, 2 }
 0x3f3   : > { %10758 = vst [vmem:[#allocation47_spill] sm:$0xff] %v9665_v59  ;;  %v2954_v2 = vsel %vm2890_vm14, %v2914_v21, 0.0  ;;  %v3009_v26 = vmax.f32 %v3008_v46, %v2913_v45  ;;  %v2880_v41 = vadd.f32 %v9404_v24, %v2841_v33  ;;  %v2736_v39 = vpop.f32.mrb[61].mxu0  ;;  %v9670_v12 = vpop.f32.mrb[61].mxu1  ;;  %v2998_v9 = vmax.f32 %v2996_v54, %v2997_v14 }
 0x3f4   : > { %v2918_v13 = vmax.f32 %v2882_v30, 0.0  ;;  %v2879_v51 = vadd.f32 %v9404_v24, %v2840_v25  ;;  %v2774_v61 = vrot.slane %v6255_v49, 2  ;;  %v2758_v47 = vrot.slane %v2736_v39, 2  ;;  %v6256_v6 = vpop.f32.mrb[62].mxu0  ;;  %v9673_v53 = vpop.f32.mrb[62].mxu1 }
 0x3f5   : > { %v3010_v11 = vmax.f32 %v3009_v26, %v2954_v2  ;;  %v2916_v38 = vmax.f32 %v2880_v41, 0.0  ;;  %v2782_v59 = vrot.slane %v6256_v6, 2  ;;  %v2739_v16 = vpop.f32.mrb[63].mxu0  ;;  %v9675_v21 = vpop.f32.mrb[63].mxu1  ;;  %v3005_v45 = vmax.f32 %v3003_v23, %v3004_v4 }
 0x3f6   : > { %v2917_v46 = vmax.f32 %v2881_v48, 0.0  ;;  %v2915_v33 = vmax.f32 %v2879_v51, 0.0  ;;  %v2766_v43 = vrot.slane %v2739_v16, 2  ;;  %v9679_v54 = vsel %vm5103_vm7, %v2998_v9, %v9625_v5 }
 0x3f7   : > { %v3011_v14 = vrot.slane %v3010_v11, 4  ;;  %v2791_v30 = vsel %vm2783_vm13, %v2774_v61, %v2782_v59  ;;  %v2815_v25 = vsel %vm2783_vm13, %v2782_v59, %v2758_v47  ;;  %v3006_v49 = vrot.slane %v3005_v45, 1 }
 0x3f8   : > { %v3017_v2 = vmax.f32 %v2915_v33, %v2916_v38  ;;  %v2846_v26 = vadd.f32 %v2791_v30, %v9379_v44  ;;  %v2847_v23 = vadd.f32 %v2815_v25, %v9381_v31  ;;  %v2799_v16 = vsel %vm2783_vm13, %v2766_v43, %v2774_v61 }
 0x3f9   : > { %v9691_v5 = vsel %vm2890_vm14, %v2918_v13, 0.0  ;;  %v2807_v48 = vsel %vm2783_vm13, %v2758_v47, %v2766_v43  ;;  %v2845_v4 = vadd.f32 %v2799_v16, %v9389_v36  ;;  %v9696_v41 = vmax.f32 %v3010_v11, %v3011_v14 }
 0x3fa   : > { %v9698_v59 = vmax.f32 %v3017_v2, %v2917_v46  ;;  %v2885_v44 = vadd.f32 %v9404_v24, %v2846_v26  ;;  %v2886_v31 = vadd.f32 %v9404_v24, %v2847_v23  ;;  %v2844_v39 = vadd.f32 %v2807_v48, %v9387_v22  ;;  %v6323_v9 = vpop.f32.mrb[64].mxu0  ;;  %v6371_v51 = vpop.f32.mrb[64].mxu1 }
 0x3fb   : > { %v2884_v13 = vadd.f32 %v9404_v24, %v2845_v4  ;;  %v3517_v61 = vrot.slane %v6323_v9, 1  ;;  %v3838_v6 = vrot.slane %v6371_v51, 2  ;;  %v3374_v38 = vpop.f32.mrb[65].mxu0  ;;  %v3695_v43 = vpop.f32.mrb[65].mxu1  ;;  %v9704_v47 = vmax.f32 %v3005_v45, %v3006_v49 }
 0x3fc   : > { %v2921_v36 = vmax.f32 %v2885_v44, 0.0  ;;  %v2883_v11 = vadd.f32 %v9404_v24, %v2844_v39  ;;  %v3501_v46 = vrot.slane %v3374_v38, 1  ;;  %v6324_v33 = vpop.f32.mrb[66].mxu0  ;;  %v6372_v14 = vpop.f32.mrb[66].mxu1  ;;  %v3013_v30 = vrot.slane %v9696_v41, 2 }
 0x3fd   : > { %v2920_v25 = vmax.f32 %v2884_v13, 0.0  ;;  %v3822_v22 = vrot.slane %v3695_v43, 2  ;;  %v3525_v2 = vrot.slane %v6324_v33, 1  ;;  %v3846_v26 = vrot.slane %v6372_v14, 2  ;;  %v3377_v23 = vpop.f32.mrb[67].mxu0  ;;  %v3698_v16 = vpop.f32.mrb[67].mxu1 }
 0x3fe   : > { %v2922_v48 = vmax.f32 %v2886_v31, 0.0  ;;  %v2919_v4 = vmax.f32 %v2883_v11, 0.0  ;;  %v3509_v9 = vrot.slane %v3377_v23, 1  ;;  %v3830_v51 = vrot.slane %v3698_v16, 2  ;;  %v9720_v43 = vld [vmem:[#allocation13] ss:$0 sm:$0xff] }
 0x3ff   : > { %v3533_v45 = vsel %vm2461_vm12, %v3517_v61, %v3525_v2  ;;  %v3557_v24 = vsel %vm2461_vm12, %v3525_v2, %v3501_v46  ;;  %v3854_v49 = vsel %vm2783_vm13, %v3838_v6, %v3846_v26  ;;  %v3878_v44 = vsel %vm2783_vm13, %v3846_v26, %v3822_v22 }
 0x400   : > { %v3026_v39 = vmax.f32 %v2919_v4, %v2920_v25  ;;  %v3567_v13 = vadd.f32 %v9391_v40, %v3533_v45  ;;  %v3568_v31 = vadd.f32 %v9396_v3, %v3557_v24  ;;  %v3541_v38 = vsel %vm2461_vm12, %v3509_v9, %v3517_v61 }
 0x401   : > { %v3549_v11 = vsel %vm2461_vm12, %v3501_v46, %v3509_v9  ;;  %v3566_v33 = vadd.f32 %v3541_v38, %v9398_v60  ;;  %v3862_v14 = vsel %vm2783_vm13, %v3830_v51, %v3838_v6  ;;  %v3870_v25 = vsel %vm2783_vm13, %v3822_v22, %v3830_v51 }
 0x402   : > { %v9729_v2 = vmax.f32 %v3026_v39, %v2921_v36  ;;  %v3888_v40 = vadd.f32 %v3854_v49, %v3567_v13  ;;  %v3889_v3 = vadd.f32 %v3878_v44, %v3568_v31  ;;  %v3565_v26 = vadd.f32 %v3549_v11, %v9393_v7  ;;  %v6327_v61 = vpop.f32.mrb[68].mxu0  ;;  %v6375_v23 = vpop.f32.mrb[68].mxu1 }
 0x403   : > { %v9734_v16 = vsel %vm2890_vm14, %v2922_v48, 0.0  ;;  %v3887_v46 = vadd.f32 %v3862_v14, %v3566_v33  ;;  %v3518_v60 = vrot.slane %v6327_v61, 1  ;;  %v3839_v4 = vrot.slane %v6375_v23, 2  ;;  %v3390_v9 = vpop.f32.mrb[69].mxu0  ;;  %v3711_v6 = vpop.f32.mrb[69].mxu1 }
 0x404   : > { %v3927_v45 = vadd.f32 %v9720_v43, %v3888_v40  ;;  %v3928_v36 = vadd.f32 %v9720_v43, %v3889_v3  ;;  %v3886_v22 = vadd.f32 %v3870_v25, %v3565_v26  ;;  %v3502_v51 = vrot.slane %v3390_v9, 1  ;;  %v6328_v24 = vpop.f32.mrb[70].mxu0  ;;  %v6376_v49 = vpop.f32.mrb[70].mxu1 }
 0x405   : > { %v3823_v7 = vrot.slane %v3711_v6, 2  ;;  %v3526_v44 = vrot.slane %v6328_v24, 1  ;;  %v3847_v39 = vrot.slane %v6376_v49, 2  ;;  %v3393_v13 = vpop.f32.mrb[71].mxu0  ;;  %v3714_v31 = vpop.f32.mrb[71].mxu1  ;;  %v3926_v48 = vadd.f32 %v9720_v43, %v3887_v46 }
 0x406   : > { %v3959_v38 = vmax.f32 %v3927_v45, 0.0  ;;  %v3960_v11 = vmax.f32 %v3928_v36, 0.0  ;;  %v3510_v33 = vrot.slane %v3393_v13, 1  ;;  %v3831_v14 = vrot.slane %v3714_v31, 2 }
 0x407   : > { %v3534_v40 = vsel %vm2461_vm12, %v3518_v60, %v3526_v44  ;;  %v3558_v25 = vsel %vm2461_vm12, %v3526_v44, %v3502_v51  ;;  %v3855_v3 = vsel %vm2783_vm13, %v3839_v4, %v3847_v39  ;;  %v3879_v26 = vsel %vm2783_vm13, %v3847_v39, %v3823_v7 }
 0x408   : > { %v9747_v61 = vpack.c.bf16 %v3960_v11, %v3959_v38  ;;  %v3571_v23 = vadd.f32 %v9415_v1, %v3534_v40  ;;  %v3572_v46 = vadd.f32 %v9422_v29, %v3558_v25  ;;  %v3542_v9 = vsel %vm2461_vm12, %v3510_v33, %v3518_v60 }
 0x409   : > { %v3550_v6 = vsel %vm2461_vm12, %v3502_v51, %v3510_v33  ;;  %v3570_v45 = vadd.f32 %v3542_v9, %v9424_v20  ;;  %v3863_v36 = vsel %vm2783_vm13, %v3831_v14, %v3839_v4  ;;  %v3871_v24 = vsel %vm2783_vm13, %v3823_v7, %v3831_v14 }
 0x40a   : > { %10759 = vst [vmem:[#allocation48_spill] sm:$0xff] %v9747_v61  ;;  %v3892_v49 = vadd.f32 %v3855_v3, %v3571_v23  ;;  %v3893_v44 = vadd.f32 %v3879_v26, %v3572_v46  ;;  %v3569_v1 = vadd.f32 %v3550_v6, %v9420_v18  ;;  %v6331_v39 = vpop.f32.mrb[72].mxu0  ;;  %v6379_v29 = vpop.f32.mrb[72].mxu1  ;;  %v3925_v13 = vadd.f32 %v9720_v43, %v3886_v22 }
 0x40b   : > { %v9762_v60 = vadd.f32 %v3863_v36, %v3570_v45  ;;  %v3519_v31 = vrot.slane %v6331_v39, 1  ;;  %v3840_v51 = vrot.slane %v6379_v29, 2  ;;  %v3406_v38 = vpop.f32.mrb[73].mxu0  ;;  %v3727_v20 = vpop.f32.mrb[73].mxu1  ;;  %v3958_v11 = vmax.f32 %v3926_v48, 0.0 }
 0x40c   : > { %v9765_v4 = vadd.f32 %v9720_v43, %v3892_v49  ;;  %v9768_v7 = vadd.f32 %v9720_v43, %v3893_v44  ;;  %v3890_v33 = vadd.f32 %v3871_v24, %v3569_v1  ;;  %v3503_v14 = vrot.slane %v3406_v38, 1  ;;  %v6332_v18 = vpop.f32.mrb[74].mxu0  ;;  %v6380_v40 = vpop.f32.mrb[74].mxu1  ;;  %v6858_v38 = vld [vmem:[#allocation14 + $0x88] sm:$0xff]  }
 0x40d   : > { %v3824_v25 = vrot.slane %v3727_v20, 2  ;;  %v3957_v3 = vmax.f32 %v3925_v13, 0.0  ;;  %v3527_v22 = vrot.slane %v6332_v18, 1  ;;  %v3848_v26 = vrot.slane %v6380_v40, 2  ;;  %v3409_v23 = vpop.f32.mrb[75].mxu0  ;;  %v3730_v46 = vpop.f32.mrb[75].mxu1 }
 0x40e   : > { %v3963_v9 = vmax.f32 %v9765_v4, 0.0  ;;  %v3511_v6 = vrot.slane %v3409_v23, 1  ;;  %v3832_v48 = vrot.slane %v3730_v46, 2  ;;  %v9774_v45 = vmax.f32 %v9696_v41, %v3013_v30  ;;  %v10763_v30 = vld [vmem:[#allocation66_spill] sm:$0xff] }
 0x40f   : > { %v9783_v24 = vpack.c.bf16 %v3958_v11, %v3957_v3  ;;  %v3535_v49 = vsel %vm2461_vm12, %v3519_v31, %v3527_v22  ;;  %v3559_v44 = vsel %vm2461_vm12, %v3527_v22, %v3503_v14  ;;  %v3856_v1 = vsel %vm2783_vm13, %v3840_v51, %v3848_v26 }
 0x410   : > { %v3575_v41 = vadd.f32 %v9459_v28, %v3535_v49  ;;  %v3576_v39 = vadd.f32 %v10763_v30, %v3559_v44  ;;  %v3880_v29 = vsel %vm2783_vm13, %v3848_v26, %v3824_v25  ;;  %v3543_v13 = vsel %vm2461_vm12, %v3511_v6, %v3519_v31  ;;  %v10764_v31 = vld [vmem:[#allocation65_spill] sm:$0xff]  ;;  %v10766_v44 = vld [vmem:[#allocation59_spill] sm:$0xff] }
 0x411   : > { %10762 = vst [vmem:[#allocation32_spill] sm:$0xff] %v9783_v24  ;;  %v3964_v20 = vmax.f32 %v9768_v7, 0.0  ;;  %6417 = vmatprep.mubr.bf16.mxu0 %v9783_v24  ;;  %6465 = vmatprep.mubr.bf16.mxu1 %v9783_v24  ;;  %v3551_v11 = vsel %vm2461_vm12, %v3503_v14, %v3511_v6  ;;  %v3574_v28 = vadd.f32 %v3543_v13, %v9479_v19  ;;  %v10765_v19 = vld [vmem:[#allocation56_spill] sm:$0xff] }
 0x412   : > { %v3864_v4 = vsel %vm2783_vm13, %v3832_v48, %v3840_v51  ;;  %v3896_v18 = vadd.f32 %v3856_v1, %v3575_v41  ;;  %v3897_v40 = vadd.f32 %v3880_v29, %v3576_v39  ;;  %6418 = vmatmul.mubr.msk.bf16.vlgmr.msra.gmra.mrb[96].mxu0 %vm9779_vm15, %v9747_v61  ;;  %6466 = vmatmul.mubr.msk.bf16.vlgmr.msra.gmra.mrb[96].mxu1 %vm9779_vm15, %v9747_v61  ;;  %v6335_v3 = vpop.f32.mrb[76].mxu0  ;;  %v6383_v22 = vpop.f32.mrb[76].mxu1  ;;  %v10767_v1 = vld [vmem:[#allocation57_spill] sm:$0xff] }
 0x413   : > { %v3573_v7 = vadd.f32 %v3551_v11, %v10764_v31  ;;  %6498 = vmatpush3.bf16.msra.mxu0 %v10765_v19  ;;  %v3872_v51 = vsel %vm2783_vm13, %v3824_v25, %v3832_v48  ;;  %v3895_v26 = vadd.f32 %v3864_v4, %v3574_v28  ;;  %v3520_v23 = vrot.slane %v6335_v3, 1  ;;  %v3422_v6 = vpop.f32.mrb[77].mxu0  ;;  %v9816_v49 = vpop.f32.mrb[77].mxu1  ;;  %v6859_v25 = vld [vmem:[#allocation14 + $0x90] sm:$0xff]   ;;  %v10769_v48 = vld [vmem:[#allocation62_spill] sm:$0xff] }
 0x414   : > { %v3841_v46 = vrot.slane %v6383_v22, 2  ;;  %v10768_v41 = vpack.c.bf16 %v10766_v44, %v10767_v1  ;;  %v3935_v30 = vadd.f32 %v9720_v43, %v3896_v18  ;;  %v3936_v39 = vadd.f32 %v9720_v43, %v3897_v40  ;;  %6499 = vmatprep.subr.bf16.mxu0 %v6858_v38  ;;  %v6336_v11 = vpop.f32.mrb[78].mxu0  ;;  %v6384_v31 = vpop.f32.mrb[78].mxu1  ;;  %v10770_v28 = vld [vmem:[#allocation60_spill] sm:$0xff] }
 0x415   : > { %v3894_v29 = vadd.f32 %v3872_v51, %v3573_v7  ;;  %v3504_v13 = vrot.slane %v3422_v6, 1  ;;  %v10771_v4 = vpack.c.bf16 %v10769_v48, %v10770_v28  ;;  %v3825_v3 = vrot.slane %v9816_v49, 2  ;;  %v3425_v44 = vpop.f32.mrb[79].mxu0  ;;  %v3746_v40 = vpop.f32.mrb[79].mxu1 }
 0x416   : > { %6583 = vmatpush3.bf16.msra.mxu1 %v10768_v41  ;;  %v3929_v22 = vadd.f32 %v9720_v43, %v3890_v33  ;;  %v3930_v19 = vadd.f32 %v9720_v43, %v9762_v60  ;;  %v3528_v18 = vrot.slane %v6336_v11, 1  ;;  %v3967_v7 = vmax.f32 %v3935_v30, 0.0  ;;  %v10773_v33 = vld [vmem:[#allocation55_spill] sm:$0xff]  ;;  %v10775_v11 = vld [vmem:[#allocation37_spill] sm:$0xff] }
 0x417   : > { %6585 = vmatprep.subr.bf16.mxu1 %v10771_v4  ;;  %v3968_v51 = vmax.f32 %v3936_v39, 0.0  ;;  %v3849_v6 = vrot.slane %v6384_v31, 2  ;;  %v9830_v1 = vpack.c.bf16 %v3964_v20, %v3963_v9  ;;  %6500 = vmatpush3.bf16.msra.mxu0 %v6858_v38  ;;  %v10774_v60 = vpack.c.bf16 %v9449_v35, %v10773_v33  ;;  %v10776_v30 = vld [vmem:[#allocation53_spill] sm:$0xff]  ;;  %v10779_v35 = vld [vmem:[#allocation63_spill] sm:$0xff] }
 0x418   : > { %v3961_v41 = vmax.f32 %v3929_v22, 0.0  ;;  %v3962_v14 = vmax.f32 %v3930_v19, 0.0  ;;  %v3536_v48 = vsel %vm2461_vm12, %v3520_v23, %v3528_v18  ;;  %v3560_v49 = vsel %vm2461_vm12, %v3528_v18, %v3504_v13  ;;  %6501 = vmatprep.subr.bf16.mxu0 %v6859_v25  ;;  %v10778_v19 = vld [vmem:[#allocation58_spill] sm:$0xff] }
 0x419   : > { %10772 = vst [vmem:[#allocation31_spill] sm:$0xff] %v9830_v1  ;;  %v3579_v28 = vadd.f32 %v10775_v11, %v3536_v48  ;;  %v3580_v39 = vadd.f32 %v10776_v30, %v3560_v49  ;;  %v3857_v9 = vsel %vm2783_vm13, %v3841_v46, %v3849_v6  ;;  %v3881_v20 = vsel %vm2783_vm13, %v3849_v6, %v3825_v3  ;;  %v6860_v6 = vld [vmem:[#allocation14 + $0x98] sm:$0xff]  }
 0x41a   : > { %6587 = vmatpush3.bf16.msra.mxu1 %v10774_v60  ;;  %v9845_v31 = vpack.c.bf16 %v3962_v14, %v3961_v41  ;;  %v3512_v4 = vrot.slane %v3425_v44, 1  ;;  %v3833_v22 = vrot.slane %v3746_v40, 2  ;;  %v3933_v38 = vadd.f32 %v9720_v43, %v3894_v29  ;;  %v6339_v49 = vpop.f32.mrb[80].mxu0  ;;  %v6387_v60 = vpop.f32.mrb[80].mxu1 }
 0x41b   : > { %v10780_v18 = vpack.c.bf16 %v10778_v19, %v10779_v35  ;;  %v3900_v48 = vadd.f32 %v3857_v9, %v3579_v28  ;;  %v3901_v33 = vadd.f32 %v3881_v20, %v3580_v39  ;;  %v3934_v11 = vadd.f32 %v9720_v43, %v3895_v26  ;;  %v3438_v41 = vpop.f32.mrb[81].mxu0  ;;  %v9862_v28 = vpop.f32.mrb[81].mxu1  ;;  %6502 = vmatpush3.bf16.msra.mxu0 %v6859_v25 }
 0x41c   : > { %10777 = vst [vmem:[#allocation41_spill] sm:$0xff] %v9845_v31  ;;  %v9852_v30 = vpack.c.bf16 %v3968_v51, %v3967_v7  ;;  %6421 = vmatprep.mubr.bf16.mxu0 %v9845_v31  ;;  %6469 = vmatprep.mubr.bf16.mxu1 %v9845_v31  ;;  %v3544_v14 = vsel %vm2461_vm12, %v3512_v4, %v3520_v23  ;;  %v3521_v40 = vrot.slane %v6339_v49, 1  ;;  %v10781_v23 = vld [vmem:[#allocation45_spill] sm:$0xff]  ;;  %v3842_v51 = vrot.slane %v6387_v60, 2  ;;  %v6388_v39 = vpop.f32.mrb[82].mxu1 }
 0x41d   : > { %6589 = vmatprep.subr.bf16.mxu1 %v10780_v18  ;;  %v3552_v29 = vsel %vm2461_vm12, %v3504_v13, %v3512_v4  ;;  %v3865_v44 = vsel %vm2783_vm13, %v3833_v22, %v3841_v46  ;;  %v3939_v26 = vadd.f32 %v9720_v43, %v3900_v48  ;;  %v3940_v7 = vadd.f32 %v9720_v43, %v3901_v33  ;;  %v6340_v46 = vpop.f32.mrb[82].mxu0  ;;  %v3762_v18 = vpop.f32.mrb[83].mxu1  ;;  %v10782_v48 = vld [vmem:[#allocation64_spill] sm:$0xff]  ;;  %v10783_v33 = vld [vmem:[#allocation61_spill] sm:$0xff] }
 0x41e   : > { %6422 = vmatmul.mubr.msk.bf16.gmra.mrb[100].mxu0 %vm9779_vm15, %v9830_v1  ;;  %6470 = vmatmul.mubr.msk.bf16.gmra.mrb[100].mxu1 %vm9779_vm15, %v9830_v1  ;;  %v3577_v13 = vadd.f32 %v3552_v29, %v10781_v23  ;;  %v3578_v9 = vadd.f32 %v3544_v14, %v9535_v34  ;;  %v3873_v20 = vsel %vm2783_vm13, %v3825_v3, %v3833_v22  ;;  %v3505_v4 = vrot.slane %v3438_v41, 1  ;;  %v3441_v35 = vpop.f32.mrb[83].mxu0  ;;  %v6861_v1 = vld [vmem:[#allocation14 + $0xa0] sm:$0xff]   ;;  %v10785_v34 = vld [vmem:[#allocation69_spill] sm:$0xff]  ;;  %v10786_v14 = vld [vmem:[#allocation68_spill] sm:$0xff] }
 0x41f   : > { %v3826_v19 = vrot.slane %v9862_v28, 2  ;;  %v10784_v49 = vpack.c.bf16 %v10782_v48, %v10783_v33  ;;  %v3971_v42 = vmax.f32 %v3939_v26, 0.0  ;;  %v3972_v29 = vmax.f32 %v3940_v7, 0.0  ;;  %6503 = vmatprep.subr.bf16.mxu0 %v6860_v6 }
 0x420   : > { %v3898_v60 = vadd.f32 %v3873_v20, %v3577_v13  ;;  %v3965_v23 = vmax.f32 %v3933_v38, 0.0  ;;  %v10787_v31 = vpack.c.bf16 %v10785_v34, %v10786_v14  ;;  %v3899_v3 = vadd.f32 %v3865_v44, %v3578_v9  ;;  %6504 = vmatpush3.bf16.msra.mxu0 %v6860_v6  ;;  %v6862_v9 = vld [vmem:[#allocation14 + $0xa8] sm:$0xff]  }
 0x421   : > { %6591 = vmatpush3.bf16.msra.mxu1 %v10784_v49  ;;  %v3966_v22 = vmax.f32 %v3934_v11, 0.0  ;;  %v3529_v41 = vrot.slane %v6340_v46, 1  ;;  %v3850_v25 = vrot.slane %v6388_v39, 2  ;;  %v3513_v28 = vrot.slane %v3441_v35, 1  ;;  %6505 = vmatprep.subr.bf16.mxu0 %v6861_v1 }
 0x422   : > { %6593 = vmatprep.subr.bf16.mxu1 %v10787_v31  ;;  %v3834_v61 = vrot.slane %v3762_v18, 2  ;;  %v3937_v24 = vadd.f32 %v9720_v43, %v3898_v60  ;;  %v9884_v48 = vpack.c.bf16 %v3972_v29, %v3971_v42  ;;  %v6343_v46 = vpop.f32.mrb[84].mxu0  ;;  %v6391_v39 = vpop.f32.mrb[84].mxu1 }
 0x423   : > { %v9886_v26 = vpack.c.bf16 %v3966_v22, %v3965_v23  ;;  %v3537_v38 = vsel %vm2461_vm12, %v3521_v40, %v3529_v41  ;;  %v3561_v7 = vsel %vm2461_vm12, %v3529_v41, %v3505_v4  ;;  %v3858_v31 = vsel %vm2783_vm13, %v3842_v51, %v3850_v25  ;;  %v3454_v35 = vpop.f32.mrb[85].mxu0  ;;  %v3775_v18 = vpop.f32.mrb[85].mxu1  ;;  %v10788_v41 = vld [vmem:[#allocation71_spill] sm:$0xff] }
 0x424   : > { %v3583_v11 = vadd.f32 %v9561_v32, %v3537_v38  ;;  %v3584_v44 = vadd.f32 %v9571_v17, %v3561_v7  ;;  %v3882_v42 = vsel %vm2783_vm13, %v3850_v25, %v3826_v19  ;;  %v3545_v13 = vsel %vm2461_vm12, %v3513_v28, %v3521_v40  ;;  %v6392_v29 = vpop.f32.mrb[86].mxu1  ;;  %6506 = vmatpush3.bf16.msra.mxu0 %v6861_v1  ;;  %v10789_v25 = vld [vmem:[#allocation70_spill] sm:$0xff] }
 0x425   : > { %6425 = vmatprep.mubr.bf16.mxu0 %v9886_v26  ;;  %6473 = vmatprep.mubr.bf16.mxu1 %v9886_v26  ;;  %v3553_v6 = vsel %vm2461_vm12, %v3505_v4, %v3513_v28  ;;  %v3582_v32 = vadd.f32 %v3545_v13, %v9575_v37  ;;  %v3866_v17 = vsel %vm2783_vm13, %v3834_v61, %v3842_v51  ;;  %v3522_v20 = vrot.slane %v6343_v46, 1  ;;  %v6344_v37 = vpop.f32.mrb[86].mxu0  ;;  %v3778_v22 = vpop.f32.mrb[87].mxu1  ;;  %v10791_v13 = vld [vmem:[#allocation35_spill] sm:$0xff]  ;;  %v10792_v46 = vld [vmem:[#allocation33_spill] sm:$0xff] }
 0x426   : > { %v3904_v40 = vadd.f32 %v3858_v31, %v3583_v11  ;;  %v3905_v33 = vadd.f32 %v3882_v42, %v3584_v44  ;;  %6426 = vmatmul.mubr.msk.bf16.gmra.mrb[104].mxu0 %vm9779_vm15, %v9852_v30  ;;  %6474 = vmatmul.mubr.msk.bf16.gmra.mrb[104].mxu1 %vm9779_vm15, %v9852_v30  ;;  %v3581_v4 = vadd.f32 %v3553_v6, %v9567_v58  ;;  %v3843_v49 = vrot.slane %v6391_v39, 2  ;;  %v3457_v14 = vpop.f32.mrb[87].mxu0 }
 0x427   : > { %v3874_v51 = vsel %vm2783_vm13, %v3826_v19, %v3834_v61  ;;  %v9916_v60 = vadd.f32 %v3866_v17, %v3582_v32  ;;  %v3506_v23 = vrot.slane %v3454_v35, 1  ;;  %v3827_v34 = vrot.slane %v3775_v18, 2  ;;  %6507 = vmatprep.subr.bf16.mxu0 %v6862_v9  ;;  %v6863_v61 = vld [vmem:[#allocation14 + $0xb0] sm:$0xff]  }
 0x428   : > { %v10790_v28 = vpack.c.bf16 %v10788_v41, %v10789_v25  ;;  %v3943_v38 = vadd.f32 %v9720_v43, %v3904_v40  ;;  %v3944_v58 = vadd.f32 %v9720_v43, %v3905_v33  ;;  %v3902_v7 = vadd.f32 %v3874_v51, %v3581_v4  ;;  %6508 = vmatpush3.bf16.msra.mxu0 %v6862_v9  ;;  %v10794_v25 = vld [vmem:[#allocation34_spill] sm:$0xff] }
 0x429   : > { %v3938_v31 = vadd.f32 %v9720_v43, %v3899_v3  ;;  %v3969_v19 = vmax.f32 %v3937_v24, 0.0  ;;  %v3530_v11 = vrot.slane %v6344_v37, 1  ;;  %v3851_v44 = vrot.slane %v6392_v29, 2  ;;  %6509 = vmatprep.subr.bf16.mxu0 %v6863_v61 }
 0x42a   : > { %6595 = vmatpush3.bf16.msra.mxu1 %v10790_v28  ;;  %v3514_v42 = vrot.slane %v3457_v14, 1  ;;  %v10793_v1 = vpack.c.bf16 %v10791_v13, %v10792_v46  ;;  %v3975_v39 = vmax.f32 %v3943_v38, 0.0  ;;  %v3976_v6 = vmax.f32 %v3944_v58, 0.0  ;;  %v6347_v29 = vpop.f32.mrb[88].mxu0  ;;  %v9941_v51 = vpop.f32.mrb[88].mxu1  ;;  %v6864_v38 = vld [vmem:[#allocation14 + $0xb8] sm:$0xff]  }
 0x42b   : > { %v3970_v32 = vmax.f32 %v3938_v31, 0.0  ;;  %v3835_v17 = vrot.slane %v3778_v22, 2  ;;  %v3538_v35 = vsel %vm2461_vm12, %v3522_v20, %v3530_v11  ;;  %v3562_v3 = vsel %vm2461_vm12, %v3530_v11, %v3506_v23  ;;  %v3470_v41 = vpop.f32.mrb[89].mxu0 }
 0x42c   : > { %6597 = vmatprep.subr.bf16.mxu1 %v10793_v1  ;;  %v3859_v24 = vsel %vm2783_vm13, %v3843_v49, %v3851_v44  ;;  %v3883_v18 = vsel %vm2783_vm13, %v3851_v44, %v3827_v34  ;;  %v3587_v33 = vadd.f32 %v9589_v10, %v3538_v35  ;;  %v3588_v4 = vadd.f32 %v9600_v15, %v3562_v3  ;;  %v9950_v15 = vpop.f32.mrb[89].mxu1  ;;  %v6348_v31 = vpop.f32.mrb[90].mxu0 }
 0x42d   : > { %v9935_v40 = vpack.c.bf16 %v3970_v32, %v3969_v19  ;;  %v3546_v37 = vsel %vm2461_vm12, %v3514_v42, %v3522_v20  ;;  %v3554_v14 = vsel %vm2461_vm12, %v3506_v23, %v3514_v42  ;;  %v3867_v9 = vsel %vm2783_vm13, %v3835_v17, %v3843_v49  ;;  %v10795_v20 = vld [vmem:[#allocation36_spill] sm:$0xff]  ;;  %v6396_v19 = vpop.f32.mrb[90].mxu1  ;;  %v3473_v13 = vpop.f32.mrb[91].mxu0  ;;  %6510 = vmatpush3.bf16.msra.mxu0 %v6863_v61  ;;  %v10801_v61 = vld [vmem:[#allocation43_spill] sm:$0xff] }
 0x42e   : > { %v3586_v22 = vadd.f32 %v3546_v37, %v9602_v63  ;;  %v3875_v10 = vsel %vm2783_vm13, %v3827_v34, %v3835_v17  ;;  %v10796_v28 = vpack.c.bf16 %v10794_v25, %v10795_v20  ;;  %v3908_v23 = vadd.f32 %v3859_v24, %v3587_v33  ;;  %v10797_v33 = vld [vmem:[#allocation44_spill] sm:$0xff]  ;;  %6511 = vmatprep.subr.bf16.mxu0 %v6864_v38 }
 0x42f   : > { %6429 = vmatprep.mubr.bf16.mxu0 %v9935_v40  ;;  %6477 = vmatprep.mubr.bf16.mxu1 %v9935_v40  ;;  %v3909_v63 = vadd.f32 %v3883_v18, %v3588_v4  ;;  %v3585_v58 = vadd.f32 %v3554_v14, %v9596_v52  ;;  %v3523_v49 = vrot.slane %v6347_v29, 1  ;;  %v3844_v11 = vrot.slane %v9941_v51, 2  ;;  %v3794_v52 = vpop.f32.mrb[91].mxu1  ;;  %v10798_v4 = vld [vmem:[#allocation73_spill] sm:$0xff] }
 0x430   : > { %6599 = vmatpush3.bf16.msra.mxu1 %v10796_v28  ;;  %6430 = vmatmul.mubr.msk.bf16.gmra.mrb[108].mxu0 %vm9779_vm15, %v9884_v48  ;;  %v9964_v34 = vadd.f32 %v3867_v9, %v3586_v22  ;;  %v3507_v44 = vrot.slane %v3470_v41, 1  ;;  %v3828_v42 = vrot.slane %v9950_v15, 2  ;;  %v9969_v46 = vadd.f32 %v9720_v43, %v3908_v23  ;;  %v10803_v41 = vld [vmem:[#allocation72_spill] sm:$0xff] }
 0x431   : > { %6478 = vmatmul.mubr.msk.bf16.gmra.mrb[108].mxu1 %vm9779_vm15, %v9884_v48  ;;  %v9972_v1 = vadd.f32 %v9720_v43, %v3909_v63  ;;  %v3906_v32 = vadd.f32 %v3875_v10, %v3585_v58  ;;  %v3941_v17 = vadd.f32 %v9720_v43, %v3902_v7  ;;  %v3942_v35 = vadd.f32 %v9720_v43, %v9916_v60  ;;  %v10800_v7 = vld [vmem:[#allocation74_spill] sm:$0xff] }
 0x432   : > { %v3531_v3 = vrot.slane %v6348_v31, 1  ;;  %v3852_v24 = vrot.slane %v6396_v19, 2  ;;  %v9977_v18 = vpack.c.bf16 %v3976_v6, %v3975_v39  ;;  %v10799_v37 = vpack.c.bf16 %v10797_v33, %v10798_v4  ;;  %v6351_v63 = vpop.f32.mrb[92].mxu0  ;;  %v6399_v58 = vpop.f32.mrb[92].mxu1  ;;  %6512 = vmatpush3.bf16.msra.mxu0 %v6864_v38  ;;  %v10805_v38 = vld [vmem:[#allocation30_spill] sm:$0xff] }
 0x433   : > { %v3979_v29 = vmax.f32 %v9969_v46, 0.0  ;;  %v3980_v51 = vmax.f32 %v9972_v1, 0.0  ;;  %v3973_v14 = vmax.f32 %v3941_v17, 0.0  ;;  %v3515_v22 = vrot.slane %v3473_v13, 1  ;;  %v10007_v46 = vpop.f32.mrb[93].mxu1 }
 0x434   : > { %6601 = vmatprep.subr.bf16.mxu1 %v10799_v37  ;;  %v10802_v9 = vpack.c.bf16 %v10800_v7, %v10801_v61  ;;  %v3974_v60 = vmax.f32 %v3942_v35, 0.0  ;;  %v3539_v39 = vsel %vm2461_vm12, %v3523_v49, %v3531_v3  ;;  %v3563_v6 = vsel %vm2461_vm12, %v3531_v3, %v3507_v44  ;;  %v6400_v3 = vpop.f32.mrb[94].mxu1 }
 0x435   : > { %v3860_v10 = vsel %vm2783_vm13, %v3844_v11, %v3852_v24  ;;  %v10804_v15 = vpack.c.bf16 %v9555_v55, %v10803_v41  ;;  %v3591_v25 = vadd.f32 %v9633_v62, %v3539_v39  ;;  %v3592_v20 = vadd.f32 %v9643_v0, %v3563_v6  ;;  %v3486_v62 = vpop.f32.mrb[93].mxu0  ;;  %v3810_v4 = vpop.f32.mrb[95].mxu1 }
 0x436   : > { %6603 = vmatpush3.bf16.msra.mxu1 %v10802_v9  ;;  %v3884_v28 = vsel %vm2783_vm13, %v3852_v24, %v3828_v42  ;;  %v3547_v23 = vsel %vm2461_vm12, %v3515_v22, %v3523_v49  ;;  %v10002_v31 = vpack.c.bf16 %v3974_v60, %v3973_v14  ;;  %v3555_v19 = vsel %vm2461_vm12, %v3507_v44, %v3515_v22  ;;  %v6352_v49 = vpop.f32.mrb[94].mxu0  ;;  %v10807_v9 = vld [vmem:[#allocation52_spill] sm:$0xff] }
 0x437   : > { %6605 = vmatprep.subr.bf16.mxu1 %v10804_v15  ;;  %v3590_v55 = vadd.f32 %v3547_v23, %v9649_v57  ;;  %v3836_v13 = vrot.slane %v3794_v52, 2  ;;  %v3912_v0 = vadd.f32 %v3860_v10, %v3591_v25  ;;  %v3913_v1 = vadd.f32 %v3884_v28, %v3592_v20  ;;  %v10809_v15 = vld [vmem:[#allocation39_spill] sm:$0xff]  ;;  %v10810_v25 = vld [vmem:[#allocation38_spill] sm:$0xff] }
 0x438   : > { %v3589_v17 = vadd.f32 %v3555_v19, %v9639_v8  ;;  %v3524_v35 = vrot.slane %v6351_v63, 1  ;;  %v10806_v24 = vpack.c.bf16 %v9606_v56, %v10805_v38  ;;  %6433 = vmatprep.mubr.bf16.mxu0 %v10002_v31  ;;  %6481 = vmatprep.mubr.bf16.mxu1 %v10002_v31  ;;  %v3845_v52 = vrot.slane %v6399_v58, 2  ;;  %v3489_v8 = vpop.f32.mrb[95].mxu0  ;;  %v10812_v63 = vld [vmem:[#allocation47_spill] sm:$0xff] }
 0x439   : > { %v3868_v57 = vsel %vm2783_vm13, %v3836_v13, %v3844_v11  ;;  %v3876_v44 = vsel %vm2783_vm13, %v3828_v42, %v3836_v13  ;;  %v3508_v33 = vrot.slane %v3486_v62, 1  ;;  %v3951_v37 = vadd.f32 %v9720_v43, %v3912_v0  ;;  %6434 = vmatmul.mubr.msk.bf16.gmra.mrb[112].mxu0 %vm9779_vm15, %v9977_v18  ;;  %6482 = vmatmul.mubr.msk.bf16.gmra.mrb[112].mxu1 %vm9779_vm15, %v9977_v18 }
 0x43a   : > { %6607 = vmatpush3.bf16.msra.mxu1 %v10806_v24  ;;  %v3952_v14 = vadd.f32 %v9720_v43, %v3913_v1  ;;  %v3910_v56 = vadd.f32 %v3876_v44, %v3589_v17  ;;  %v3829_v11 = vrot.slane %v10007_v46, 2  ;;  %v3911_v42 = vadd.f32 %v3868_v57, %v3590_v55 }
 0x43b   : > { %v3945_v22 = vadd.f32 %v9720_v43, %v3906_v32  ;;  %v3946_v7 = vadd.f32 %v9720_v43, %v9964_v34  ;;  %v3532_v61 = vrot.slane %v6352_v49, 1  ;;  %v10808_v60 = vpack.c.bf16 %v9616_v50, %v10807_v9 }
 0x43c   : > { %v3983_v39 = vmax.f32 %v3951_v37, 0.0  ;;  %v3984_v6 = vmax.f32 %v3952_v14, 0.0  ;;  %v3853_v10 = vrot.slane %v6400_v3, 2  ;;  %v10034_v41 = vpack.c.bf16 %v3980_v51, %v3979_v29 }
 0x43d   : > { %6609 = vmatprep.subr.bf16.mxu1 %v10808_v60  ;;  %v10811_v20 = vpack.c.bf16 %v10809_v15, %v10810_v25  ;;  %v3977_v28 = vmax.f32 %v3945_v22, 0.0  ;;  %v3978_v23 = vmax.f32 %v3946_v7, 0.0  ;;  %v3540_v32 = vsel %vm2461_vm12, %v3524_v35, %v3532_v61 }
 0x43e   : > { %v3564_v34 = vsel %vm2461_vm12, %v3532_v61, %v3508_v33  ;;  %v3595_v50 = vadd.f32 %v10812_v63, %v3540_v32  ;;  %v3861_v29 = vsel %vm2783_vm13, %v3845_v52, %v3853_v10  ;;  %v3885_v51 = vsel %vm2783_vm13, %v3853_v10, %v3829_v11  ;;  %v10814_v32 = vld [vmem:[#allocation32_spill] sm:$0xff] }
 0x43f   : > { %6611 = vmatpush3.bf16.msra.mxu1 %v10811_v20  ;;  %v3596_v58 = vadd.f32 %v9673_v53, %v3564_v34  ;;  %v10049_v19 = vpack.c.bf16 %v3978_v23, %v3977_v28  ;;  %v3516_v55 = vrot.slane %v3489_v8, 1  ;;  %v3837_v13 = vrot.slane %v3810_v4, 2  ;;  %v10815_v63 = vld [vmem:[#allocation48_spill] sm:$0xff] }
 0x440   : > { %v3949_v62 = vadd.f32 %v9720_v43, %v3910_v56  ;;  %v3916_v46 = vadd.f32 %v3861_v29, %v3595_v50  ;;  %v3950_v1 = vadd.f32 %v9720_v43, %v3911_v42  ;;  %v10053_v17 = vpack.c.bf16 %v3984_v6, %v3983_v39  ;;  %v10816_v50 = vld [vmem:[#allocation54_spill] sm:$0xff]  ;;  %v10818_v29 = vld [vmem:[#allocation31_spill] sm:$0xff] }
 0x441   : > { %v3917_v0 = vadd.f32 %v3885_v51, %v3596_v58  ;;  %6437 = vmatprep.mubr.bf16.mxu0 %v10049_v19  ;;  %6485 = vmatprep.mubr.bf16.mxu1 %v10049_v19  ;;  %v3548_v53 = vsel %vm2461_vm12, %v3516_v55, %v3524_v35  ;;  %v3556_v49 = vsel %vm2461_vm12, %v3508_v33, %v3516_v55  ;;  %v10813_v8 = vrot.slane %v9774_v45, 1  ;;  %v10817_v58 = vld [vmem:[#allocation41_spill] sm:$0xff] }
 0x442   : > { %v3869_v3 = vsel %vm2783_vm13, %v3837_v13, %v3845_v52  ;;  %v3981_v38 = vmax.f32 %v3949_v62, 0.0  ;;  %v3955_v24 = vadd.f32 %v9720_v43, %v3916_v46  ;;  %6438 = vmatmul.mubr.msk.bf16.gmra.mrb[116].mxu0 %vm9779_vm15, %v10034_v41  ;;  %6486 = vmatmul.mubr.msk.bf16.gmra.mrb[116].mxu1 %vm9779_vm15, %v10034_v41  ;;  %v3593_v35 = vadd.f32 %v3556_v49, %v9670_v12  ;;  %v5178_v49 = vld [vmem:[#allocation17 + $0x100] sm:$0xff] }
 0x443   : > { %v3956_v57 = vadd.f32 %v9720_v43, %v3917_v0  ;;  %v3982_v44 = vmax.f32 %v3950_v1, 0.0  ;;  %v3594_v33 = vadd.f32 %v3548_v53, %v9675_v21  ;;  %v3877_v52 = vsel %vm2783_vm13, %v3829_v11, %v3837_v13 }
 0x444   : > { %v3016_v4 = vmax.f32 %v9774_v45, %v10813_v8  ;;  %v3019_v37 = vmax.f32 %v9698_v59, %v9691_v5  ;;  %v3987_v14 = vmax.f32 %v3955_v24, 0.0  ;;  %v3914_v42 = vadd.f32 %v3877_v52, %v3593_v35 }
 0x445   : > { %v3988_v56 = vmax.f32 %v3956_v57, 0.0  ;;  %v4033_v22 = vpack.c.bf16 %v3982_v44, %v3981_v38  ;;  %v3915_v7 = vadd.f32 %v3869_v3, %v3594_v33  ;;  %v3028_v12 = vmax.f32 %v9729_v2, %v9734_v16  ;;  %v5179_v3 = vld [vmem:[#allocation17 + $0x108] sm:$0xff] }
 0x446   : > { %v3020_v61 = vrot.slane %v3019_v37, 4  ;;  %v5125_v21 = vsel %vm5105_vm8, %v9704_v47, %v9679_v54  ;;  %v3953_v45 = vadd.f32 %v9720_v43, %v3914_v42  ;;  %v6613_v57 = vpack.c.bf16 %v5179_v3, %v5178_v49 }
 0x447   : > { %6441 = vmatprep.mubr.bf16.mxu0 %v4033_v22  ;;  %6489 = vmatprep.mubr.bf16.mxu1 %v4033_v22  ;;  %v5773_v11 = vpack.c.bf16 %v3988_v56, %v3987_v14  ;;  %v5126_v5 = vsel %vm5107_vm9, %v3016_v4, %v5125_v21  ;;  %v3954_v59 = vadd.f32 %v9720_v43, %v3915_v7  ;;  %v3029_v60 = vrot.slane %v3028_v12, 4  ;;  %v5181_v21 = vld [vmem:[#allocation17 + $0x118] sm:$0xff] }
 0x448   : > { %v3021_v9 = vmax.f32 %v3019_v37, %v3020_v61  ;;  %v3985_v39 = vmax.f32 %v3953_v45, 0.0  ;;  %v7283_v35 = vmov 0.0|0.0   ;;  %v5182_v45 = vld [vmem:[#allocation17 + $0x120] sm:$0xff] }
 0x449   : > { %v3986_v6 = vmax.f32 %v3954_v59, 0.0  ;;  %v3030_v15 = vmax.f32 %v3028_v12, %v3029_v60  ;;  %6612 = vmatprep.subr.bf16.mxu1 %v7283_v35  ;;  %v5180_v12 = vld [vmem:[#allocation17 + $0x110] sm:$0xff]  ;;  %v7285_v60 = vmov 0.0  }
 0x44a   : > { %v3022_v10 = vrot.slane %v3021_v9, 2  ;;  %6442 = vmatmul.mubr.msk.bf16.gmra.mrb[120].mxu0 %vm9779_vm15, %v10053_v17  ;;  %6490 = vmatmul.mubr.msk.bf16.gmra.mrb[120].mxu1 %vm9779_vm15, %v10053_v17  ;;  %v6616_v59 = vpack.c.bf16 %v5181_v21, %v5180_v12 }
 0x44b   : > { %v4035_v54 = vpack.c.bf16 %v3986_v6, %v3985_v39  ;;  %v3031_v2 = vrot.slane %v3030_v15, 2 }
 0x44c   : > { %v3023_v47 = vmax.f32 %v3021_v9, %v3022_v10  ;;  %v5183_v9 = vld [vmem:[#allocation17 + $0x128] sm:$0xff] }
 0x44d   : > { %6445 = vmatprep.mubr.bf16.mxu0 %v4035_v54  ;;  %6493 = vmatprep.mubr.bf16.mxu1 %v4035_v54  ;;  %v3032_v16 = vmax.f32 %v3030_v15, %v3031_v2  ;;  %v6619_v2 = vpack.c.bf16 %v5183_v9, %v5182_v45 }
 0x44e   : > { %v3024_v43 = vrot.slane %v3023_v47, 1 }
 0x44f   : > { %v3033_v20 = vrot.slane %v3032_v16, 1 }
 0x450   : > { %v3025_v25 = vmax.f32 %v3023_v47, %v3024_v43 }
 0x451   : > { %v3034_v28 = vmax.f32 %v3032_v16, %v3033_v20  ;;  %v5185_v20 = vld [vmem:[#allocation17 + $0x138] sm:$0xff] }
 0x452   : > { %v5127_v23 = vsel %vm5109_vm10, %v3025_v25, %v5126_v5  ;;  %6446 = vmatmul.mubr.msk.bf16.gmra.mrb[124].mxu0 %vm9779_vm15, %v5773_v11  ;;  %6494 = vmatmul.mubr.msk.bf16.gmra.mrb[124].mxu1 %vm9779_vm15, %v5773_v11  ;;  %v5184_v25 = vld [vmem:[#allocation17 + $0x130] sm:$0xff] }
 0x453   : > { %6513 = vmatprep.mubr.bf16.mxu0 %v10814_v32  ;;  %v5128_v34 = vsel %vm5111_vm11, %v3034_v28, %v5127_v23 }
 0x454   : > { %5265 = vmatprep.mubr.f32.mxu1 %v5128_v34 }
 0x45a   : > { %6514 = vmatmul.mubr.msk.bf16.vlgmr.msra.gmra.mrb[128].mxu0 %vm9779_vm15, %v10815_v63  ;;  %5266 = vmatmul.mubr.f32.vlgmr.msra.gmra.mrb[128].mxu1 %v10816_v50 }
 0x45b   : > { %6517 = vmatprep.mubr.bf16.mxu0 %v10817_v58  ;;  %6614 = vmatpush3.bf16.msra.mxu1 %v6613_v57 }
 0x45c   : > { %6615 = vmatprep.subr.bf16.mxu1 %v7283_v35  ;;  %6577 = vmatprep.mubr.msk.f32.mxu1 %vm7284_vm0, %v7285_v60 }
 0x45f   : > { %6617 = vmatpush3.bf16.msra.mxu1 %v6616_v59 }
 0x460   : > { %6618 = vmatprep.subr.bf16.mxu1 %v7283_v35 }
 0x462   : > { %6518 = vmatmul.mubr.msk.bf16.gmra.mrb[132].mxu0 %vm9779_vm15, %v10818_v29 }
 0x463   : > { %6521 = vmatprep.mubr.bf16.mxu0 %v9886_v26  ;;  %6620 = vmatpush3.bf16.msra.mxu1 %v6619_v2  ;;  %v5193_v2 = vld [vmem:[#allocation17 + $0x178] sm:$0xff] }
 0x464   : > { %6621 = vmatprep.subr.bf16.mxu1 %v7283_v35 }
 0x46a   : > { %6522 = vmatmul.mubr.msk.bf16.gmra.mrb[136].mxu0 %vm9779_vm15, %v9852_v30 }
 0x46b   : > { %6525 = vmatprep.mubr.bf16.mxu0 %v9935_v40 }
 0x472   : > { %6526 = vmatmul.mubr.msk.bf16.gmra.mrb[140].mxu0 %vm9779_vm15, %v9884_v48 }
 0x473   : > { %6529 = vmatprep.mubr.bf16.mxu0 %v10002_v31 }
 0x47a   : > { %6530 = vmatmul.mubr.msk.bf16.gmra.mrb[144].mxu0 %vm9779_vm15, %v9977_v18 }
 0x47b   : > { %6533 = vmatprep.mubr.bf16.mxu0 %v10049_v19 }
 0x482   : > { %6534 = vmatmul.mubr.msk.bf16.gmra.mrb[148].mxu0 %vm9779_vm15, %v10034_v41 }
 0x483   : > { %6537 = vmatprep.mubr.bf16.mxu0 %v4033_v22 }
 0x48a   : > { %6538 = vmatmul.mubr.msk.bf16.gmra.mrb[152].mxu0 %vm9779_vm15, %v10053_v17 }
 0x48b   : > { %6541 = vmatprep.mubr.bf16.mxu0 %v4035_v54 }
 0x492   : > { %6542 = vmatmul.mubr.msk.bf16.gmra.mrb[156].mxu0 %vm9779_vm15, %v5773_v11 }
 0x4e5   : > { %v6419_v30 = vpop.f32.mrb[96].mxu0  ;;  %v6467_v48 = vpop.f32.mrb[96].mxu1 }
 0x4e6   : > { %v4135_v26 = vpop.f32.mrb[97].mxu0  ;;  %v4360_v40 = vpop.f32.mrb[97].mxu1  ;;  %v4503_v19 = vrot.slane %v6467_v48, 1  ;;  %v6622_v48 = vpack.c.bf16 %v5185_v20, %v5184_v25 }
 0x4e7   : > { %v4487_v18 = vrot.slane %v4360_v40, 1  ;;  %v6420_v31 = vpop.f32.mrb[98].mxu0  ;;  %v6468_v51 = vpop.f32.mrb[98].mxu1  ;;  %v5186_v40 = vld [vmem:[#allocation17 + $0x140] sm:$0xff] }
 0x4e8   : > { %v4511_v55 = vrot.slane %v6468_v51, 1  ;;  %v4138_v13 = vpop.f32.mrb[99].mxu0  ;;  %v4363_v41 = vpop.f32.mrb[99].mxu1  ;;  %6623 = vmatpush3.bf16.msra.mxu1 %v6622_v48 }
 0x4e9   : > { %v4495_v62 = vrot.slane %v4363_v41, 1  ;;  %6624 = vmatprep.subr.bf16.mxu1 %v7283_v35 }
 0x4ea   : > { %v4519_v46 = vsel %vm2461_vm12, %v4503_v19, %v4511_v55  ;;  %v4543_v0 = vsel %vm2461_vm12, %v4511_v55, %v4487_v18 }
 0x4eb   : > { %v10134_v36 = vadd.f32 %v6419_v30, %v4519_v46  ;;  %v10136_v1 = vadd.f32 %v6420_v31, %v4543_v0  ;;  %v4527_v17 = vsel %vm2461_vm12, %v4495_v62, %v4503_v19  ;;  %v4535_v53 = vsel %vm2461_vm12, %v4487_v18, %v4495_v62  ;;  %v5187_v18 = vld [vmem:[#allocation17 + $0x148] sm:$0xff] }
 0x4ec   : > { %v10142_v38 = vadd.f32 %v4535_v53, %v4135_v26  ;;  %v10144_v24 = vadd.f32 %v4527_v17, %v4138_v13  ;;  %v6625_v0 = vpack.c.bf16 %v5187_v18, %v5186_v40  ;;  %v5188_v17 = vld [vmem:[#allocation17 + $0x150] sm:$0xff]  ;;  %v5189_v53 = vld [vmem:[#allocation17 + $0x158] sm:$0xff] }
 0x4ee   : > { %6626 = vmatpush3.bf16.msra.mxu1 %v6625_v0 }
 0x4ef   : > { %6627 = vmatprep.subr.bf16.mxu1 %v7283_v35 }
 0x4f1   : > { %v6423_v44 = vpop.f32.mrb[100].mxu0  ;;  %v6471_v33 = vpop.f32.mrb[100].mxu1 }
 0x4f2   : > { %v4151_v52 = vpop.f32.mrb[101].mxu0  ;;  %v4376_v8 = vpop.f32.mrb[101].mxu1  ;;  %v4504_v56 = vrot.slane %v6471_v33, 1 }
 0x4f3   : > { %v4488_v4 = vrot.slane %v4376_v8, 1  ;;  %v6424_v37 = vpop.f32.mrb[102].mxu0  ;;  %v6472_v14 = vpop.f32.mrb[102].mxu1 }
 0x4f4   : > { %v4512_v42 = vrot.slane %v6472_v14, 1  ;;  %v4154_v22 = vpop.f32.mrb[103].mxu0  ;;  %v4379_v7 = vpop.f32.mrb[103].mxu1  ;;  %v5191_v14 = vld [vmem:[#allocation17 + $0x168] sm:$0xff] }
 0x4f5   : > { %v4496_v61 = vrot.slane %v4379_v7, 1 }
 0x4f6   : > { %v4520_v11 = vsel %vm2461_vm12, %v4504_v56, %v4512_v42  ;;  %v4544_v5 = vsel %vm2461_vm12, %v4512_v42, %v4488_v4 }
 0x4f7   : > { %v10152_v39 = vadd.f32 %v6423_v44, %v4520_v11  ;;  %v10154_v6 = vadd.f32 %v6424_v37, %v4544_v5  ;;  %v4528_v10 = vsel %vm2461_vm12, %v4496_v61, %v4504_v56  ;;  %v4536_v15 = vsel %vm2461_vm12, %v4488_v4, %v4496_v61  ;;  %v5190_v37 = vld [vmem:[#allocation17 + $0x160] sm:$0xff] }
 0x4f8   : > { %v10160_v54 = vadd.f32 %v4536_v15, %v4151_v52  ;;  %v10162_v47 = vadd.f32 %v4528_v10, %v4154_v22  ;;  %v6628_v4 = vpack.c.bf16 %v5189_v53, %v5188_v17  ;;  %v6631_v45 = vpack.c.bf16 %v5191_v14, %v5190_v37  ;;  %v5192_v15 = vld [vmem:[#allocation17 + $0x170] sm:$0xff] }
 0x4f9   : > { %v6427_v43 = vpop.f32.mrb[104].mxu0  ;;  %v6475_v16 = vpop.f32.mrb[104].mxu1 }
 0x4fa   : > { %v4167_v28 = vpop.f32.mrb[105].mxu0  ;;  %v4392_v23 = vpop.f32.mrb[105].mxu1  ;;  %v4505_v50 = vrot.slane %v6475_v16, 1  ;;  %6629 = vmatpush3.bf16.msra.mxu1 %v6628_v4 }
 0x4fb   : > { %v4489_v32 = vrot.slane %v4392_v23, 1  ;;  %v6428_v34 = vpop.f32.mrb[106].mxu0  ;;  %v6476_v63 = vpop.f32.mrb[106].mxu1  ;;  %6630 = vmatprep.subr.bf16.mxu1 %v7283_v35 }
 0x4fc   : > { %v4513_v58 = vrot.slane %v6476_v63, 1  ;;  %v4170_v29 = vpop.f32.mrb[107].mxu0  ;;  %v4395_v30 = vpop.f32.mrb[107].mxu1 }
 0x4fd   : > { %v4497_v26 = vrot.slane %v4395_v30, 1 }
 0x4fe   : > { %v4521_v31 = vsel %vm2461_vm12, %v4505_v50, %v4513_v58  ;;  %v4545_v51 = vsel %vm2461_vm12, %v4513_v58, %v4489_v32  ;;  %6632 = vmatpush3.bf16.msra.mxu1 %v6631_v45 }
 0x4ff   : > { %v10170_v19 = vadd.f32 %v6427_v43, %v4521_v31  ;;  %v10172_v55 = vadd.f32 %v6428_v34, %v4545_v51  ;;  %v4529_v13 = vsel %vm2461_vm12, %v4497_v26, %v4505_v50  ;;  %v4537_v41 = vsel %vm2461_vm12, %v4489_v32, %v4497_v26  ;;  %6633 = vmatprep.subr.bf16.mxu1 %v7283_v35 }
 0x500   : > { %v10178_v62 = vadd.f32 %v4537_v41, %v4167_v28  ;;  %v10180_v46 = vadd.f32 %v4529_v13, %v4170_v29  ;;  %v6634_v28 = vpack.c.bf16 %v5193_v2, %v5192_v15 }
 0x502   : > { %6635 = vmatpush3.bf16.msra.mxu1 %v6634_v28 }
 0x503   : > { %v6431_v49 = vpop.f32.mrb[108].mxu0 }
 0x504   : > { %v6479_v3 = vpop.f32.mrb[108].mxu1  ;;  %v4183_v57 = vpop.f32.mrb[109].mxu0 }
 0x505   : > { %v4408_v44 = vpop.f32.mrb[109].mxu1  ;;  %v6432_v52 = vpop.f32.mrb[110].mxu0  ;;  %v4506_v56 = vrot.slane %v6479_v3, 1 }
 0x506   : > { %v4490_v33 = vrot.slane %v4408_v44, 1  ;;  %v6480_v8 = vpop.f32.mrb[110].mxu1  ;;  %v4186_v22 = vpop.f32.mrb[111].mxu0 }
 0x507   : > { %v4514_v42 = vrot.slane %v6480_v8, 1  ;;  %v4411_v7 = vpop.f32.mrb[111].mxu1 }
 0x508   : > { %v4498_v61 = vrot.slane %v4411_v7, 1 }
 0x509   : > { %v4522_v12 = vsel %vm2461_vm12, %v4506_v56, %v4514_v42  ;;  %v4546_v21 = vsel %vm2461_vm12, %v4514_v42, %v4490_v33 }
 0x50a   : > { %v10188_v11 = vadd.f32 %v6431_v49, %v4522_v12  ;;  %v10190_v5 = vadd.f32 %v6432_v52, %v4546_v21  ;;  %v4530_v59 = vsel %vm2461_vm12, %v4498_v61, %v4506_v56  ;;  %v4538_v9 = vsel %vm2461_vm12, %v4490_v33, %v4498_v61 }
 0x50b   : > { %v10196_v60 = vadd.f32 %v4538_v9, %v4183_v57  ;;  %v10198_v10 = vadd.f32 %v4530_v59, %v4186_v22 }
 0x50c   : > { %v6435_v43 = vpop.f32.mrb[112].mxu0  ;;  %v6483_v16 = vpop.f32.mrb[112].mxu1 }
 0x50d   : > { %v4199_v25 = vpop.f32.mrb[113].mxu0  ;;  %v4424_v20 = vpop.f32.mrb[113].mxu1  ;;  %v4507_v63 = vrot.slane %v6483_v16, 1 }
 0x50e   : > { %v4491_v23 = vrot.slane %v4424_v20, 1  ;;  %v6436_v32 = vpop.f32.mrb[114].mxu0  ;;  %v6484_v34 = vpop.f32.mrb[114].mxu1 }
 0x50f   : > { %v4515_v50 = vrot.slane %v6484_v34, 1  ;;  %v4202_v58 = vpop.f32.mrb[115].mxu0  ;;  %v4427_v29 = vpop.f32.mrb[115].mxu1 }
 0x510   : > { %v4499_v30 = vrot.slane %v4427_v29, 1 }
 0x511   : > { %v4523_v48 = vsel %vm2461_vm12, %v4507_v63, %v4515_v50  ;;  %v4547_v26 = vsel %vm2461_vm12, %v4515_v50, %v4491_v23 }
 0x512   : > { %v10206_v40 = vadd.f32 %v6435_v43, %v4523_v48  ;;  %v10208_v18 = vadd.f32 %v6436_v32, %v4547_v26  ;;  %v4531_v31 = vsel %vm2461_vm12, %v4499_v30, %v4507_v63  ;;  %v4539_v35 = vsel %vm2461_vm12, %v4491_v23, %v4499_v30 }
 0x513   : > { %v10214_v51 = vadd.f32 %v4539_v35, %v4199_v25  ;;  %v10216_v13 = vadd.f32 %v4531_v31, %v4202_v58 }
 0x515   : > { %v6439_v41 = vpop.f32.mrb[116].mxu0  ;;  %v6487_v0 = vpop.f32.mrb[116].mxu1 }
 0x516   : > { %v4215_v17 = vpop.f32.mrb[117].mxu0  ;;  %v4440_v53 = vpop.f32.mrb[117].mxu1  ;;  %v4508_v44 = vrot.slane %v6487_v0, 1 }
 0x517   : > { %v4492_v49 = vrot.slane %v4440_v53, 1  ;;  %v6440_v3 = vpop.f32.mrb[118].mxu0  ;;  %v6488_v57 = vpop.f32.mrb[118].mxu1 }
 0x518   : > { %v4516_v33 = vrot.slane %v6488_v57, 1  ;;  %v4218_v52 = vpop.f32.mrb[119].mxu0  ;;  %v4443_v8 = vpop.f32.mrb[119].mxu1 }
 0x519   : > { %v4500_v4 = vrot.slane %v4443_v8, 1 }
 0x51a   : > { %v4524_v37 = vsel %vm2461_vm12, %v4508_v44, %v4516_v33  ;;  %v4548_v14 = vsel %vm2461_vm12, %v4516_v33, %v4492_v49 }
 0x51b   : > { %v10222_v56 = vadd.f32 %v6439_v41, %v4524_v37  ;;  %v10224_v42 = vadd.f32 %v6440_v3, %v4548_v14  ;;  %v4532_v22 = vsel %vm2461_vm12, %v4500_v4, %v4508_v44  ;;  %v4540_v7 = vsel %vm2461_vm12, %v4492_v49, %v4500_v4 }
 0x51c   : > { %v10230_v61 = vadd.f32 %v4540_v7, %v4215_v17  ;;  %v10232_v12 = vadd.f32 %v4532_v22, %v4218_v52 }
 0x51d   : > { %v6443_v21 = vpop.f32.mrb[120].mxu0  ;;  %v6491_v45 = vpop.f32.mrb[120].mxu1 }
 0x51e   : > { %v4231_v59 = vpop.f32.mrb[121].mxu0  ;;  %v4456_v9 = vpop.f32.mrb[121].mxu1  ;;  %v4509_v16 = vrot.slane %v6491_v45, 1 }
 0x51f   : > { %v4493_v15 = vrot.slane %v4456_v9, 1  ;;  %v6444_v2 = vpop.f32.mrb[122].mxu0  ;;  %v6492_v43 = vpop.f32.mrb[122].mxu1 }
 0x520   : > { %v4517_v25 = vrot.slane %v6492_v43, 1  ;;  %v4234_v20 = vpop.f32.mrb[123].mxu0  ;;  %v4459_v28 = vpop.f32.mrb[123].mxu1 }
 0x521   : > { %v4501_v23 = vrot.slane %v4459_v28, 1 }
 0x522   : > { %v4525_v32 = vsel %vm2461_vm12, %v4509_v16, %v4517_v25  ;;  %v4549_v34 = vsel %vm2461_vm12, %v4517_v25, %v4493_v15 }
 0x523   : > { %v10238_v63 = vadd.f32 %v6443_v21, %v4525_v32  ;;  %v10240_v50 = vadd.f32 %v6444_v2, %v4549_v34  ;;  %v4533_v58 = vsel %vm2461_vm12, %v4501_v23, %v4509_v16  ;;  %v4541_v29 = vsel %vm2461_vm12, %v4493_v15, %v4501_v23 }
 0x524   : > { %v10246_v30 = vadd.f32 %v4541_v29, %v4231_v59  ;;  %v10248_v48 = vadd.f32 %v4533_v58, %v4234_v20  ;;  %v10272_v58 = vld [vmem:[#allocation16] ss:$0 sm:$0xff] }
 0x525   : > { %v6447_v26 = vpop.f32.mrb[124].mxu0  ;;  %v6495_v31 = vpop.f32.mrb[124].mxu1 }
 0x526   : > { %v4247_v35 = vpop.f32.mrb[125].mxu0  ;;  %v4472_v41 = vpop.f32.mrb[125].mxu1  ;;  %v4510_v49 = vrot.slane %v6495_v31, 1 }
 0x527   : > { %v4494_v0 = vrot.slane %v4472_v41, 1  ;;  %v6448_v17 = vpop.f32.mrb[126].mxu0  ;;  %v6496_v53 = vpop.f32.mrb[126].mxu1 }
 0x528   : > { %v4518_v3 = vrot.slane %v6496_v53, 1  ;;  %v4250_v57 = vpop.f32.mrb[127].mxu0  ;;  %v4475_v44 = vpop.f32.mrb[127].mxu1 }
 0x529   : > { %v4502_v33 = vrot.slane %v4475_v44, 1 }
 0x52a   : > { %v4526_v52 = vsel %vm2461_vm12, %v4510_v49, %v4518_v3  ;;  %v4550_v8 = vsel %vm2461_vm12, %v4518_v3, %v4494_v0 }
 0x52b   : > { %v10254_v4 = vadd.f32 %v6447_v26, %v4526_v52  ;;  %v10256_v37 = vadd.f32 %v6448_v17, %v4550_v8  ;;  %v4534_v14 = vsel %vm2461_vm12, %v4502_v33, %v4510_v49  ;;  %v4542_v22 = vsel %vm2461_vm12, %v4494_v0, %v4502_v33 }
 0x52c   : > { %v10262_v7 = vadd.f32 %v4542_v22, %v4247_v35  ;;  %v10264_v21 = vadd.f32 %v4534_v14, %v4250_v57 }
 0x52d   : > { %v6515_v45 = vpop.f32.mrb[128].mxu0  ;;  %v6093_v59 = vpop.f32.mrb[128].mxu1 }
 0x52e   : > { %v4681_v9 = vpop.f32.mrb[129].mxu0  ;;  %v6094_v15 = vpop.f32.mrb[129].mxu1  ;;  %v4824_v25 = vrot.slane %v6515_v45, 2 }
 0x52f   : > { %v4808_v2 = vrot.slane %v4681_v9, 2  ;;  %v10266_v43 = vadd.f32 %v6094_v15, %v6093_v59  ;;  %v6516_v16 = vpop.f32.mrb[130].mxu0 }
 0x530   : > { %v4832_v20 = vrot.slane %v6516_v16, 2  ;;  %v4684_v28 = vpop.f32.mrb[131].mxu0 }
 0x531   : > { %v4816_v23 = vrot.slane %v4684_v28, 2 }
 0x532   : > { %v4840_v32 = vsel %vm2783_vm13, %v4824_v25, %v4832_v20  ;;  %v4864_v34 = vsel %vm2783_vm13, %v4832_v20, %v4808_v2 }
 0x533   : > { %v4874_v29 = vadd.f32 %v4840_v32, %v10134_v36  ;;  %v4875_v26 = vadd.f32 %v4864_v34, %v10136_v1  ;;  %v4848_v31 = vsel %vm2783_vm13, %v4816_v23, %v4824_v25  ;;  %v4856_v35 = vsel %vm2783_vm13, %v4808_v2, %v4816_v23 }
 0x534   : > { %v4872_v41 = vadd.f32 %v4856_v35, %v10142_v38  ;;  %v4873_v0 = vadd.f32 %v4848_v31, %v10144_v24  ;;  %v10819_v38 = vld [vmem:[#allocation67_spill] sm:$0xff] }
 0x535   : > { %v4914_v17 = vadd.f32 %v10272_v58, %v4875_v26  ;;  %v6519_v53 = vpop.f32.mrb[132].mxu0  ;;  %v4913_v49 = vadd.f32 %v10272_v58, %v4874_v29  ;;  %vm4946_vm1 = vcmp.lt.s32.totalorder %v10819_v38, 26 }
 0x536   : > { %v4911_v3 = vadd.f32 %v10272_v58, %v4872_v41  ;;  %v4912_v36 = vadd.f32 %v10272_v58, %v4873_v0  ;;  %v4697_v1 = vpop.f32.mrb[133].mxu0  ;;  %v4825_v8 = vrot.slane %v6519_v53, 2 }
 0x537   : > { %v4809_v57 = vrot.slane %v4697_v1, 2  ;;  %v6520_v44 = vpop.f32.mrb[134].mxu0  ;;  %v4950_v24 = vmax.f32 %v4914_v17, 0.0  ;;  %v4949_v59 = vmax.f32 %v4913_v49, 0.0 }
 0x538   : > { %v4947_v33 = vmax.f32 %v4911_v3, 0.0  ;;  %v4948_v52 = vmax.f32 %v4912_v36, 0.0  ;;  %v4833_v14 = vrot.slane %v6520_v44, 2  ;;  %v4700_v22 = vpop.f32.mrb[135].mxu0 }
 0x539   : > { %v4817_v45 = vrot.slane %v4700_v22, 2  ;;  %v4990_v29 = vsel %vm4946_vm1, %v4950_v24, 0.0 }
 0x53a   : > { %v5019_v9 = vmax.f32 %v4947_v33, %v4948_v52  ;;  %v4841_v15 = vsel %vm2783_vm13, %v4825_v8, %v4833_v14  ;;  %v4865_v2 = vsel %vm2783_vm13, %v4833_v14, %v4809_v57 }
 0x53b   : > { %v4878_v16 = vadd.f32 %v4841_v15, %v10152_v39  ;;  %v4879_v25 = vadd.f32 %v4865_v2, %v10154_v6  ;;  %v4849_v20 = vsel %vm2783_vm13, %v4817_v45, %v4825_v8  ;;  %v4857_v28 = vsel %vm2783_vm13, %v4809_v57, %v4817_v45 }
 0x53c   : > { %v5020_v23 = vmax.f32 %v5019_v9, %v4949_v59  ;;  %v4876_v32 = vadd.f32 %v4857_v28, %v10160_v54  ;;  %v4877_v34 = vadd.f32 %v4849_v20, %v10162_v47 }
 0x53d   : > { %v4917_v26 = vadd.f32 %v10272_v58, %v4878_v16  ;;  %v4918_v39 = vadd.f32 %v10272_v58, %v4879_v25  ;;  %v6523_v31 = vpop.f32.mrb[136].mxu0 }
 0x53e   : > { %v5021_v6 = vmax.f32 %v5020_v23, %v4990_v29  ;;  %v4915_v35 = vadd.f32 %v10272_v58, %v4876_v32  ;;  %v4916_v41 = vadd.f32 %v10272_v58, %v4877_v34  ;;  %v4713_v0 = vpop.f32.mrb[137].mxu0  ;;  %v4826_v17 = vrot.slane %v6523_v31, 2 }
 0x53f   : > { %v4810_v53 = vrot.slane %v4713_v0, 2  ;;  %v6524_v49 = vpop.f32.mrb[138].mxu0  ;;  %v4953_v57 = vmax.f32 %v4917_v26, 0.0  ;;  %v4954_v44 = vmax.f32 %v4918_v39, 0.0 }
 0x540   : > { %v5022_v54 = vrot.slane %v5021_v6, 4  ;;  %v4951_v3 = vmax.f32 %v4915_v35, 0.0  ;;  %v4952_v47 = vmax.f32 %v4916_v41, 0.0  ;;  %v4834_v36 = vrot.slane %v6524_v49, 2  ;;  %v4716_v1 = vpop.f32.mrb[139].mxu0 }
 0x541   : > { %v4818_v33 = vrot.slane %v4716_v1, 2  ;;  %v4994_v20 = vsel %vm4946_vm1, %v4954_v44, 0.0 }
 0x542   : > { %v5023_v52 = vmax.f32 %v5021_v6, %v5022_v54  ;;  %v5028_v8 = vmax.f32 %v4951_v3, %v4952_v47  ;;  %v4842_v14 = vsel %vm2783_vm13, %v4826_v17, %v4834_v36  ;;  %v4866_v22 = vsel %vm2783_vm13, %v4834_v36, %v4810_v53 }
 0x543   : > { %v4882_v24 = vadd.f32 %v4842_v14, %v10170_v19  ;;  %v4883_v45 = vadd.f32 %v4866_v22, %v10172_v55  ;;  %v4850_v59 = vsel %vm2783_vm13, %v4818_v33, %v4826_v17  ;;  %v4858_v9 = vsel %vm2783_vm13, %v4810_v53, %v4818_v33 }
 0x544   : > { %v5024_v15 = vrot.slane %v5023_v52, 2  ;;  %v5029_v2 = vmax.f32 %v5028_v8, %v4953_v57  ;;  %v4880_v16 = vadd.f32 %v4858_v9, %v10178_v62  ;;  %v4881_v25 = vadd.f32 %v4850_v59, %v10180_v46 }
 0x545   : > { %v4921_v28 = vadd.f32 %v10272_v58, %v4882_v24  ;;  %v4922_v19 = vadd.f32 %v10272_v58, %v4883_v45  ;;  %v6527_v55 = vpop.f32.mrb[140].mxu0 }
 0x546   : > { %v5025_v23 = vmax.f32 %v5023_v52, %v5024_v15  ;;  %v5030_v32 = vmax.f32 %v5029_v2, %v4994_v20  ;;  %v4919_v34 = vadd.f32 %v10272_v58, %v4880_v16  ;;  %v4920_v29 = vadd.f32 %v10272_v58, %v4881_v25  ;;  %v4729_v26 = vpop.f32.mrb[141].mxu0 }
 0x547   : > { %v4811_v39 = vrot.slane %v4729_v26, 2  ;;  %v6528_v31 = vpop.f32.mrb[142].mxu0  ;;  %v4958_v41 = vmax.f32 %v4922_v19, 0.0  ;;  %v4827_v0 = vrot.slane %v6527_v55, 2  ;;  %v4957_v3 = vmax.f32 %v4921_v28, 0.0 }
 0x548   : > { %v5031_v62 = vrot.slane %v5030_v32, 4  ;;  %v4955_v6 = vmax.f32 %v4919_v34, 0.0  ;;  %v4956_v46 = vmax.f32 %v4920_v29, 0.0  ;;  %v4732_v35 = vpop.f32.mrb[143].mxu0  ;;  %v4835_v17 = vrot.slane %v6528_v31, 2 }
 0x549   : > { %v4819_v53 = vrot.slane %v4732_v35, 2  ;;  %v5026_v49 = vrot.slane %v5025_v23, 1  ;;  %v4998_v22 = vsel %vm4946_vm1, %v4958_v41, 0.0 }
 0x54a   : > { %v5032_v54 = vmax.f32 %v5030_v32, %v5031_v62  ;;  %v5037_v47 = vmax.f32 %v4955_v6, %v4956_v46  ;;  %v4843_v36 = vsel %vm2783_vm13, %v4827_v0, %v4835_v17  ;;  %v4867_v1 = vsel %vm2783_vm13, %v4835_v17, %v4811_v39 }
 0x54b   : > { %v4851_v57 = vsel %vm2783_vm13, %v4819_v53, %v4827_v0  ;;  %v4859_v44 = vsel %vm2783_vm13, %v4811_v39, %v4819_v53  ;;  %v4886_v8 = vadd.f32 %v4843_v36, %v10188_v11  ;;  %v4887_v14 = vadd.f32 %v4867_v1, %v10190_v5 }
 0x54c   : > { %v5033_v33 = vrot.slane %v5032_v54, 2  ;;  %v5038_v52 = vmax.f32 %v5037_v47, %v4957_v3  ;;  %v4884_v24 = vadd.f32 %v4859_v44, %v10196_v60  ;;  %v4885_v45 = vadd.f32 %v4851_v57, %v10198_v10 }
 0x54d   : > { %v6531_v59 = vpop.f32.mrb[144].mxu0  ;;  %v4925_v2 = vadd.f32 %v10272_v58, %v4886_v8  ;;  %v4926_v16 = vadd.f32 %v10272_v58, %v4887_v14  ;;  %v5027_v19 = vmax.f32 %v5025_v23, %v5026_v49 }
 0x54e   : > { %v5034_v9 = vmax.f32 %v5032_v54, %v5033_v33  ;;  %v5039_v15 = vmax.f32 %v5038_v52, %v4998_v22  ;;  %v4745_v25 = vpop.f32.mrb[145].mxu0  ;;  %v4923_v20 = vadd.f32 %v10272_v58, %v4884_v24  ;;  %v4924_v11 = vadd.f32 %v10272_v58, %v4885_v45 }
 0x54f   : > { %v4812_v5 = vrot.slane %v4745_v25, 2  ;;  %v6532_v28 = vpop.f32.mrb[146].mxu0  ;;  %v4828_v60 = vrot.slane %v6531_v59, 2  ;;  %v4961_v6 = vmax.f32 %v4925_v2, 0.0  ;;  %v4962_v46 = vmax.f32 %v4926_v16, 0.0 }
 0x550   : > { %v5035_v55 = vrot.slane %v5034_v9, 1  ;;  %v5040_v32 = vrot.slane %v5039_v15, 4  ;;  %v4748_v34 = vpop.f32.mrb[147].mxu0  ;;  %v4959_v10 = vmax.f32 %v4923_v20, 0.0  ;;  %v4960_v29 = vmax.f32 %v4924_v11, 0.0 }
 0x551   : > { %v4836_v26 = vrot.slane %v6532_v28, 2  ;;  %v4820_v39 = vrot.slane %v4748_v34, 2  ;;  %v5002_v33 = vsel %vm4946_vm1, %v4962_v46, 0.0 }
 0x552   : > { %v5036_v31 = vmax.f32 %v5034_v9, %v5035_v55  ;;  %v5041_v62 = vmax.f32 %v5039_v15, %v5040_v32  ;;  %v5046_v35 = vmax.f32 %v4959_v10, %v4960_v29 }
 0x553   : > { %v4844_v41 = vsel %vm2783_vm13, %v4828_v60, %v4836_v26  ;;  %v4868_v0 = vsel %vm2783_vm13, %v4836_v26, %v4812_v5  ;;  %v4852_v23 = vsel %vm2783_vm13, %v4820_v39, %v4828_v60  ;;  %v4860_v54 = vsel %vm2783_vm13, %v4812_v5, %v4820_v39 }
 0x554   : > { %v5042_v17 = vrot.slane %v5041_v62, 2  ;;  %v4890_v53 = vadd.f32 %v4844_v41, %v10206_v40  ;;  %v4891_v49 = vadd.f32 %v4868_v0, %v10208_v18  ;;  %v5047_v3 = vmax.f32 %v5046_v35, %v4961_v6 }
 0x555   : > { %v4888_v47 = vadd.f32 %v4860_v54, %v10214_v51  ;;  %v4889_v36 = vadd.f32 %v4852_v23, %v10216_v13  ;;  %v6535_v1 = vpop.f32.mrb[148].mxu0  ;;  %v5138_v57 = vsel %vm5099_vm5, %v5036_v31, %v5027_v19 }
 0x556   : > { %v5043_v44 = vmax.f32 %v5041_v62, %v5042_v17  ;;  %v4929_v52 = vadd.f32 %v10272_v58, %v4890_v53  ;;  %v4930_v40 = vadd.f32 %v10272_v58, %v4891_v49  ;;  %v4761_v18 = vpop.f32.mrb[149].mxu0  ;;  %v5048_v8 = vmax.f32 %v5047_v3, %v5002_v33 }
 0x557   : > { %v4927_v14 = vadd.f32 %v10272_v58, %v4888_v47  ;;  %v4928_v22 = vadd.f32 %v10272_v58, %v4889_v36  ;;  %v4813_v51 = vrot.slane %v4761_v18, 2  ;;  %v6536_v24 = vpop.f32.mrb[150].mxu0  ;;  %v4829_v59 = vrot.slane %v6535_v1, 2 }
 0x558   : > { %v5044_v13 = vrot.slane %v5043_v44, 1  ;;  %v4965_v45 = vmax.f32 %v4929_v52, 0.0  ;;  %v4837_v9 = vrot.slane %v6536_v24, 2  ;;  %v4764_v15 = vpop.f32.mrb[151].mxu0  ;;  %v5049_v2 = vrot.slane %v5048_v8, 4 }
 0x559   : > { %v4963_v16 = vmax.f32 %v4927_v14, 0.0  ;;  %v4964_v25 = vmax.f32 %v4928_v22, 0.0  ;;  %v4821_v20 = vrot.slane %v4764_v15, 2  ;;  %v4966_v11 = vmax.f32 %v4930_v40, 0.0 }
 0x55a   : > { %v4845_v5 = vsel %vm2783_vm13, %v4829_v59, %v4837_v9  ;;  %v4869_v28 = vsel %vm2783_vm13, %v4837_v9, %v4813_v51  ;;  %v5045_v19 = vmax.f32 %v5043_v44, %v5044_v13  ;;  %v5050_v55 = vmax.f32 %v5048_v8, %v5049_v2 }
 0x55b   : > { %v5055_v32 = vmax.f32 %v4963_v16, %v4964_v25  ;;  %v4894_v60 = vadd.f32 %v4845_v5, %v10222_v56  ;;  %v4895_v34 = vadd.f32 %v4869_v28, %v10224_v42  ;;  %v4853_v10 = vsel %vm2783_vm13, %v4821_v20, %v4829_v59 }
 0x55c   : > { %v4861_v29 = vsel %vm2783_vm13, %v4813_v51, %v4821_v20  ;;  %v5139_v26 = vsel %vm5101_vm6, %v5045_v19, %v5138_v57  ;;  %v5051_v39 = vrot.slane %v5050_v55, 2  ;;  %v5006_v56 = vsel %vm4946_vm1, %v4966_v11, 0.0 }
 0x55d   : > { %v5056_v31 = vmax.f32 %v5055_v32, %v4965_v45  ;;  %v4933_v62 = vadd.f32 %v10272_v58, %v4894_v60  ;;  %v4934_v6 = vadd.f32 %v10272_v58, %v4895_v34  ;;  %v6539_v46 = vpop.f32.mrb[152].mxu0  ;;  %v4892_v42 = vadd.f32 %v4861_v29, %v10230_v61 }
 0x55e   : > { %v4893_v35 = vadd.f32 %v4853_v10, %v10232_v12  ;;  %v4777_v41 = vpop.f32.mrb[153].mxu0  ;;  %v5052_v0 = vmax.f32 %v5050_v55, %v5051_v39  ;;  %v4830_v53 = vrot.slane %v6539_v46, 2 }
 0x55f   : > { %v5057_v23 = vmax.f32 %v5056_v31, %v5006_v56  ;;  %v4969_v17 = vmax.f32 %v4933_v62, 0.0  ;;  %v6540_v49 = vpop.f32.mrb[154].mxu0  ;;  %v4931_v54 = vadd.f32 %v10272_v58, %v4892_v42  ;;  %v4814_v47 = vrot.slane %v4777_v41, 2 }
 0x560   : > { %v4932_v3 = vadd.f32 %v10272_v58, %v4893_v35  ;;  %v4838_v36 = vrot.slane %v6540_v49, 2  ;;  %v4780_v1 = vpop.f32.mrb[155].mxu0  ;;  %v4970_v44 = vmax.f32 %v4934_v6, 0.0  ;;  %v5053_v52 = vrot.slane %v5052_v0, 1 }
 0x561   : > { %v5058_v57 = vrot.slane %v5057_v23, 4  ;;  %v4822_v33 = vrot.slane %v4780_v1, 2  ;;  %v4967_v61 = vmax.f32 %v4931_v54, 0.0 }
 0x562   : > { %v4968_v40 = vmax.f32 %v4932_v3, 0.0  ;;  %v4846_v12 = vsel %vm2783_vm13, %v4830_v53, %v4838_v36  ;;  %v4870_v18 = vsel %vm2783_vm13, %v4838_v36, %v4814_v47  ;;  %v5054_v59 = vmax.f32 %v5052_v0, %v5053_v52 }
 0x563   : > { %v5059_v8 = vmax.f32 %v5057_v23, %v5058_v57  ;;  %v4898_v14 = vadd.f32 %v4846_v12, %v10238_v63  ;;  %v4899_v22 = vadd.f32 %v4870_v18, %v10240_v50  ;;  %v4854_v51 = vsel %vm2783_vm13, %v4822_v33, %v4830_v53 }
 0x564   : > { %v5064_v24 = vmax.f32 %v4967_v61, %v4968_v40  ;;  %v4862_v13 = vsel %vm2783_vm13, %v4814_v47, %v4822_v33  ;;  %v4897_v45 = vadd.f32 %v4854_v51, %v10248_v48  ;;  %v5140_v11 = vsel %vm5103_vm7, %v5054_v59, %v5139_v26 }
 0x565   : > { %v5060_v9 = vrot.slane %v5059_v8, 2  ;;  %v4937_v15 = vadd.f32 %v10272_v58, %v4898_v14  ;;  %v4938_v2 = vadd.f32 %v10272_v58, %v4899_v22  ;;  %v4896_v16 = vadd.f32 %v4862_v13, %v10246_v30  ;;  %v6543_v63 = vpop.f32.mrb[156].mxu0 }
 0x566   : > { %v5065_v25 = vmax.f32 %v5064_v24, %v4969_v17  ;;  %v4936_v50 = vadd.f32 %v10272_v58, %v4897_v45  ;;  %v4793_v20 = vpop.f32.mrb[157].mxu0  ;;  %v5010_v5 = vsel %vm4946_vm1, %v4970_v44, 0.0  ;;  %v4831_v28 = vrot.slane %v6543_v63, 2 }
 0x567   : > { %v4935_v48 = vadd.f32 %v10272_v58, %v4896_v16  ;;  %v4815_v19 = vrot.slane %v4793_v20, 2  ;;  %v6544_v55 = vpop.f32.mrb[158].mxu0  ;;  %v5061_v30 = vmax.f32 %v5059_v8, %v5060_v9  ;;  %v4973_v29 = vmax.f32 %v4937_v15, 0.0 }
 0x568   : > { %v5066_v32 = vmax.f32 %v5065_v25, %v5010_v5  ;;  %v4972_v60 = vmax.f32 %v4936_v50, 0.0  ;;  %v4839_v34 = vrot.slane %v6544_v55, 2  ;;  %v4796_v10 = vpop.f32.mrb[159].mxu0  ;;  %v4974_v39 = vmax.f32 %v4938_v2, 0.0 }
 0x569   : > { %v4971_v31 = vmax.f32 %v4935_v48, 0.0  ;;  %v4823_v62 = vrot.slane %v4796_v10, 2  ;;  %v5062_v56 = vrot.slane %v5061_v30, 1 }
 0x56a   : > { %v5067_v6 = vrot.slane %v5066_v32, 4  ;;  %v4847_v26 = vsel %vm2783_vm13, %v4831_v28, %v4839_v34  ;;  %v4871_v46 = vsel %vm2783_vm13, %v4839_v34, %v4815_v19  ;;  %v5014_v54 = vsel %vm4946_vm1, %v4974_v39, 0.0 }
 0x56b   : > { %v5073_v42 = vmax.f32 %v4971_v31, %v4972_v60  ;;  %v4902_v35 = vadd.f32 %v4847_v26, %v10254_v4  ;;  %v4903_v41 = vadd.f32 %v4871_v46, %v10256_v37  ;;  %v4855_v0 = vsel %vm2783_vm13, %v4823_v62, %v4831_v28 }
 0x56c   : > { %v4863_v23 = vsel %vm2783_vm13, %v4815_v19, %v4823_v62  ;;  %v4901_v17 = vadd.f32 %v4855_v0, %v10264_v21  ;;  %v5063_v53 = vmax.f32 %v5061_v30, %v5062_v56  ;;  %v5068_v49 = vmax.f32 %v5066_v32, %v5067_v6 }
 0x56d   : > { %v5074_v3 = vmax.f32 %v5073_v42, %v4973_v29  ;;  %v4900_v47 = vadd.f32 %v4863_v23, %v10262_v7  ;;  %v4942_v4 = vadd.f32 %v10272_v58, %v4903_v41  ;;  %v4941_v27 = vadd.f32 %v10272_v58, %v4902_v35 }
 0x56e   : > { %v4940_v37 = vadd.f32 %v10272_v58, %v4901_v17  ;;  %v5069_v36 = vrot.slane %v5068_v49, 2  ;;  %v5141_v1 = vsel %vm5105_vm8, %v5063_v53, %v5140_v11  ;;  %v5840_v11 = vld [vmem:[#allocation19] ss:$0 sm:$0xff] }
 0x56f   : > { %v5075_v57 = vmax.f32 %v5074_v3, %v5014_v54  ;;  %v4939_v21 = vadd.f32 %v10272_v58, %v4900_v47  ;;  %v4978_v40 = vmax.f32 %v4942_v4, 0.0  ;;  %v4977_v18 = vmax.f32 %v4941_v27, 0.0 }
 0x570   : > { %v4976_v44 = vmax.f32 %v4940_v37, 0.0  ;;  %v5070_v33 = vmax.f32 %v5068_v49, %v5069_v36  ;;  %v5268_v5 = vadd.f32 %v10266_v43, %v5840_v11 }
 0x571   : > { %v4975_v52 = vmax.f32 %v4939_v21, 0.0  ;;  %v5076_v61 = vrot.slane %v5075_v57, 4  ;;  %v5018_v24 = vsel %vm4946_vm1, %v4978_v40, 0.0 }
 0x572   : > { %v5071_v12 = vrot.slane %v5070_v33, 1 }
 0x573   : > { %v5082_v7 = vmax.f32 %v4975_v52, %v4976_v44  ;;  %v5077_v8 = vmax.f32 %v5075_v57, %v5076_v61 }
 0x574   : > { %v5072_v14 = vmax.f32 %v5070_v33, %v5071_v12 }
 0x575   : > { %v5083_v22 = vmax.f32 %v5082_v7, %v4977_v18  ;;  %v5078_v51 = vrot.slane %v5077_v8, 2 }
 0x576   : > { %v5142_v13 = vsel %vm5107_vm9, %v5072_v14, %v5141_v1 }
 0x577   : > { %v5084_v58 = vmax.f32 %v5083_v22, %v5018_v24  ;;  %v5079_v45 = vmax.f32 %v5077_v8, %v5078_v51 }
 0x579   : > { %v5080_v59 = vrot.slane %v5079_v45, 1  ;;  %v5085_v9 = vrot.slane %v5084_v58, 4 }
 0x57b   : > { %v5081_v15 = vmax.f32 %v5079_v45, %v5080_v59  ;;  %v5086_v2 = vmax.f32 %v5084_v58, %v5085_v9 }
 0x57d   : > { %v5087_v16 = vrot.slane %v5086_v2, 2  ;;  %v5143_v63 = vsel %vm5109_vm10, %v5081_v15, %v5142_v13 }
 0x57f   : > { %v5088_v25 = vmax.f32 %v5086_v2, %v5087_v16 }
 0x581   : > { %v5089_v50 = vrot.slane %v5088_v25, 1 }
 0x583   : > { %v5090_v20 = vmax.f32 %v5088_v25, %v5089_v50 }
 0x585   : > { %v5144_v38 = vsel %vm5111_vm11, %v5090_v20, %v5143_v63 }
 0x586   : > { %6578 = vmatmul.mubr.f32.vlgmr.msra.gmra.mrb[130].mxu1 %v5144_v38 }
 0x659   : > { %v5337_v48 = vpop.f32.mrb[130].mxu1 }
 0x65a   : > { %v5338_v28 = vadd.f32 %v5337_v48, %v5268_v5  ;;  %v6579_v19 = vpop.f32.mrb[131].mxu1 }
 0x65c   : > { %5341 = vst [vmem:[%s534_s15] sm:$0xff] %v5338_v28 }
 0x65d   : > { %7190 = shalt.err (!%p7187_p8)
}
 0x65e   : > { %s7191_s21 = scalar_lea.hbm %s10429_s25, 128  ;;  %s7195_s12 = scalar_lea.hbm %s10820_s3, 256 }
 0x65f   : > { %p7192_p10 = scmp.ne.s32.totalorder %s10429_s25, %s7191_s21  ;;  %p7196_p12 = scmp.lt.u32.totalorder %s10429_s25, %s10820_s3 }
 0x660   : > { %p7197_p5 = scmp.lt.u32.totalorder %s7195_s12, %s7191_s21  ;;  %p7199_p4 = scmp.lt.u32.totalorder %s7191_s21, %s10429_s25 }
 0x661   : > { %p7193_p11 = pnand %p7192_p10, %p10821_p1 }
 0x662   : > { %p7198_p7 = por %p7197_p5, %p7196_p12 }
 0x663   : > { %p7194_p6 = pneg %p7193_p11 }
 0x664   : > { %p7200_p3 = por %p7199_p4, %p7198_p7 }
 0x666   : > { %p7201_p9 = pnand %p7200_p3, %p7194_p6 }
 0x668   : > { %7204 = shalt.err (!%p7201_p9)
}
 0x669   : > { %6678 = dma.vmem_to_hbm [thread:$0]  (%p10821_p1), %s10431_s16, 128, %s10429_s25, %s5343_s23  }
 0x66a PF: > { %s5368_s29 = sand.u32 1, %s7251_s17   ;;  %p10822_p13 = scmp.ne.s32.totalorder %s10556_s1, 0 }
 0x66b   : > { %p10823_p0 = scmp.ge.s32.totalorder %s7263_s20, 2  ;;  %s5369_s30 = scalar_lea.sflag [#allocation4], %s5368_s29 }
 0x66d   : > { %p6716_p2 = pnand %p10823_p0, %p10822_p13 }
 0x66f   : > { %7246 = dma.done.wait (!%p6716_p2), %s5369_s30, 128  }
 0x670   : > { %7248 = vsyncadd (!%p6716_p2), %s5369_s30, 4294967168  ;;  %p29_p8 = scmp.ge.s32.totalorder %s7597_s27, 4   ;;  %s10824_s17 = smov %s7255_s18 }
 0x671   : > { %s10825_s18 = smov %s7259_s19  ;;  %s10826_s19 = smov %s7608_s28 }
 0x672   : > { %s10827_s20 = smov %s7597_s27  ;;  %31 = sbr.rel (!%p29_p8) target bundleno = 15 (0xf), region = 149 }
 0x679   :  { %5374 = vsyncpa [#allocation3], 1 }
 0x67a   :  { %5376 = vsyncpa [#allocation3 + $0x1], 1 }
 0x67b   :  { %5377 = vsyncpa [#allocation6], 1 }
 0x67c   :  { %5378 = vsyncpa [#allocation9], 1 }
 0x67d   :  { %5379 = vsyncpa [#allocation12], 1 }
 0x67e   :  { %5380 = vsyncpa [#allocation15], 1 }
 0x67f   :  { %5381 = vsyncpa [#allocation18], 1 }
 0x680   :  { %5382 = vsyncpa [#allocation4], 1 }
 0x681   :  { %5384 = vsyncpa [#allocation4 + $0x1], 1 }

</bundles_post_ra>
